<compile_context>
chip_gen: v7x
topology: tpu7x:2x2x1
jax: 0.10.0
libtpu: 0.0.40
codegen_flags: <defaults>
</compile_context>

<pallas_src>
import jax
import jax.numpy as jnp
from jax.experimental import pallas as pl
from jax.experimental.pallas import tpu as pltpu


def encoder_rnn_kernel(x_ref, wih_ref, whh_ref, bih_ref, bhh_ref, h0_ref,
                       out_ref):
    """Multi-layer (bi)GRU forward for one batch block.

    Block shapes:
      x_ref   : (Bb, L, MAXW)       layer-0 input, zero-padded to MAXW
      wih_ref : (NL, ND*3H, MAXW)   W_ih for both directions, zero-padded
      whh_ref : (NL*ND, 3H, H)
      bih_ref : (NL, 1, ND*3H)
      bhh_ref : (NL*ND, 1, 3H)
      h0_ref  : (NL*ND, 1, H)       init_hidden (per layer / direction)
      out_ref : (Bb, L, NL*ND*H)    concat of every layer's sequence output
    """
    bb, seq_len, maxw = x_ref.shape
    n_layers, nd3h, _ = wih_ref.shape
    hidden = whh_ref.shape[-1]
    gates = 3 * hidden
    n_dirs = nd3h // gates
    layer_width = n_dirs * hidden

    cur = x_ref[...]                                          # (Bb, L, din)
    for layer in range(n_layers):
        din = cur.shape[-1]
        w_ih = wih_ref[layer]                                 # (ND*3H, MAXW)
        if din < maxw:
            w_ih = w_ih[:, :din]

        # Hoisted input projection for both directions at once:
        #   (Bb*L, din) @ W_ih^T -> (Bb*L, ND*3H); contraction on the last
        # dims, so no transposed copy of W_ih is materialized.
        gi = jax.lax.dot_general(
            cur.reshape(bb * seq_len, din), w_ih,
            dimension_numbers=(((1,), (1,)), ((), ())),
            preferred_element_type=jnp.float32)
        gi = (gi + bih_ref[layer]).reshape(bb, seq_len, nd3h)

        col0 = layer * layer_width
        for d in range(n_dirs):
            idx = layer * n_dirs + d
            w_hh = whh_ref[idx]                               # (3H, H)
            b_hh = bhh_ref[idx]                               # (1, 3H)
            h = jnp.broadcast_to(h0_ref[idx], (bb, hidden))   # (Bb, H)

            steps = range(seq_len) if d == 0 else range(seq_len - 1, -1, -1)
            for t in steps:
                gi_t = gi[:, t, d * gates:(d + 1) * gates]    # (Bb, 3H)
                gh = jax.lax.dot_general(
                    h, w_hh,
                    dimension_numbers=(((1,), (1,)), ((), ())),
                    preferred_element_type=jnp.float32) + b_hh
                r = jax.nn.sigmoid(gi_t[:, :hidden] + gh[:, :hidden])
                z = jax.nn.sigmoid(gi_t[:, hidden:2 * hidden]
                                   + gh[:, hidden:2 * hidden])
                n = jnp.tanh(gi_t[:, 2 * hidden:] + r * gh[:, 2 * hidden:])
                h = (1.0 - z) * n + z * h
                # Store straight into the lane-dense output block.
                c0 = col0 + d * hidden
                out_ref[:, t, c0:c0 + hidden] = h

        # Next layer's input = this layer's [fwd ++ bwd] output, read back
        # from the output block (avoids jnp.concatenate temporaries).
        cur = out_ref[:, :, col0:col0 + layer_width]


def _pick_block_b(batch):
    # Prefer >=2 grid steps when batch >= 2 (keeps both v7x TensorCores busy)
    # while batching up to 8 rows per step (fills f32 vreg sublanes).
    for cand in (8, 4, 2):
        if batch % cand == 0 and batch // cand >= 2:
            return cand
    return 1


def encoder_rnn_forward(x_pad, wih_all, whh_all, bih_all, bhh_all, h0_all,
                        *, block_b=None):
    batch, seq_len, maxw = x_pad.shape
    n_layers, nd3h, _ = wih_all.shape
    hidden = whh_all.shape[-1]
    n_dirs = nd3h // (3 * hidden)
    out_width = n_layers * n_dirs * hidden

    if block_b is None:
        block_b = _pick_block_b(batch)
    assert batch % block_b == 0

    return pl.pallas_call(
        encoder_rnn_kernel,
        out_shape=jax.ShapeDtypeStruct((batch, seq_len, out_width),
                                       x_pad.dtype),
        grid=(batch // block_b,),
        in_specs=[
            pl.BlockSpec((block_b, seq_len, maxw), lambda b: (b, 0, 0)),
            pl.BlockSpec(wih_all.shape, lambda b: (0, 0, 0)),
            pl.BlockSpec(whh_all.shape, lambda b: (0, 0, 0)),
            pl.BlockSpec(bih_all.shape, lambda b: (0, 0, 0)),
            pl.BlockSpec(bhh_all.shape, lambda b: (0, 0, 0)),
            pl.BlockSpec(h0_all.shape, lambda b: (0, 0, 0)),
        ],
        out_specs=pl.BlockSpec((block_b, seq_len, out_width),
                               lambda b: (b, 0, 0)),
        compiler_params=pltpu.CompilerParams(
            dimension_semantics=("parallel",)),
    )(x_pad, wih_all, whh_all, bih_all, bhh_all, h0_all)


# ----------------------------------------------------------------------------
# Host-side parameter construction / packing and a pure-JAX reference.
# ----------------------------------------------------------------------------
def make_params(key, input_size, hidden, n_layers, bidir):
    n_dirs = 2 if bidir else 1
    layers = []
    for i in range(n_layers):
        din = input_size if i == 0 else n_dirs * hidden
        dirs = []
        for _ in range(n_dirs):
            key, k1, k2, k3, k4, k5 = jax.random.split(key, 6)
            dirs.append(dict(
                w_ih=0.1 * jax.random.normal(k1, (3 * hidden, din),
                                             jnp.float32),
                w_hh=0.1 * jax.random.normal(k2, (3 * hidden, hidden),
                                             jnp.float32),
                b_ih=0.1 * jax.random.normal(k3, (3 * hidden,), jnp.float32),
                b_hh=0.1 * jax.random.normal(k4, (3 * hidden,), jnp.float32),
                h0=0.1 * jax.random.normal(k5, (hidden,), jnp.float32),
            ))
        layers.append(dirs)
    return layers


def pack_params(layers, input_size, hidden):
    n_layers = len(layers)
    n_dirs = len(layers[0])
    gates = 3 * hidden
    maxw = max(input_size, n_dirs * hidden)
    wih = jnp.zeros((n_layers, n_dirs * gates, maxw), jnp.float32)
    whh = jnp.zeros((n_layers * n_dirs, gates, hidden), jnp.float32)
    bih = jnp.zeros((n_layers, 1, n_dirs * gates), jnp.float32)
    bhh = jnp.zeros((n_layers * n_dirs, 1, gates), jnp.float32)
    h0 = jnp.zeros((n_layers * n_dirs, 1, hidden), jnp.float32)
    for i, dirs in enumerate(layers):
        for d, p in enumerate(dirs):
            din = p['w_ih'].shape[1]
            wih = wih.at[i, d * gates:(d + 1) * gates, :din].set(p['w_ih'])
            bih = bih.at[i, 0, d * gates:(d + 1) * gates].set(p['b_ih'])
            whh = whh.at[i * n_dirs + d].set(p['w_hh'])
            bhh = bhh.at[i * n_dirs + d, 0].set(p['b_hh'])
            h0 = h0.at[i * n_dirs + d, 0].set(p['h0'])
    return wih, whh, bih, bhh, h0, maxw


def _gru_layer_ref(x, p, reverse):
    batch, seq_len, _ = x.shape
    hidden = p['w_hh'].shape[1]
    h = jnp.broadcast_to(p['h0'][None, :], (batch, hidden))
    outs = [None] * seq_len
    steps = range(seq_len - 1, -1, -1) if reverse else range(seq_len)
    for t in steps:
        gi = x[:, t, :] @ p['w_ih'].T + p['b_ih']
        gh = h @ p['w_hh'].T + p['b_hh']
        i_r, i_z, i_n = jnp.split(gi, 3, axis=-1)
        h_r, h_z, h_n = jnp.split(gh, 3, axis=-1)
        r = jax.nn.sigmoid(i_r + h_r)
        z = jax.nn.sigmoid(i_z + h_z)
        n = jnp.tanh(i_n + r * h_n)
        h = (1.0 - z) * n + z * h
        outs[t] = h
    return jnp.stack(outs, axis=1)


def encoder_rnn_ref(x, layers):
    """Pure-JAX reference mirroring EncoderRNN.forward (eval mode,
    concat=True, return_last=False, input_lengths=None)."""
    cur = x
    feats = []
    for dirs in layers:
        outs = [_gru_layer_ref(cur, p, reverse=(d == 1))
                for d, p in enumerate(dirs)]
        cur = jnp.concatenate(outs, axis=-1) if len(outs) > 1 else outs[0]
        feats.append(cur)
    return jnp.concatenate(feats, axis=-1)


if __name__ == "__main__":
    BATCH, SEQ, INPUT_SIZE, NUM_UNITS = 2, 8, 32, 32
    NLAYERS, BIDIR = 2, True     # concat=True, return_last=False, eval mode

    key = jax.random.PRNGKey(0)
    key, kx = jax.random.split(key)
    x = jax.random.normal(kx, (BATCH, SEQ, INPUT_SIZE), dtype=jnp.float32)

    layers = make_params(key, INPUT_SIZE, NUM_UNITS, NLAYERS, BIDIR)
    wih, whh, bih, bhh, h0, maxw = pack_params(layers, INPUT_SIZE, NUM_UNITS)
    x_pad = (jnp.pad(x, ((0, 0), (0, 0), (0, maxw - INPUT_SIZE)))
             if maxw > INPUT_SIZE else x)

    out = encoder_rnn_forward(x_pad, wih, whh, bih, bhh, h0)
    out = jax.block_until_ready(out)

    ref = encoder_rnn_ref(x, layers)
    n_dirs = 2 if BIDIR else 1
    assert out.shape == (BATCH, SEQ, NLAYERS * n_dirs * NUM_UNITS)
    assert jnp.allclose(out, ref, rtol=1e-2, atol=1e-2), (
        float(jnp.max(jnp.abs(out - ref))))

    print("KERNEL_OK")
</pallas_src>

<mosaic_0001>
module attributes {stable_mosaic.version = 11 : i64} {
  func.func @encoder_rnn_kernel(%arg0: i32, %arg1: memref<1x8x64xf32, #tpu.memory_space<vmem>>, %arg2: memref<2x192x64xf32, #tpu.memory_space<vmem>>, %arg3: memref<4x96x32xf32, #tpu.memory_space<vmem>>, %arg4: memref<2x1x192xf32, #tpu.memory_space<vmem>>, %arg5: memref<4x1x96xf32, #tpu.memory_space<vmem>>, %arg6: memref<4x1x32xf32, #tpu.memory_space<vmem>>, %arg7: memref<1x8x128xf32, #tpu.memory_space<vmem>>) attributes {dimension_semantics = [#tpu.dimension_semantics<parallel>], iteration_bounds = array<i64: 2>, scalar_prefetch = 0 : i64, scratch_operands = 0 : i64, tpu.core_type = #tpu.core_type<tc>, window_params = [{transform_indices = @transform_0, window_bounds = array<i64: 1, 8, 64>}, {pipeline_mode = #tpu.pipeline_mode<synchronous>, transform_indices = @transform_1, window_bounds = array<i64: 2, 192, 64>}, {pipeline_mode = #tpu.pipeline_mode<synchronous>, transform_indices = @transform_2, window_bounds = array<i64: 4, 96, 32>}, {pipeline_mode = #tpu.pipeline_mode<synchronous>, transform_indices = @transform_3, window_bounds = array<i64: 2, 1, 192>}, {pipeline_mode = #tpu.pipeline_mode<synchronous>, transform_indices = @transform_4, window_bounds = array<i64: 4, 1, 96>}, {pipeline_mode = #tpu.pipeline_mode<synchronous>, transform_indices = @transform_5, window_bounds = array<i64: 4, 1, 32>}, {transform_indices = @transform_6, window_bounds = array<i64: 1, 8, 128>}]} {
    %c0 = arith.constant 0 : index
    %c0_0 = arith.constant 0 : index
    %c0_1 = arith.constant 0 : index
    %0 = vector.load %arg1[%c0, %c0_0, %c0_1] : memref<1x8x64xf32, #tpu.memory_space<vmem>>, vector<1x8x64xf32>
    %c0_2 = arith.constant 0 : index
    %c0_3 = arith.constant 0 : index
    %c0_4 = arith.constant 0 : index
    %1 = vector.load %arg2[%c0_2, %c0_3, %c0_4] : memref<2x192x64xf32, #tpu.memory_space<vmem>>, vector<1x192x64xf32>
    %2 = vector.shape_cast %1 : vector<1x192x64xf32> to vector<192x64xf32>
    %3 = vector.shape_cast %0 : vector<1x8x64xf32> to vector<8x64xf32>
    %cst = arith.constant dense<0.000000e+00> : vector<8x192xf32>
    %4 = tpu.matmul %3, %2, %cst {dimension_numbers = #tpu.dot_dimension_numbers<[1], [1], [0], [0], [0, 0, 1, 0], [], []>} : vector<8x64xf32>, vector<192x64xf32>, vector<8x192xf32> -> vector<8x192xf32>
    %c0_5 = arith.constant 0 : index
    %c0_6 = arith.constant 0 : index
    %c0_7 = arith.constant 0 : index
    %5 = vector.load %arg4[%c0_5, %c0_6, %c0_7] : memref<2x1x192xf32, #tpu.memory_space<vmem>>, vector<1x1x192xf32>
    %6 = vector.shape_cast %5 : vector<1x1x192xf32> to vector<1x192xf32>
    %7 = vector.broadcast %6 : vector<1x192xf32> to vector<8x192xf32>
    %8 = arith.addf %4, %7 : vector<8x192xf32>
    %9 = vector.shape_cast %8 : vector<8x192xf32> to vector<1x8x192xf32>
    %c0_8 = arith.constant 0 : index
    %c0_9 = arith.constant 0 : index
    %c0_10 = arith.constant 0 : index
    %10 = vector.load %arg3[%c0_8, %c0_9, %c0_10] : memref<4x96x32xf32, #tpu.memory_space<vmem>>, vector<1x96x32xf32>
    %11 = vector.shape_cast %10 : vector<1x96x32xf32> to vector<96x32xf32>
    %c0_11 = arith.constant 0 : index
    %c0_12 = arith.constant 0 : index
    %c0_13 = arith.constant 0 : index
    %12 = vector.load %arg5[%c0_11, %c0_12, %c0_13] : memref<4x1x96xf32, #tpu.memory_space<vmem>>, vector<1x1x96xf32>
    %13 = vector.shape_cast %12 : vector<1x1x96xf32> to vector<1x96xf32>
    %c0_14 = arith.constant 0 : index
    %c0_15 = arith.constant 0 : index
    %c0_16 = arith.constant 0 : index
    %14 = vector.load %arg6[%c0_14, %c0_15, %c0_16] : memref<4x1x32xf32, #tpu.memory_space<vmem>>, vector<1x1x32xf32>
    %15 = vector.shape_cast %14 : vector<1x1x32xf32> to vector<1x32xf32>
    %16 = vector.extract_strided_slice %9 {offsets = [0, 0, 0], sizes = [1, 1, 96], strides = [1, 1, 1]} : vector<1x8x192xf32> to vector<1x1x96xf32>
    %17 = vector.shape_cast %16 : vector<1x1x96xf32> to vector<1x96xf32>
    %cst_17 = arith.constant dense<0.000000e+00> : vector<1x96xf32>
    %18 = tpu.matmul %15, %11, %cst_17 {dimension_numbers = #tpu.dot_dimension_numbers<[1], [1], [0], [0], [0, 0, 1, 0], [], []>} : vector<1x32xf32>, vector<96x32xf32>, vector<1x96xf32> -> vector<1x96xf32>
    %19 = arith.addf %18, %13 : vector<1x96xf32>
    %20 = vector.extract_strided_slice %17 {offsets = [0, 0], sizes = [1, 32], strides = [1, 1]} : vector<1x96xf32> to vector<1x32xf32>
    %21 = vector.extract_strided_slice %19 {offsets = [0, 0], sizes = [1, 32], strides = [1, 1]} : vector<1x96xf32> to vector<1x32xf32>
    %22 = arith.addf %20, %21 : vector<1x32xf32>
    %23 = arith.negf %22 : vector<1x32xf32>
    %24 = math.exp %23 : vector<1x32xf32>
    %cst_18 = arith.constant 1.000000e+00 : f32
    %25 = vector.broadcast %cst_18 : f32 to vector<1x32xf32>
    %26 = arith.addf %25, %24 : vector<1x32xf32>
    %27 = arith.divf %25, %26 : vector<1x32xf32>
    %28 = vector.extract_strided_slice %17 {offsets = [0, 32], sizes = [1, 32], strides = [1, 1]} : vector<1x96xf32> to vector<1x32xf32>
    %29 = vector.extract_strided_slice %19 {offsets = [0, 32], sizes = [1, 32], strides = [1, 1]} : vector<1x96xf32> to vector<1x32xf32>
    %30 = arith.addf %28, %29 : vector<1x32xf32>
    %31 = arith.negf %30 : vector<1x32xf32>
    %32 = math.exp %31 : vector<1x32xf32>
    %cst_19 = arith.constant 1.000000e+00 : f32
    %33 = vector.broadcast %cst_19 : f32 to vector<1x32xf32>
    %34 = arith.addf %33, %32 : vector<1x32xf32>
    %35 = arith.divf %33, %34 : vector<1x32xf32>
    %36 = vector.extract_strided_slice %17 {offsets = [0, 64], sizes = [1, 32], strides = [1, 1]} : vector<1x96xf32> to vector<1x32xf32>
    %37 = vector.extract_strided_slice %19 {offsets = [0, 64], sizes = [1, 32], strides = [1, 1]} : vector<1x96xf32> to vector<1x32xf32>
    %38 = arith.mulf %27, %37 : vector<1x32xf32>
    %39 = arith.addf %36, %38 : vector<1x32xf32>
    %40 = math.tanh %39 : vector<1x32xf32>
    %cst_20 = arith.constant 1.000000e+00 : f32
    %41 = vector.broadcast %cst_20 : f32 to vector<1x32xf32>
    %42 = arith.subf %41, %35 : vector<1x32xf32>
    %43 = arith.mulf %42, %40 : vector<1x32xf32>
    %44 = arith.mulf %35, %15 : vector<1x32xf32>
    %45 = arith.addf %43, %44 : vector<1x32xf32>
    %c0_21 = arith.constant 0 : index
    %c0_22 = arith.constant 0 : index
    %c0_23 = arith.constant 0 : index
    %46 = vector.load %arg7[%c0_21, %c0_22, %c0_23] : memref<1x8x128xf32, #tpu.memory_space<vmem>>, vector<1x1x32xf32>
    %47 = vector.shape_cast %46 : vector<1x1x32xf32> to vector<1x32xf32>
    %48 = vector.shape_cast %45 : vector<1x32xf32> to vector<1x1x32xf32>
    tpu.vector_store %arg7[%c0_21, %c0_22, %c0_23], %48 {strides = array<i32>} : memref<1x8x128xf32, #tpu.memory_space<vmem>>, vector<1x1x32xf32>,
    %49 = vector.extract_strided_slice %9 {offsets = [0, 1, 0], sizes = [1, 1, 96], strides = [1, 1, 1]} : vector<1x8x192xf32> to vector<1x1x96xf32>
    %50 = vector.shape_cast %49 : vector<1x1x96xf32> to vector<1x96xf32>
    %cst_24 = arith.constant dense<0.000000e+00> : vector<1x96xf32>
    %51 = tpu.matmul %45, %11, %cst_24 {dimension_numbers = #tpu.dot_dimension_numbers<[1], [1], [0], [0], [0, 0, 1, 0], [], []>} : vector<1x32xf32>, vector<96x32xf32>, vector<1x96xf32> -> vector<1x96xf32>
    %52 = arith.addf %51, %13 : vector<1x96xf32>
    %53 = vector.extract_strided_slice %50 {offsets = [0, 0], sizes = [1, 32], strides = [1, 1]} : vector<1x96xf32> to vector<1x32xf32>
    %54 = vector.extract_strided_slice %52 {offsets = [0, 0], sizes = [1, 32], strides = [1, 1]} : vector<1x96xf32> to vector<1x32xf32>
    %55 = arith.addf %53, %54 : vector<1x32xf32>
    %56 = arith.negf %55 : vector<1x32xf32>
    %57 = math.exp %56 : vector<1x32xf32>
    %cst_25 = arith.constant 1.000000e+00 : f32
    %58 = vector.broadcast %cst_25 : f32 to vector<1x32xf32>
    %59 = arith.addf %58, %57 : vector<1x32xf32>
    %60 = arith.divf %58, %59 : vector<1x32xf32>
    %61 = vector.extract_strided_slice %50 {offsets = [0, 32], sizes = [1, 32], strides = [1, 1]} : vector<1x96xf32> to vector<1x32xf32>
    %62 = vector.extract_strided_slice %52 {offsets = [0, 32], sizes = [1, 32], strides = [1, 1]} : vector<1x96xf32> to vector<1x32xf32>
    %63 = arith.addf %61, %62 : vector<1x32xf32>
    %64 = arith.negf %63 : vector<1x32xf32>
    %65 = math.exp %64 : vector<1x32xf32>
    %cst_26 = arith.constant 1.000000e+00 : f32
    %66 = vector.broadcast %cst_26 : f32 to vector<1x32xf32>
    %67 = arith.addf %66, %65 : vector<1x32xf32>
    %68 = arith.divf %66, %67 : vector<1x32xf32>
    %69 = vector.extract_strided_slice %50 {offsets = [0, 64], sizes = [1, 32], strides = [1, 1]} : vector<1x96xf32> to vector<1x32xf32>
    %70 = vector.extract_strided_slice %52 {offsets = [0, 64], sizes = [1, 32], strides = [1, 1]} : vector<1x96xf32> to vector<1x32xf32>
    %71 = arith.mulf %60, %70 : vector<1x32xf32>
    %72 = arith.addf %69, %71 : vector<1x32xf32>
    %73 = math.tanh %72 : vector<1x32xf32>
    %cst_27 = arith.constant 1.000000e+00 : f32
    %74 = vector.broadcast %cst_27 : f32 to vector<1x32xf32>
    %75 = arith.subf %74, %68 : vector<1x32xf32>
    %76 = arith.mulf %75, %73 : vector<1x32xf32>
    %77 = arith.mulf %68, %45 : vector<1x32xf32>
    %78 = arith.addf %76, %77 : vector<1x32xf32>
    %c0_28 = arith.constant 0 : index
    %c1 = arith.constant 1 : index
    %c0_29 = arith.constant 0 : index
    %79 = vector.load %arg7[%c0_28, %c1, %c0_29] : memref<1x8x128xf32, #tpu.memory_space<vmem>>, vector<1x1x32xf32>
    %80 = vector.shape_cast %79 : vector<1x1x32xf32> to vector<1x32xf32>
    %81 = vector.shape_cast %78 : vector<1x32xf32> to vector<1x1x32xf32>
    tpu.vector_store %arg7[%c0_28, %c1, %c0_29], %81 {strides = array<i32>} : memref<1x8x128xf32, #tpu.memory_space<vmem>>, vector<1x1x32xf32>,
    %82 = vector.extract_strided_slice %9 {offsets = [0, 2, 0], sizes = [1, 1, 96], strides = [1, 1, 1]} : vector<1x8x192xf32> to vector<1x1x96xf32>
    %83 = vector.shape_cast %82 : vector<1x1x96xf32> to vector<1x96xf32>
    %cst_30 = arith.constant dense<0.000000e+00> : vector<1x96xf32>
    %84 = tpu.matmul %78, %11, %cst_30 {dimension_numbers = #tpu.dot_dimension_numbers<[1], [1], [0], [0], [0, 0, 1, 0], [], []>} : vector<1x32xf32>, vector<96x32xf32>, vector<1x96xf32> -> vector<1x96xf32>
    %85 = arith.addf %84, %13 : vector<1x96xf32>
    %86 = vector.extract_strided_slice %83 {offsets = [0, 0], sizes = [1, 32], strides = [1, 1]} : vector<1x96xf32> to vector<1x32xf32>
    %87 = vector.extract_strided_slice %85 {offsets = [0, 0], sizes = [1, 32], strides = [1, 1]} : vector<1x96xf32> to vector<1x32xf32>
    %88 = arith.addf %86, %87 : vector<1x32xf32>
    %89 = arith.negf %88 : vector<1x32xf32>
    %90 = math.exp %89 : vector<1x32xf32>
    %cst_31 = arith.constant 1.000000e+00 : f32
    %91 = vector.broadcast %cst_31 : f32 to vector<1x32xf32>
    %92 = arith.addf %91, %90 : vector<1x32xf32>
    %93 = arith.divf %91, %92 : vector<1x32xf32>
    %94 = vector.extract_strided_slice %83 {offsets = [0, 32], sizes = [1, 32], strides = [1, 1]} : vector<1x96xf32> to vector<1x32xf32>
    %95 = vector.extract_strided_slice %85 {offsets = [0, 32], sizes = [1, 32], strides = [1, 1]} : vector<1x96xf32> to vector<1x32xf32>
    %96 = arith.addf %94, %95 : vector<1x32xf32>
    %97 = arith.negf %96 : vector<1x32xf32>
    %98 = math.exp %97 : vector<1x32xf32>
    %cst_32 = arith.constant 1.000000e+00 : f32
    %99 = vector.broadcast %cst_32 : f32 to vector<1x32xf32>
    %100 = arith.addf %99, %98 : vector<1x32xf32>
    %101 = arith.divf %99, %100 : vector<1x32xf32>
    %102 = vector.extract_strided_slice %83 {offsets = [0, 64], sizes = [1, 32], strides = [1, 1]} : vector<1x96xf32> to vector<1x32xf32>
    %103 = vector.extract_strided_slice %85 {offsets = [0, 64], sizes = [1, 32], strides = [1, 1]} : vector<1x96xf32> to vector<1x32xf32>
    %104 = arith.mulf %93, %103 : vector<1x32xf32>
    %105 = arith.addf %102, %104 : vector<1x32xf32>
    %106 = math.tanh %105 : vector<1x32xf32>
    %cst_33 = arith.constant 1.000000e+00 : f32
    %107 = vector.broadcast %cst_33 : f32 to vector<1x32xf32>
    %108 = arith.subf %107, %101 : vector<1x32xf32>
    %109 = arith.mulf %108, %106 : vector<1x32xf32>
    %110 = arith.mulf %101, %78 : vector<1x32xf32>
    %111 = arith.addf %109, %110 : vector<1x32xf32>
    %c0_34 = arith.constant 0 : index
    %c2 = arith.constant 2 : index
    %c0_35 = arith.constant 0 : index
    %112 = vector.load %arg7[%c0_34, %c2, %c0_35] : memref<1x8x128xf32, #tpu.memory_space<vmem>>, vector<1x1x32xf32>
    %113 = vector.shape_cast %112 : vector<1x1x32xf32> to vector<1x32xf32>
    %114 = vector.shape_cast %111 : vector<1x32xf32> to vector<1x1x32xf32>
    tpu.vector_store %arg7[%c0_34, %c2, %c0_35], %114 {strides = array<i32>} : memref<1x8x128xf32, #tpu.memory_space<vmem>>, vector<1x1x32xf32>,
    %115 = vector.extract_strided_slice %9 {offsets = [0, 3, 0], sizes = [1, 1, 96], strides = [1, 1, 1]} : vector<1x8x192xf32> to vector<1x1x96xf32>
    %116 = vector.shape_cast %115 : vector<1x1x96xf32> to vector<1x96xf32>
    %cst_36 = arith.constant dense<0.000000e+00> : vector<1x96xf32>
    %117 = tpu.matmul %111, %11, %cst_36 {dimension_numbers = #tpu.dot_dimension_numbers<[1], [1], [0], [0], [0, 0, 1, 0], [], []>} : vector<1x32xf32>, vector<96x32xf32>, vector<1x96xf32> -> vector<1x96xf32>
    %118 = arith.addf %117, %13 : vector<1x96xf32>
    %119 = vector.extract_strided_slice %116 {offsets = [0, 0], sizes = [1, 32], strides = [1, 1]} : vector<1x96xf32> to vector<1x32xf32>
    %120 = vector.extract_strided_slice %118 {offsets = [0, 0], sizes = [1, 32], strides = [1, 1]} : vector<1x96xf32> to vector<1x32xf32>
    %121 = arith.addf %119, %120 : vector<1x32xf32>
    %122 = arith.negf %121 : vector<1x32xf32>
    %123 = math.exp %122 : vector<1x32xf32>
    %cst_37 = arith.constant 1.000000e+00 : f32
    %124 = vector.broadcast %cst_37 : f32 to vector<1x32xf32>
    %125 = arith.addf %124, %123 : vector<1x32xf32>
    %126 = arith.divf %124, %125 : vector<1x32xf32>
    %127 = vector.extract_strided_slice %116 {offsets = [0, 32], sizes = [1, 32], strides = [1, 1]} : vector<1x96xf32> to vector<1x32xf32>
    %128 = vector.extract_strided_slice %118 {offsets = [0, 32], sizes = [1, 32], strides = [1, 1]} : vector<1x96xf32> to vector<1x32xf32>
    %129 = arith.addf %127, %128 : vector<1x32xf32>
    %130 = arith.negf %129 : vector<1x32xf32>
    %131 = math.exp %130 : vector<1x32xf32>
    %cst_38 = arith.constant 1.000000e+00 : f32
    %132 = vector.broadcast %cst_38 : f32 to vector<1x32xf32>
    %133 = arith.addf %132, %131 : vector<1x32xf32>
    %134 = arith.divf %132, %133 : vector<1x32xf32>
    %135 = vector.extract_strided_slice %116 {offsets = [0, 64], sizes = [1, 32], strides = [1, 1]} : vector<1x96xf32> to vector<1x32xf32>
    %136 = vector.extract_strided_slice %118 {offsets = [0, 64], sizes = [1, 32], strides = [1, 1]} : vector<1x96xf32> to vector<1x32xf32>
    %137 = arith.mulf %126, %136 : vector<1x32xf32>
    %138 = arith.addf %135, %137 : vector<1x32xf32>
    %139 = math.tanh %138 : vector<1x32xf32>
    %cst_39 = arith.constant 1.000000e+00 : f32
    %140 = vector.broadcast %cst_39 : f32 to vector<1x32xf32>
    %141 = arith.subf %140, %134 : vector<1x32xf32>
    %142 = arith.mulf %141, %139 : vector<1x32xf32>
    %143 = arith.mulf %134, %111 : vector<1x32xf32>
    %144 = arith.addf %142, %143 : vector<1x32xf32>
    %c0_40 = arith.constant 0 : index
    %c3 = arith.constant 3 : index
    %c0_41 = arith.constant 0 : index
    %145 = vector.load %arg7[%c0_40, %c3, %c0_41] : memref<1x8x128xf32, #tpu.memory_space<vmem>>, vector<1x1x32xf32>
    %146 = vector.shape_cast %145 : vector<1x1x32xf32> to vector<1x32xf32>
    %147 = vector.shape_cast %144 : vector<1x32xf32> to vector<1x1x32xf32>
    tpu.vector_store %arg7[%c0_40, %c3, %c0_41], %147 {strides = array<i32>} : memref<1x8x128xf32, #tpu.memory_space<vmem>>, vector<1x1x32xf32>,
    %148 = vector.extract_strided_slice %9 {offsets = [0, 4, 0], sizes = [1, 1, 96], strides = [1, 1, 1]} : vector<1x8x192xf32> to vector<1x1x96xf32>
    %149 = vector.shape_cast %148 : vector<1x1x96xf32> to vector<1x96xf32>
    %cst_42 = arith.constant dense<0.000000e+00> : vector<1x96xf32>
    %150 = tpu.matmul %144, %11, %cst_42 {dimension_numbers = #tpu.dot_dimension_numbers<[1], [1], [0], [0], [0, 0, 1, 0], [], []>} : vector<1x32xf32>, vector<96x32xf32>, vector<1x96xf32> -> vector<1x96xf32>
    %151 = arith.addf %150, %13 : vector<1x96xf32>
    %152 = vector.extract_strided_slice %149 {offsets = [0, 0], sizes = [1, 32], strides = [1, 1]} : vector<1x96xf32> to vector<1x32xf32>
    %153 = vector.extract_strided_slice %151 {offsets = [0, 0], sizes = [1, 32], strides = [1, 1]} : vector<1x96xf32> to vector<1x32xf32>
    %154 = arith.addf %152, %153 : vector<1x32xf32>
    %155 = arith.negf %154 : vector<1x32xf32>
    %156 = math.exp %155 : vector<1x32xf32>
    %cst_43 = arith.constant 1.000000e+00 : f32
    %157 = vector.broadcast %cst_43 : f32 to vector<1x32xf32>
    %158 = arith.addf %157, %156 : vector<1x32xf32>
    %159 = arith.divf %157, %158 : vector<1x32xf32>
    %160 = vector.extract_strided_slice %149 {offsets = [0, 32], sizes = [1, 32], strides = [1, 1]} : vector<1x96xf32> to vector<1x32xf32>
    %161 = vector.extract_strided_slice %151 {offsets = [0, 32], sizes = [1, 32], strides = [1, 1]} : vector<1x96xf32> to vector<1x32xf32>
    %162 = arith.addf %160, %161 : vector<1x32xf32>
    %163 = arith.negf %162 : vector<1x32xf32>
    %164 = math.exp %163 : vector<1x32xf32>
    %cst_44 = arith.constant 1.000000e+00 : f32
    %165 = vector.broadcast %cst_44 : f32 to vector<1x32xf32>
    %166 = arith.addf %165, %164 : vector<1x32xf32>
    %167 = arith.divf %165, %166 : vector<1x32xf32>
    %168 = vector.extract_strided_slice %149 {offsets = [0, 64], sizes = [1, 32], strides = [1, 1]} : vector<1x96xf32> to vector<1x32xf32>
    %169 = vector.extract_strided_slice %151 {offsets = [0, 64], sizes = [1, 32], strides = [1, 1]} : vector<1x96xf32> to vector<1x32xf32>
    %170 = arith.mulf %159, %169 : vector<1x32xf32>
    %171 = arith.addf %168, %170 : vector<1x32xf32>
    %172 = math.tanh %171 : vector<1x32xf32>
    %cst_45 = arith.constant 1.000000e+00 : f32
    %173 = vector.broadcast %cst_45 : f32 to vector<1x32xf32>
    %174 = arith.subf %173, %167 : vector<1x32xf32>
    %175 = arith.mulf %174, %172 : vector<1x32xf32>
    %176 = arith.mulf %167, %144 : vector<1x32xf32>
    %177 = arith.addf %175, %176 : vector<1x32xf32>
    %c0_46 = arith.constant 0 : index
    %c4 = arith.constant 4 : index
    %c0_47 = arith.constant 0 : index
    %178 = vector.load %arg7[%c0_46, %c4, %c0_47] : memref<1x8x128xf32, #tpu.memory_space<vmem>>, vector<1x1x32xf32>
    %179 = vector.shape_cast %178 : vector<1x1x32xf32> to vector<1x32xf32>
    %180 = vector.shape_cast %177 : vector<1x32xf32> to vector<1x1x32xf32>
    tpu.vector_store %arg7[%c0_46, %c4, %c0_47], %180 {strides = array<i32>} : memref<1x8x128xf32, #tpu.memory_space<vmem>>, vector<1x1x32xf32>,
    %181 = vector.extract_strided_slice %9 {offsets = [0, 5, 0], sizes = [1, 1, 96], strides = [1, 1, 1]} : vector<1x8x192xf32> to vector<1x1x96xf32>
    %182 = vector.shape_cast %181 : vector<1x1x96xf32> to vector<1x96xf32>
    %cst_48 = arith.constant dense<0.000000e+00> : vector<1x96xf32>
    %183 = tpu.matmul %177, %11, %cst_48 {dimension_numbers = #tpu.dot_dimension_numbers<[1], [1], [0], [0], [0, 0, 1, 0], [], []>} : vector<1x32xf32>, vector<96x32xf32>, vector<1x96xf32> -> vector<1x96xf32>
    %184 = arith.addf %183, %13 : vector<1x96xf32>
    %185 = vector.extract_strided_slice %182 {offsets = [0, 0], sizes = [1, 32], strides = [1, 1]} : vector<1x96xf32> to vector<1x32xf32>
    %186 = vector.extract_strided_slice %184 {offsets = [0, 0], sizes = [1, 32], strides = [1, 1]} : vector<1x96xf32> to vector<1x32xf32>
    %187 = arith.addf %185, %186 : vector<1x32xf32>
    %188 = arith.negf %187 : vector<1x32xf32>
    %189 = math.exp %188 : vector<1x32xf32>
    %cst_49 = arith.constant 1.000000e+00 : f32
    %190 = vector.broadcast %cst_49 : f32 to vector<1x32xf32>
    %191 = arith.addf %190, %189 : vector<1x32xf32>
    %192 = arith.divf %190, %191 : vector<1x32xf32>
    %193 = vector.extract_strided_slice %182 {offsets = [0, 32], sizes = [1, 32], strides = [1, 1]} : vector<1x96xf32> to vector<1x32xf32>
    %194 = vector.extract_strided_slice %184 {offsets = [0, 32], sizes = [1, 32], strides = [1, 1]} : vector<1x96xf32> to vector<1x32xf32>
    %195 = arith.addf %193, %194 : vector<1x32xf32>
    %196 = arith.negf %195 : vector<1x32xf32>
    %197 = math.exp %196 : vector<1x32xf32>
    %cst_50 = arith.constant 1.000000e+00 : f32
    %198 = vector.broadcast %cst_50 : f32 to vector<1x32xf32>
    %199 = arith.addf %198, %197 : vector<1x32xf32>
    %200 = arith.divf %198, %199 : vector<1x32xf32>
    %201 = vector.extract_strided_slice %182 {offsets = [0, 64], sizes = [1, 32], strides = [1, 1]} : vector<1x96xf32> to vector<1x32xf32>
    %202 = vector.extract_strided_slice %184 {offsets = [0, 64], sizes = [1, 32], strides = [1, 1]} : vector<1x96xf32> to vector<1x32xf32>
    %203 = arith.mulf %192, %202 : vector<1x32xf32>
    %204 = arith.addf %201, %203 : vector<1x32xf32>
    %205 = math.tanh %204 : vector<1x32xf32>
    %cst_51 = arith.constant 1.000000e+00 : f32
    %206 = vector.broadcast %cst_51 : f32 to vector<1x32xf32>
    %207 = arith.subf %206, %200 : vector<1x32xf32>
    %208 = arith.mulf %207, %205 : vector<1x32xf32>
    %209 = arith.mulf %200, %177 : vector<1x32xf32>
    %210 = arith.addf %208, %209 : vector<1x32xf32>
    %c0_52 = arith.constant 0 : index
    %c5 = arith.constant 5 : index
    %c0_53 = arith.constant 0 : index
    %211 = vector.load %arg7[%c0_52, %c5, %c0_53] : memref<1x8x128xf32, #tpu.memory_space<vmem>>, vector<1x1x32xf32>
    %212 = vector.shape_cast %211 : vector<1x1x32xf32> to vector<1x32xf32>
    %213 = vector.shape_cast %210 : vector<1x32xf32> to vector<1x1x32xf32>
    tpu.vector_store %arg7[%c0_52, %c5, %c0_53], %213 {strides = array<i32>} : memref<1x8x128xf32, #tpu.memory_space<vmem>>, vector<1x1x32xf32>,
    %214 = vector.extract_strided_slice %9 {offsets = [0, 6, 0], sizes = [1, 1, 96], strides = [1, 1, 1]} : vector<1x8x192xf32> to vector<1x1x96xf32>
    %215 = vector.shape_cast %214 : vector<1x1x96xf32> to vector<1x96xf32>
    %cst_54 = arith.constant dense<0.000000e+00> : vector<1x96xf32>
    %216 = tpu.matmul %210, %11, %cst_54 {dimension_numbers = #tpu.dot_dimension_numbers<[1], [1], [0], [0], [0, 0, 1, 0], [], []>} : vector<1x32xf32>, vector<96x32xf32>, vector<1x96xf32> -> vector<1x96xf32>
    %217 = arith.addf %216, %13 : vector<1x96xf32>
    %218 = vector.extract_strided_slice %215 {offsets = [0, 0], sizes = [1, 32], strides = [1, 1]} : vector<1x96xf32> to vector<1x32xf32>
    %219 = vector.extract_strided_slice %217 {offsets = [0, 0], sizes = [1, 32], strides = [1, 1]} : vector<1x96xf32> to vector<1x32xf32>
    %220 = arith.addf %218, %219 : vector<1x32xf32>
    %221 = arith.negf %220 : vector<1x32xf32>
    %222 = math.exp %221 : vector<1x32xf32>
    %cst_55 = arith.constant 1.000000e+00 : f32
    %223 = vector.broadcast %cst_55 : f32 to vector<1x32xf32>
    %224 = arith.addf %223, %222 : vector<1x32xf32>
    %225 = arith.divf %223, %224 : vector<1x32xf32>
    %226 = vector.extract_strided_slice %215 {offsets = [0, 32], sizes = [1, 32], strides = [1, 1]} : vector<1x96xf32> to vector<1x32xf32>
    %227 = vector.extract_strided_slice %217 {offsets = [0, 32], sizes = [1, 32], strides = [1, 1]} : vector<1x96xf32> to vector<1x32xf32>
    %228 = arith.addf %226, %227 : vector<1x32xf32>
    %229 = arith.negf %228 : vector<1x32xf32>
    %230 = math.exp %229 : vector<1x32xf32>
    %cst_56 = arith.constant 1.000000e+00 : f32
    %231 = vector.broadcast %cst_56 : f32 to vector<1x32xf32>
    %232 = arith.addf %231, %230 : vector<1x32xf32>
    %233 = arith.divf %231, %232 : vector<1x32xf32>
    %234 = vector.extract_strided_slice %215 {offsets = [0, 64], sizes = [1, 32], strides = [1, 1]} : vector<1x96xf32> to vector<1x32xf32>
    %235 = vector.extract_strided_slice %217 {offsets = [0, 64], sizes = [1, 32], strides = [1, 1]} : vector<1x96xf32> to vector<1x32xf32>
    %236 = arith.mulf %225, %235 : vector<1x32xf32>
    %237 = arith.addf %234, %236 : vector<1x32xf32>
    %238 = math.tanh %237 : vector<1x32xf32>
    %cst_57 = arith.constant 1.000000e+00 : f32
    %239 = vector.broadcast %cst_57 : f32 to vector<1x32xf32>
    %240 = arith.subf %239, %233 : vector<1x32xf32>
    %241 = arith.mulf %240, %238 : vector<1x32xf32>
    %242 = arith.mulf %233, %210 : vector<1x32xf32>
    %243 = arith.addf %241, %242 : vector<1x32xf32>
    %c0_58 = arith.constant 0 : index
    %c6 = arith.constant 6 : index
    %c0_59 = arith.constant 0 : index
    %244 = vector.load %arg7[%c0_58, %c6, %c0_59] : memref<1x8x128xf32, #tpu.memory_space<vmem>>, vector<1x1x32xf32>
    %245 = vector.shape_cast %244 : vector<1x1x32xf32> to vector<1x32xf32>
    %246 = vector.shape_cast %243 : vector<1x32xf32> to vector<1x1x32xf32>
    tpu.vector_store %arg7[%c0_58, %c6, %c0_59], %246 {strides = array<i32>} : memref<1x8x128xf32, #tpu.memory_space<vmem>>, vector<1x1x32xf32>,
    %247 = vector.extract_strided_slice %9 {offsets = [0, 7, 0], sizes = [1, 1, 96], strides = [1, 1, 1]} : vector<1x8x192xf32> to vector<1x1x96xf32>
    %248 = vector.shape_cast %247 : vector<1x1x96xf32> to vector<1x96xf32>
    %cst_60 = arith.constant dense<0.000000e+00> : vector<1x96xf32>
    %249 = tpu.matmul %243, %11, %cst_60 {dimension_numbers = #tpu.dot_dimension_numbers<[1], [1], [0], [0], [0, 0, 1, 0], [], []>} : vector<1x32xf32>, vector<96x32xf32>, vector<1x96xf32> -> vector<1x96xf32>
    %250 = arith.addf %249, %13 : vector<1x96xf32>
    %251 = vector.extract_strided_slice %248 {offsets = [0, 0], sizes = [1, 32], strides = [1, 1]} : vector<1x96xf32> to vector<1x32xf32>
    %252 = vector.extract_strided_slice %250 {offsets = [0, 0], sizes = [1, 32], strides = [1, 1]} : vector<1x96xf32> to vector<1x32xf32>
    %253 = arith.addf %251, %252 : vector<1x32xf32>
    %254 = arith.negf %253 : vector<1x32xf32>
    %255 = math.exp %254 : vector<1x32xf32>
    %cst_61 = arith.constant 1.000000e+00 : f32
    %256 = vector.broadcast %cst_61 : f32 to vector<1x32xf32>
    %257 = arith.addf %256, %255 : vector<1x32xf32>
    %258 = arith.divf %256, %257 : vector<1x32xf32>
    %259 = vector.extract_strided_slice %248 {offsets = [0, 32], sizes = [1, 32], strides = [1, 1]} : vector<1x96xf32> to vector<1x32xf32>
    %260 = vector.extract_strided_slice %250 {offsets = [0, 32], sizes = [1, 32], strides = [1, 1]} : vector<1x96xf32> to vector<1x32xf32>
    %261 = arith.addf %259, %260 : vector<1x32xf32>
    %262 = arith.negf %261 : vector<1x32xf32>
    %263 = math.exp %262 : vector<1x32xf32>
    %cst_62 = arith.constant 1.000000e+00 : f32
    %264 = vector.broadcast %cst_62 : f32 to vector<1x32xf32>
    %265 = arith.addf %264, %263 : vector<1x32xf32>
    %266 = arith.divf %264, %265 : vector<1x32xf32>
    %267 = vector.extract_strided_slice %248 {offsets = [0, 64], sizes = [1, 32], strides = [1, 1]} : vector<1x96xf32> to vector<1x32xf32>
    %268 = vector.extract_strided_slice %250 {offsets = [0, 64], sizes = [1, 32], strides = [1, 1]} : vector<1x96xf32> to vector<1x32xf32>
    %269 = arith.mulf %258, %268 : vector<1x32xf32>
    %270 = arith.addf %267, %269 : vector<1x32xf32>
    %271 = math.tanh %270 : vector<1x32xf32>
    %cst_63 = arith.constant 1.000000e+00 : f32
    %272 = vector.broadcast %cst_63 : f32 to vector<1x32xf32>
    %273 = arith.subf %272, %266 : vector<1x32xf32>
    %274 = arith.mulf %273, %271 : vector<1x32xf32>
    %275 = arith.mulf %266, %243 : vector<1x32xf32>
    %276 = arith.addf %274, %275 : vector<1x32xf32>
    %c0_64 = arith.constant 0 : index
    %c7 = arith.constant 7 : index
    %c0_65 = arith.constant 0 : index
    %277 = vector.load %arg7[%c0_64, %c7, %c0_65] : memref<1x8x128xf32, #tpu.memory_space<vmem>>, vector<1x1x32xf32>
    %278 = vector.shape_cast %277 : vector<1x1x32xf32> to vector<1x32xf32>
    %279 = vector.shape_cast %276 : vector<1x32xf32> to vector<1x1x32xf32>
    tpu.vector_store %arg7[%c0_64, %c7, %c0_65], %279 {strides = array<i32>} : memref<1x8x128xf32, #tpu.memory_space<vmem>>, vector<1x1x32xf32>,
    %c1_66 = arith.constant 1 : index
    %c0_67 = arith.constant 0 : index
    %c0_68 = arith.constant 0 : index
    %280 = vector.load %arg3[%c1_66, %c0_67, %c0_68] : memref<4x96x32xf32, #tpu.memory_space<vmem>>, vector<1x96x32xf32>
    %281 = vector.shape_cast %280 : vector<1x96x32xf32> to vector<96x32xf32>
    %c1_69 = arith.constant 1 : index
    %c0_70 = arith.constant 0 : index
    %c0_71 = arith.constant 0 : index
    %282 = vector.load %arg5[%c1_69, %c0_70, %c0_71] : memref<4x1x96xf32, #tpu.memory_space<vmem>>, vector<1x1x96xf32>
    %283 = vector.shape_cast %282 : vector<1x1x96xf32> to vector<1x96xf32>
    %c1_72 = arith.constant 1 : index
    %c0_73 = arith.constant 0 : index
    %c0_74 = arith.constant 0 : index
    %284 = vector.load %arg6[%c1_72, %c0_73, %c0_74] : memref<4x1x32xf32, #tpu.memory_space<vmem>>, vector<1x1x32xf32>
    %285 = vector.shape_cast %284 : vector<1x1x32xf32> to vector<1x32xf32>
    %286 = vector.extract_strided_slice %9 {offsets = [0, 7, 96], sizes = [1, 1, 96], strides = [1, 1, 1]} : vector<1x8x192xf32> to vector<1x1x96xf32>
    %287 = vector.shape_cast %286 : vector<1x1x96xf32> to vector<1x96xf32>
    %cst_75 = arith.constant dense<0.000000e+00> : vector<1x96xf32>
    %288 = tpu.matmul %285, %281, %cst_75 {dimension_numbers = #tpu.dot_dimension_numbers<[1], [1], [0], [0], [0, 0, 1, 0], [], []>} : vector<1x32xf32>, vector<96x32xf32>, vector<1x96xf32> -> vector<1x96xf32>
    %289 = arith.addf %288, %283 : vector<1x96xf32>
    %290 = vector.extract_strided_slice %287 {offsets = [0, 0], sizes = [1, 32], strides = [1, 1]} : vector<1x96xf32> to vector<1x32xf32>
    %291 = vector.extract_strided_slice %289 {offsets = [0, 0], sizes = [1, 32], strides = [1, 1]} : vector<1x96xf32> to vector<1x32xf32>
    %292 = arith.addf %290, %291 : vector<1x32xf32>
    %293 = arith.negf %292 : vector<1x32xf32>
    %294 = math.exp %293 : vector<1x32xf32>
    %cst_76 = arith.constant 1.000000e+00 : f32
    %295 = vector.broadcast %cst_76 : f32 to vector<1x32xf32>
    %296 = arith.addf %295, %294 : vector<1x32xf32>
    %297 = arith.divf %295, %296 : vector<1x32xf32>
    %298 = vector.extract_strided_slice %287 {offsets = [0, 32], sizes = [1, 32], strides = [1, 1]} : vector<1x96xf32> to vector<1x32xf32>
    %299 = vector.extract_strided_slice %289 {offsets = [0, 32], sizes = [1, 32], strides = [1, 1]} : vector<1x96xf32> to vector<1x32xf32>
    %300 = arith.addf %298, %299 : vector<1x32xf32>
    %301 = arith.negf %300 : vector<1x32xf32>
    %302 = math.exp %301 : vector<1x32xf32>
    %cst_77 = arith.constant 1.000000e+00 : f32
    %303 = vector.broadcast %cst_77 : f32 to vector<1x32xf32>
    %304 = arith.addf %303, %302 : vector<1x32xf32>
    %305 = arith.divf %303, %304 : vector<1x32xf32>
    %306 = vector.extract_strided_slice %287 {offsets = [0, 64], sizes = [1, 32], strides = [1, 1]} : vector<1x96xf32> to vector<1x32xf32>
    %307 = vector.extract_strided_slice %289 {offsets = [0, 64], sizes = [1, 32], strides = [1, 1]} : vector<1x96xf32> to vector<1x32xf32>
    %308 = arith.mulf %297, %307 : vector<1x32xf32>
    %309 = arith.addf %306, %308 : vector<1x32xf32>
    %310 = math.tanh %309 : vector<1x32xf32>
    %cst_78 = arith.constant 1.000000e+00 : f32
    %311 = vector.broadcast %cst_78 : f32 to vector<1x32xf32>
    %312 = arith.subf %311, %305 : vector<1x32xf32>
    %313 = arith.mulf %312, %310 : vector<1x32xf32>
    %314 = arith.mulf %305, %285 : vector<1x32xf32>
    %315 = arith.addf %313, %314 : vector<1x32xf32>
    %c0_79 = arith.constant 0 : index
    %c7_80 = arith.constant 7 : index
    %c32 = arith.constant 32 : index
    %316 = vector.load %arg7[%c0_79, %c7_80, %c32] : memref<1x8x128xf32, #tpu.memory_space<vmem>>, vector<1x1x32xf32>
    %317 = vector.shape_cast %316 : vector<1x1x32xf32> to vector<1x32xf32>
    %318 = vector.shape_cast %315 : vector<1x32xf32> to vector<1x1x32xf32>
    tpu.vector_store %arg7[%c0_79, %c7_80, %c32], %318 {strides = array<i32>} : memref<1x8x128xf32, #tpu.memory_space<vmem>>, vector<1x1x32xf32>,
    %319 = vector.extract_strided_slice %9 {offsets = [0, 6, 96], sizes = [1, 1, 96], strides = [1, 1, 1]} : vector<1x8x192xf32> to vector<1x1x96xf32>
    %320 = vector.shape_cast %319 : vector<1x1x96xf32> to vector<1x96xf32>
    %cst_81 = arith.constant dense<0.000000e+00> : vector<1x96xf32>
    %321 = tpu.matmul %315, %281, %cst_81 {dimension_numbers = #tpu.dot_dimension_numbers<[1], [1], [0], [0], [0, 0, 1, 0], [], []>} : vector<1x32xf32>, vector<96x32xf32>, vector<1x96xf32> -> vector<1x96xf32>
    %322 = arith.addf %321, %283 : vector<1x96xf32>
    %323 = vector.extract_strided_slice %320 {offsets = [0, 0], sizes = [1, 32], strides = [1, 1]} : vector<1x96xf32> to vector<1x32xf32>
    %324 = vector.extract_strided_slice %322 {offsets = [0, 0], sizes = [1, 32], strides = [1, 1]} : vector<1x96xf32> to vector<1x32xf32>
    %325 = arith.addf %323, %324 : vector<1x32xf32>
    %326 = arith.negf %325 : vector<1x32xf32>
    %327 = math.exp %326 : vector<1x32xf32>
    %cst_82 = arith.constant 1.000000e+00 : f32
    %328 = vector.broadcast %cst_82 : f32 to vector<1x32xf32>
    %329 = arith.addf %328, %327 : vector<1x32xf32>
    %330 = arith.divf %328, %329 : vector<1x32xf32>
    %331 = vector.extract_strided_slice %320 {offsets = [0, 32], sizes = [1, 32], strides = [1, 1]} : vector<1x96xf32> to vector<1x32xf32>
    %332 = vector.extract_strided_slice %322 {offsets = [0, 32], sizes = [1, 32], strides = [1, 1]} : vector<1x96xf32> to vector<1x32xf32>
    %333 = arith.addf %331, %332 : vector<1x32xf32>
    %334 = arith.negf %333 : vector<1x32xf32>
    %335 = math.exp %334 : vector<1x32xf32>
    %cst_83 = arith.constant 1.000000e+00 : f32
    %336 = vector.broadcast %cst_83 : f32 to vector<1x32xf32>
    %337 = arith.addf %336, %335 : vector<1x32xf32>
    %338 = arith.divf %336, %337 : vector<1x32xf32>
    %339 = vector.extract_strided_slice %320 {offsets = [0, 64], sizes = [1, 32], strides = [1, 1]} : vector<1x96xf32> to vector<1x32xf32>
    %340 = vector.extract_strided_slice %322 {offsets = [0, 64], sizes = [1, 32], strides = [1, 1]} : vector<1x96xf32> to vector<1x32xf32>
    %341 = arith.mulf %330, %340 : vector<1x32xf32>
    %342 = arith.addf %339, %341 : vector<1x32xf32>
    %343 = math.tanh %342 : vector<1x32xf32>
    %cst_84 = arith.constant 1.000000e+00 : f32
    %344 = vector.broadcast %cst_84 : f32 to vector<1x32xf32>
    %345 = arith.subf %344, %338 : vector<1x32xf32>
    %346 = arith.mulf %345, %343 : vector<1x32xf32>
    %347 = arith.mulf %338, %315 : vector<1x32xf32>
    %348 = arith.addf %346, %347 : vector<1x32xf32>
    %c0_85 = arith.constant 0 : index
    %c6_86 = arith.constant 6 : index
    %c32_87 = arith.constant 32 : index
    %349 = vector.load %arg7[%c0_85, %c6_86, %c32_87] : memref<1x8x128xf32, #tpu.memory_space<vmem>>, vector<1x1x32xf32>
    %350 = vector.shape_cast %349 : vector<1x1x32xf32> to vector<1x32xf32>
    %351 = vector.shape_cast %348 : vector<1x32xf32> to vector<1x1x32xf32>
    tpu.vector_store %arg7[%c0_85, %c6_86, %c32_87], %351 {strides = array<i32>} : memref<1x8x128xf32, #tpu.memory_space<vmem>>, vector<1x1x32xf32>,
    %352 = vector.extract_strided_slice %9 {offsets = [0, 5, 96], sizes = [1, 1, 96], strides = [1, 1, 1]} : vector<1x8x192xf32> to vector<1x1x96xf32>
    %353 = vector.shape_cast %352 : vector<1x1x96xf32> to vector<1x96xf32>
    %cst_88 = arith.constant dense<0.000000e+00> : vector<1x96xf32>
    %354 = tpu.matmul %348, %281, %cst_88 {dimension_numbers = #tpu.dot_dimension_numbers<[1], [1], [0], [0], [0, 0, 1, 0], [], []>} : vector<1x32xf32>, vector<96x32xf32>, vector<1x96xf32> -> vector<1x96xf32>
    %355 = arith.addf %354, %283 : vector<1x96xf32>
    %356 = vector.extract_strided_slice %353 {offsets = [0, 0], sizes = [1, 32], strides = [1, 1]} : vector<1x96xf32> to vector<1x32xf32>
    %357 = vector.extract_strided_slice %355 {offsets = [0, 0], sizes = [1, 32], strides = [1, 1]} : vector<1x96xf32> to vector<1x32xf32>
    %358 = arith.addf %356, %357 : vector<1x32xf32>
    %359 = arith.negf %358 : vector<1x32xf32>
    %360 = math.exp %359 : vector<1x32xf32>
    %cst_89 = arith.constant 1.000000e+00 : f32
    %361 = vector.broadcast %cst_89 : f32 to vector<1x32xf32>
    %362 = arith.addf %361, %360 : vector<1x32xf32>
    %363 = arith.divf %361, %362 : vector<1x32xf32>
    %364 = vector.extract_strided_slice %353 {offsets = [0, 32], sizes = [1, 32], strides = [1, 1]} : vector<1x96xf32> to vector<1x32xf32>
    %365 = vector.extract_strided_slice %355 {offsets = [0, 32], sizes = [1, 32], strides = [1, 1]} : vector<1x96xf32> to vector<1x32xf32>
    %366 = arith.addf %364, %365 : vector<1x32xf32>
    %367 = arith.negf %366 : vector<1x32xf32>
    %368 = math.exp %367 : vector<1x32xf32>
    %cst_90 = arith.constant 1.000000e+00 : f32
    %369 = vector.broadcast %cst_90 : f32 to vector<1x32xf32>
    %370 = arith.addf %369, %368 : vector<1x32xf32>
    %371 = arith.divf %369, %370 : vector<1x32xf32>
    %372 = vector.extract_strided_slice %353 {offsets = [0, 64], sizes = [1, 32], strides = [1, 1]} : vector<1x96xf32> to vector<1x32xf32>
    %373 = vector.extract_strided_slice %355 {offsets = [0, 64], sizes = [1, 32], strides = [1, 1]} : vector<1x96xf32> to vector<1x32xf32>
    %374 = arith.mulf %363, %373 : vector<1x32xf32>
    %375 = arith.addf %372, %374 : vector<1x32xf32>
    %376 = math.tanh %375 : vector<1x32xf32>
    %cst_91 = arith.constant 1.000000e+00 : f32
    %377 = vector.broadcast %cst_91 : f32 to vector<1x32xf32>
    %378 = arith.subf %377, %371 : vector<1x32xf32>
    %379 = arith.mulf %378, %376 : vector<1x32xf32>
    %380 = arith.mulf %371, %348 : vector<1x32xf32>
    %381 = arith.addf %379, %380 : vector<1x32xf32>
    %c0_92 = arith.constant 0 : index
    %c5_93 = arith.constant 5 : index
    %c32_94 = arith.constant 32 : index
    %382 = vector.load %arg7[%c0_92, %c5_93, %c32_94] : memref<1x8x128xf32, #tpu.memory_space<vmem>>, vector<1x1x32xf32>
    %383 = vector.shape_cast %382 : vector<1x1x32xf32> to vector<1x32xf32>
    %384 = vector.shape_cast %381 : vector<1x32xf32> to vector<1x1x32xf32>
    tpu.vector_store %arg7[%c0_92, %c5_93, %c32_94], %384 {strides = array<i32>} : memref<1x8x128xf32, #tpu.memory_space<vmem>>, vector<1x1x32xf32>,
    %385 = vector.extract_strided_slice %9 {offsets = [0, 4, 96], sizes = [1, 1, 96], strides = [1, 1, 1]} : vector<1x8x192xf32> to vector<1x1x96xf32>
    %386 = vector.shape_cast %385 : vector<1x1x96xf32> to vector<1x96xf32>
    %cst_95 = arith.constant dense<0.000000e+00> : vector<1x96xf32>
    %387 = tpu.matmul %381, %281, %cst_95 {dimension_numbers = #tpu.dot_dimension_numbers<[1], [1], [0], [0], [0, 0, 1, 0], [], []>} : vector<1x32xf32>, vector<96x32xf32>, vector<1x96xf32> -> vector<1x96xf32>
    %388 = arith.addf %387, %283 : vector<1x96xf32>
    %389 = vector.extract_strided_slice %386 {offsets = [0, 0], sizes = [1, 32], strides = [1, 1]} : vector<1x96xf32> to vector<1x32xf32>
    %390 = vector.extract_strided_slice %388 {offsets = [0, 0], sizes = [1, 32], strides = [1, 1]} : vector<1x96xf32> to vector<1x32xf32>
    %391 = arith.addf %389, %390 : vector<1x32xf32>
    %392 = arith.negf %391 : vector<1x32xf32>
    %393 = math.exp %392 : vector<1x32xf32>
    %cst_96 = arith.constant 1.000000e+00 : f32
    %394 = vector.broadcast %cst_96 : f32 to vector<1x32xf32>
    %395 = arith.addf %394, %393 : vector<1x32xf32>
    %396 = arith.divf %394, %395 : vector<1x32xf32>
    %397 = vector.extract_strided_slice %386 {offsets = [0, 32], sizes = [1, 32], strides = [1, 1]} : vector<1x96xf32> to vector<1x32xf32>
    %398 = vector.extract_strided_slice %388 {offsets = [0, 32], sizes = [1, 32], strides = [1, 1]} : vector<1x96xf32> to vector<1x32xf32>
    %399 = arith.addf %397, %398 : vector<1x32xf32>
    %400 = arith.negf %399 : vector<1x32xf32>
    %401 = math.exp %400 : vector<1x32xf32>
    %cst_97 = arith.constant 1.000000e+00 : f32
    %402 = vector.broadcast %cst_97 : f32 to vector<1x32xf32>
    %403 = arith.addf %402, %401 : vector<1x32xf32>
    %404 = arith.divf %402, %403 : vector<1x32xf32>
    %405 = vector.extract_strided_slice %386 {offsets = [0, 64], sizes = [1, 32], strides = [1, 1]} : vector<1x96xf32> to vector<1x32xf32>
    %406 = vector.extract_strided_slice %388 {offsets = [0, 64], sizes = [1, 32], strides = [1, 1]} : vector<1x96xf32> to vector<1x32xf32>
    %407 = arith.mulf %396, %406 : vector<1x32xf32>
    %408 = arith.addf %405, %407 : vector<1x32xf32>
    %409 = math.tanh %408 : vector<1x32xf32>
    %cst_98 = arith.constant 1.000000e+00 : f32
    %410 = vector.broadcast %cst_98 : f32 to vector<1x32xf32>
    %411 = arith.subf %410, %404 : vector<1x32xf32>
    %412 = arith.mulf %411, %409 : vector<1x32xf32>
    %413 = arith.mulf %404, %381 : vector<1x32xf32>
    %414 = arith.addf %412, %413 : vector<1x32xf32>
    %c0_99 = arith.constant 0 : index
    %c4_100 = arith.constant 4 : index
    %c32_101 = arith.constant 32 : index
    %415 = vector.load %arg7[%c0_99, %c4_100, %c32_101] : memref<1x8x128xf32, #tpu.memory_space<vmem>>, vector<1x1x32xf32>
    %416 = vector.shape_cast %415 : vector<1x1x32xf32> to vector<1x32xf32>
    %417 = vector.shape_cast %414 : vector<1x32xf32> to vector<1x1x32xf32>
    tpu.vector_store %arg7[%c0_99, %c4_100, %c32_101], %417 {strides = array<i32>} : memref<1x8x128xf32, #tpu.memory_space<vmem>>, vector<1x1x32xf32>,
    %418 = vector.extract_strided_slice %9 {offsets = [0, 3, 96], sizes = [1, 1, 96], strides = [1, 1, 1]} : vector<1x8x192xf32> to vector<1x1x96xf32>
    %419 = vector.shape_cast %418 : vector<1x1x96xf32> to vector<1x96xf32>
    %cst_102 = arith.constant dense<0.000000e+00> : vector<1x96xf32>
    %420 = tpu.matmul %414, %281, %cst_102 {dimension_numbers = #tpu.dot_dimension_numbers<[1], [1], [0], [0], [0, 0, 1, 0], [], []>} : vector<1x32xf32>, vector<96x32xf32>, vector<1x96xf32> -> vector<1x96xf32>
    %421 = arith.addf %420, %283 : vector<1x96xf32>
    %422 = vector.extract_strided_slice %419 {offsets = [0, 0], sizes = [1, 32], strides = [1, 1]} : vector<1x96xf32> to vector<1x32xf32>
    %423 = vector.extract_strided_slice %421 {offsets = [0, 0], sizes = [1, 32], strides = [1, 1]} : vector<1x96xf32> to vector<1x32xf32>
    %424 = arith.addf %422, %423 : vector<1x32xf32>
    %425 = arith.negf %424 : vector<1x32xf32>
    %426 = math.exp %425 : vector<1x32xf32>
    %cst_103 = arith.constant 1.000000e+00 : f32
    %427 = vector.broadcast %cst_103 : f32 to vector<1x32xf32>
    %428 = arith.addf %427, %426 : vector<1x32xf32>
    %429 = arith.divf %427, %428 : vector<1x32xf32>
    %430 = vector.extract_strided_slice %419 {offsets = [0, 32], sizes = [1, 32], strides = [1, 1]} : vector<1x96xf32> to vector<1x32xf32>
    %431 = vector.extract_strided_slice %421 {offsets = [0, 32], sizes = [1, 32], strides = [1, 1]} : vector<1x96xf32> to vector<1x32xf32>
    %432 = arith.addf %430, %431 : vector<1x32xf32>
    %433 = arith.negf %432 : vector<1x32xf32>
    %434 = math.exp %433 : vector<1x32xf32>
    %cst_104 = arith.constant 1.000000e+00 : f32
    %435 = vector.broadcast %cst_104 : f32 to vector<1x32xf32>
    %436 = arith.addf %435, %434 : vector<1x32xf32>
    %437 = arith.divf %435, %436 : vector<1x32xf32>
    %438 = vector.extract_strided_slice %419 {offsets = [0, 64], sizes = [1, 32], strides = [1, 1]} : vector<1x96xf32> to vector<1x32xf32>
    %439 = vector.extract_strided_slice %421 {offsets = [0, 64], sizes = [1, 32], strides = [1, 1]} : vector<1x96xf32> to vector<1x32xf32>
    %440 = arith.mulf %429, %439 : vector<1x32xf32>
    %441 = arith.addf %438, %440 : vector<1x32xf32>
    %442 = math.tanh %441 : vector<1x32xf32>
    %cst_105 = arith.constant 1.000000e+00 : f32
    %443 = vector.broadcast %cst_105 : f32 to vector<1x32xf32>
    %444 = arith.subf %443, %437 : vector<1x32xf32>
    %445 = arith.mulf %444, %442 : vector<1x32xf32>
    %446 = arith.mulf %437, %414 : vector<1x32xf32>
    %447 = arith.addf %445, %446 : vector<1x32xf32>
    %c0_106 = arith.constant 0 : index
    %c3_107 = arith.constant 3 : index
    %c32_108 = arith.constant 32 : index
    %448 = vector.load %arg7[%c0_106, %c3_107, %c32_108] : memref<1x8x128xf32, #tpu.memory_space<vmem>>, vector<1x1x32xf32>
    %449 = vector.shape_cast %448 : vector<1x1x32xf32> to vector<1x32xf32>
    %450 = vector.shape_cast %447 : vector<1x32xf32> to vector<1x1x32xf32>
    tpu.vector_store %arg7[%c0_106, %c3_107, %c32_108], %450 {strides = array<i32>} : memref<1x8x128xf32, #tpu.memory_space<vmem>>, vector<1x1x32xf32>,
    %451 = vector.extract_strided_slice %9 {offsets = [0, 2, 96], sizes = [1, 1, 96], strides = [1, 1, 1]} : vector<1x8x192xf32> to vector<1x1x96xf32>
    %452 = vector.shape_cast %451 : vector<1x1x96xf32> to vector<1x96xf32>
    %cst_109 = arith.constant dense<0.000000e+00> : vector<1x96xf32>
    %453 = tpu.matmul %447, %281, %cst_109 {dimension_numbers = #tpu.dot_dimension_numbers<[1], [1], [0], [0], [0, 0, 1, 0], [], []>} : vector<1x32xf32>, vector<96x32xf32>, vector<1x96xf32> -> vector<1x96xf32>
    %454 = arith.addf %453, %283 : vector<1x96xf32>
    %455 = vector.extract_strided_slice %452 {offsets = [0, 0], sizes = [1, 32], strides = [1, 1]} : vector<1x96xf32> to vector<1x32xf32>
    %456 = vector.extract_strided_slice %454 {offsets = [0, 0], sizes = [1, 32], strides = [1, 1]} : vector<1x96xf32> to vector<1x32xf32>
    %457 = arith.addf %455, %456 : vector<1x32xf32>
    %458 = arith.negf %457 : vector<1x32xf32>
    %459 = math.exp %458 : vector<1x32xf32>
    %cst_110 = arith.constant 1.000000e+00 : f32
    %460 = vector.broadcast %cst_110 : f32 to vector<1x32xf32>
    %461 = arith.addf %460, %459 : vector<1x32xf32>
    %462 = arith.divf %460, %461 : vector<1x32xf32>
    %463 = vector.extract_strided_slice %452 {offsets = [0, 32], sizes = [1, 32], strides = [1, 1]} : vector<1x96xf32> to vector<1x32xf32>
    %464 = vector.extract_strided_slice %454 {offsets = [0, 32], sizes = [1, 32], strides = [1, 1]} : vector<1x96xf32> to vector<1x32xf32>
    %465 = arith.addf %463, %464 : vector<1x32xf32>
    %466 = arith.negf %465 : vector<1x32xf32>
    %467 = math.exp %466 : vector<1x32xf32>
    %cst_111 = arith.constant 1.000000e+00 : f32
    %468 = vector.broadcast %cst_111 : f32 to vector<1x32xf32>
    %469 = arith.addf %468, %467 : vector<1x32xf32>
    %470 = arith.divf %468, %469 : vector<1x32xf32>
    %471 = vector.extract_strided_slice %452 {offsets = [0, 64], sizes = [1, 32], strides = [1, 1]} : vector<1x96xf32> to vector<1x32xf32>
    %472 = vector.extract_strided_slice %454 {offsets = [0, 64], sizes = [1, 32], strides = [1, 1]} : vector<1x96xf32> to vector<1x32xf32>
    %473 = arith.mulf %462, %472 : vector<1x32xf32>
    %474 = arith.addf %471, %473 : vector<1x32xf32>
    %475 = math.tanh %474 : vector<1x32xf32>
    %cst_112 = arith.constant 1.000000e+00 : f32
    %476 = vector.broadcast %cst_112 : f32 to vector<1x32xf32>
    %477 = arith.subf %476, %470 : vector<1x32xf32>
    %478 = arith.mulf %477, %475 : vector<1x32xf32>
    %479 = arith.mulf %470, %447 : vector<1x32xf32>
    %480 = arith.addf %478, %479 : vector<1x32xf32>
    %c0_113 = arith.constant 0 : index
    %c2_114 = arith.constant 2 : index
    %c32_115 = arith.constant 32 : index
    %481 = vector.load %arg7[%c0_113, %c2_114, %c32_115] : memref<1x8x128xf32, #tpu.memory_space<vmem>>, vector<1x1x32xf32>
    %482 = vector.shape_cast %481 : vector<1x1x32xf32> to vector<1x32xf32>
    %483 = vector.shape_cast %480 : vector<1x32xf32> to vector<1x1x32xf32>
    tpu.vector_store %arg7[%c0_113, %c2_114, %c32_115], %483 {strides = array<i32>} : memref<1x8x128xf32, #tpu.memory_space<vmem>>, vector<1x1x32xf32>,
    %484 = vector.extract_strided_slice %9 {offsets = [0, 1, 96], sizes = [1, 1, 96], strides = [1, 1, 1]} : vector<1x8x192xf32> to vector<1x1x96xf32>
    %485 = vector.shape_cast %484 : vector<1x1x96xf32> to vector<1x96xf32>
    %cst_116 = arith.constant dense<0.000000e+00> : vector<1x96xf32>
    %486 = tpu.matmul %480, %281, %cst_116 {dimension_numbers = #tpu.dot_dimension_numbers<[1], [1], [0], [0], [0, 0, 1, 0], [], []>} : vector<1x32xf32>, vector<96x32xf32>, vector<1x96xf32> -> vector<1x96xf32>
    %487 = arith.addf %486, %283 : vector<1x96xf32>
    %488 = vector.extract_strided_slice %485 {offsets = [0, 0], sizes = [1, 32], strides = [1, 1]} : vector<1x96xf32> to vector<1x32xf32>
    %489 = vector.extract_strided_slice %487 {offsets = [0, 0], sizes = [1, 32], strides = [1, 1]} : vector<1x96xf32> to vector<1x32xf32>
    %490 = arith.addf %488, %489 : vector<1x32xf32>
    %491 = arith.negf %490 : vector<1x32xf32>
    %492 = math.exp %491 : vector<1x32xf32>
    %cst_117 = arith.constant 1.000000e+00 : f32
    %493 = vector.broadcast %cst_117 : f32 to vector<1x32xf32>
    %494 = arith.addf %493, %492 : vector<1x32xf32>
    %495 = arith.divf %493, %494 : vector<1x32xf32>
    %496 = vector.extract_strided_slice %485 {offsets = [0, 32], sizes = [1, 32], strides = [1, 1]} : vector<1x96xf32> to vector<1x32xf32>
    %497 = vector.extract_strided_slice %487 {offsets = [0, 32], sizes = [1, 32], strides = [1, 1]} : vector<1x96xf32> to vector<1x32xf32>
    %498 = arith.addf %496, %497 : vector<1x32xf32>
    %499 = arith.negf %498 : vector<1x32xf32>
    %500 = math.exp %499 : vector<1x32xf32>
    %cst_118 = arith.constant 1.000000e+00 : f32
    %501 = vector.broadcast %cst_118 : f32 to vector<1x32xf32>
    %502 = arith.addf %501, %500 : vector<1x32xf32>
    %503 = arith.divf %501, %502 : vector<1x32xf32>
    %504 = vector.extract_strided_slice %485 {offsets = [0, 64], sizes = [1, 32], strides = [1, 1]} : vector<1x96xf32> to vector<1x32xf32>
    %505 = vector.extract_strided_slice %487 {offsets = [0, 64], sizes = [1, 32], strides = [1, 1]} : vector<1x96xf32> to vector<1x32xf32>
    %506 = arith.mulf %495, %505 : vector<1x32xf32>
    %507 = arith.addf %504, %506 : vector<1x32xf32>
    %508 = math.tanh %507 : vector<1x32xf32>
    %cst_119 = arith.constant 1.000000e+00 : f32
    %509 = vector.broadcast %cst_119 : f32 to vector<1x32xf32>
    %510 = arith.subf %509, %503 : vector<1x32xf32>
    %511 = arith.mulf %510, %508 : vector<1x32xf32>
    %512 = arith.mulf %503, %480 : vector<1x32xf32>
    %513 = arith.addf %511, %512 : vector<1x32xf32>
    %c0_120 = arith.constant 0 : index
    %c1_121 = arith.constant 1 : index
    %c32_122 = arith.constant 32 : index
    %514 = vector.load %arg7[%c0_120, %c1_121, %c32_122] : memref<1x8x128xf32, #tpu.memory_space<vmem>>, vector<1x1x32xf32>
    %515 = vector.shape_cast %514 : vector<1x1x32xf32> to vector<1x32xf32>
    %516 = vector.shape_cast %513 : vector<1x32xf32> to vector<1x1x32xf32>
    tpu.vector_store %arg7[%c0_120, %c1_121, %c32_122], %516 {strides = array<i32>} : memref<1x8x128xf32, #tpu.memory_space<vmem>>, vector<1x1x32xf32>,
    %517 = vector.extract_strided_slice %9 {offsets = [0, 0, 96], sizes = [1, 1, 96], strides = [1, 1, 1]} : vector<1x8x192xf32> to vector<1x1x96xf32>
    %518 = vector.shape_cast %517 : vector<1x1x96xf32> to vector<1x96xf32>
    %cst_123 = arith.constant dense<0.000000e+00> : vector<1x96xf32>
    %519 = tpu.matmul %513, %281, %cst_123 {dimension_numbers = #tpu.dot_dimension_numbers<[1], [1], [0], [0], [0, 0, 1, 0], [], []>} : vector<1x32xf32>, vector<96x32xf32>, vector<1x96xf32> -> vector<1x96xf32>
    %520 = arith.addf %519, %283 : vector<1x96xf32>
    %521 = vector.extract_strided_slice %518 {offsets = [0, 0], sizes = [1, 32], strides = [1, 1]} : vector<1x96xf32> to vector<1x32xf32>
    %522 = vector.extract_strided_slice %520 {offsets = [0, 0], sizes = [1, 32], strides = [1, 1]} : vector<1x96xf32> to vector<1x32xf32>
    %523 = arith.addf %521, %522 : vector<1x32xf32>
    %524 = arith.negf %523 : vector<1x32xf32>
    %525 = math.exp %524 : vector<1x32xf32>
    %cst_124 = arith.constant 1.000000e+00 : f32
    %526 = vector.broadcast %cst_124 : f32 to vector<1x32xf32>
    %527 = arith.addf %526, %525 : vector<1x32xf32>
    %528 = arith.divf %526, %527 : vector<1x32xf32>
    %529 = vector.extract_strided_slice %518 {offsets = [0, 32], sizes = [1, 32], strides = [1, 1]} : vector<1x96xf32> to vector<1x32xf32>
    %530 = vector.extract_strided_slice %520 {offsets = [0, 32], sizes = [1, 32], strides = [1, 1]} : vector<1x96xf32> to vector<1x32xf32>
    %531 = arith.addf %529, %530 : vector<1x32xf32>
    %532 = arith.negf %531 : vector<1x32xf32>
    %533 = math.exp %532 : vector<1x32xf32>
    %cst_125 = arith.constant 1.000000e+00 : f32
    %534 = vector.broadcast %cst_125 : f32 to vector<1x32xf32>
    %535 = arith.addf %534, %533 : vector<1x32xf32>
    %536 = arith.divf %534, %535 : vector<1x32xf32>
    %537 = vector.extract_strided_slice %518 {offsets = [0, 64], sizes = [1, 32], strides = [1, 1]} : vector<1x96xf32> to vector<1x32xf32>
    %538 = vector.extract_strided_slice %520 {offsets = [0, 64], sizes = [1, 32], strides = [1, 1]} : vector<1x96xf32> to vector<1x32xf32>
    %539 = arith.mulf %528, %538 : vector<1x32xf32>
    %540 = arith.addf %537, %539 : vector<1x32xf32>
    %541 = math.tanh %540 : vector<1x32xf32>
    %cst_126 = arith.constant 1.000000e+00 : f32
    %542 = vector.broadcast %cst_126 : f32 to vector<1x32xf32>
    %543 = arith.subf %542, %536 : vector<1x32xf32>
    %544 = arith.mulf %543, %541 : vector<1x32xf32>
    %545 = arith.mulf %536, %513 : vector<1x32xf32>
    %546 = arith.addf %544, %545 : vector<1x32xf32>
    %c0_127 = arith.constant 0 : index
    %c0_128 = arith.constant 0 : index
    %c32_129 = arith.constant 32 : index
    %547 = vector.load %arg7[%c0_127, %c0_128, %c32_129] : memref<1x8x128xf32, #tpu.memory_space<vmem>>, vector<1x1x32xf32>
    %548 = vector.shape_cast %547 : vector<1x1x32xf32> to vector<1x32xf32>
    %549 = vector.shape_cast %546 : vector<1x32xf32> to vector<1x1x32xf32>
    tpu.vector_store %arg7[%c0_127, %c0_128, %c32_129], %549 {strides = array<i32>} : memref<1x8x128xf32, #tpu.memory_space<vmem>>, vector<1x1x32xf32>,
    %c0_130 = arith.constant 0 : index
    %c0_131 = arith.constant 0 : index
    %c0_132 = arith.constant 0 : index
    %550 = vector.load %arg7[%c0_130, %c0_131, %c0_132] : memref<1x8x128xf32, #tpu.memory_space<vmem>>, vector<1x8x64xf32>
    %c1_133 = arith.constant 1 : index
    %c0_134 = arith.constant 0 : index
    %c0_135 = arith.constant 0 : index
    %551 = vector.load %arg2[%c1_133, %c0_134, %c0_135] : memref<2x192x64xf32, #tpu.memory_space<vmem>>, vector<1x192x64xf32>
    %552 = vector.shape_cast %551 : vector<1x192x64xf32> to vector<192x64xf32>
    %553 = vector.shape_cast %550 : vector<1x8x64xf32> to vector<8x64xf32>
    %cst_136 = arith.constant dense<0.000000e+00> : vector<8x192xf32>
    %554 = tpu.matmul %553, %552, %cst_136 {dimension_numbers = #tpu.dot_dimension_numbers<[1], [1], [0], [0], [0, 0, 1, 0], [], []>} : vector<8x64xf32>, vector<192x64xf32>, vector<8x192xf32> -> vector<8x192xf32>
    %c1_137 = arith.constant 1 : index
    %c0_138 = arith.constant 0 : index
    %c0_139 = arith.constant 0 : index
    %555 = vector.load %arg4[%c1_137, %c0_138, %c0_139] : memref<2x1x192xf32, #tpu.memory_space<vmem>>, vector<1x1x192xf32>
    %556 = vector.shape_cast %555 : vector<1x1x192xf32> to vector<1x192xf32>
    %557 = vector.broadcast %556 : vector<1x192xf32> to vector<8x192xf32>
    %558 = arith.addf %554, %557 : vector<8x192xf32>
    %559 = vector.shape_cast %558 : vector<8x192xf32> to vector<1x8x192xf32>
    %c2_140 = arith.constant 2 : index
    %c0_141 = arith.constant 0 : index
    %c0_142 = arith.constant 0 : index
    %560 = vector.load %arg3[%c2_140, %c0_141, %c0_142] : memref<4x96x32xf32, #tpu.memory_space<vmem>>, vector<1x96x32xf32>
    %561 = vector.shape_cast %560 : vector<1x96x32xf32> to vector<96x32xf32>
    %c2_143 = arith.constant 2 : index
    %c0_144 = arith.constant 0 : index
    %c0_145 = arith.constant 0 : index
    %562 = vector.load %arg5[%c2_143, %c0_144, %c0_145] : memref<4x1x96xf32, #tpu.memory_space<vmem>>, vector<1x1x96xf32>
    %563 = vector.shape_cast %562 : vector<1x1x96xf32> to vector<1x96xf32>
    %c2_146 = arith.constant 2 : index
    %c0_147 = arith.constant 0 : index
    %c0_148 = arith.constant 0 : index
    %564 = vector.load %arg6[%c2_146, %c0_147, %c0_148] : memref<4x1x32xf32, #tpu.memory_space<vmem>>, vector<1x1x32xf32>
    %565 = vector.shape_cast %564 : vector<1x1x32xf32> to vector<1x32xf32>
    %566 = vector.extract_strided_slice %559 {offsets = [0, 0, 0], sizes = [1, 1, 96], strides = [1, 1, 1]} : vector<1x8x192xf32> to vector<1x1x96xf32>
    %567 = vector.shape_cast %566 : vector<1x1x96xf32> to vector<1x96xf32>
    %cst_149 = arith.constant dense<0.000000e+00> : vector<1x96xf32>
    %568 = tpu.matmul %565, %561, %cst_149 {dimension_numbers = #tpu.dot_dimension_numbers<[1], [1], [0], [0], [0, 0, 1, 0], [], []>} : vector<1x32xf32>, vector<96x32xf32>, vector<1x96xf32> -> vector<1x96xf32>
    %569 = arith.addf %568, %563 : vector<1x96xf32>
    %570 = vector.extract_strided_slice %567 {offsets = [0, 0], sizes = [1, 32], strides = [1, 1]} : vector<1x96xf32> to vector<1x32xf32>
    %571 = vector.extract_strided_slice %569 {offsets = [0, 0], sizes = [1, 32], strides = [1, 1]} : vector<1x96xf32> to vector<1x32xf32>
    %572 = arith.addf %570, %571 : vector<1x32xf32>
    %573 = arith.negf %572 : vector<1x32xf32>
    %574 = math.exp %573 : vector<1x32xf32>
    %cst_150 = arith.constant 1.000000e+00 : f32
    %575 = vector.broadcast %cst_150 : f32 to vector<1x32xf32>
    %576 = arith.addf %575, %574 : vector<1x32xf32>
    %577 = arith.divf %575, %576 : vector<1x32xf32>
    %578 = vector.extract_strided_slice %567 {offsets = [0, 32], sizes = [1, 32], strides = [1, 1]} : vector<1x96xf32> to vector<1x32xf32>
    %579 = vector.extract_strided_slice %569 {offsets = [0, 32], sizes = [1, 32], strides = [1, 1]} : vector<1x96xf32> to vector<1x32xf32>
    %580 = arith.addf %578, %579 : vector<1x32xf32>
    %581 = arith.negf %580 : vector<1x32xf32>
    %582 = math.exp %581 : vector<1x32xf32>
    %cst_151 = arith.constant 1.000000e+00 : f32
    %583 = vector.broadcast %cst_151 : f32 to vector<1x32xf32>
    %584 = arith.addf %583, %582 : vector<1x32xf32>
    %585 = arith.divf %583, %584 : vector<1x32xf32>
    %586 = vector.extract_strided_slice %567 {offsets = [0, 64], sizes = [1, 32], strides = [1, 1]} : vector<1x96xf32> to vector<1x32xf32>
    %587 = vector.extract_strided_slice %569 {offsets = [0, 64], sizes = [1, 32], strides = [1, 1]} : vector<1x96xf32> to vector<1x32xf32>
    %588 = arith.mulf %577, %587 : vector<1x32xf32>
    %589 = arith.addf %586, %588 : vector<1x32xf32>
    %590 = math.tanh %589 : vector<1x32xf32>
    %cst_152 = arith.constant 1.000000e+00 : f32
    %591 = vector.broadcast %cst_152 : f32 to vector<1x32xf32>
    %592 = arith.subf %591, %585 : vector<1x32xf32>
    %593 = arith.mulf %592, %590 : vector<1x32xf32>
    %594 = arith.mulf %585, %565 : vector<1x32xf32>
    %595 = arith.addf %593, %594 : vector<1x32xf32>
    %c0_153 = arith.constant 0 : index
    %c0_154 = arith.constant 0 : index
    %c64 = arith.constant 64 : index
    %596 = vector.load %arg7[%c0_153, %c0_154, %c64] : memref<1x8x128xf32, #tpu.memory_space<vmem>>, vector<1x1x32xf32>
    %597 = vector.shape_cast %596 : vector<1x1x32xf32> to vector<1x32xf32>
    %598 = vector.shape_cast %595 : vector<1x32xf32> to vector<1x1x32xf32>
    tpu.vector_store %arg7[%c0_153, %c0_154, %c64], %598 {strides = array<i32>} : memref<1x8x128xf32, #tpu.memory_space<vmem>>, vector<1x1x32xf32>,
    %599 = vector.extract_strided_slice %559 {offsets = [0, 1, 0], sizes = [1, 1, 96], strides = [1, 1, 1]} : vector<1x8x192xf32> to vector<1x1x96xf32>
    %600 = vector.shape_cast %599 : vector<1x1x96xf32> to vector<1x96xf32>
    %cst_155 = arith.constant dense<0.000000e+00> : vector<1x96xf32>
    %601 = tpu.matmul %595, %561, %cst_155 {dimension_numbers = #tpu.dot_dimension_numbers<[1], [1], [0], [0], [0, 0, 1, 0], [], []>} : vector<1x32xf32>, vector<96x32xf32>, vector<1x96xf32> -> vector<1x96xf32>
    %602 = arith.addf %601, %563 : vector<1x96xf32>
    %603 = vector.extract_strided_slice %600 {offsets = [0, 0], sizes = [1, 32], strides = [1, 1]} : vector<1x96xf32> to vector<1x32xf32>
    %604 = vector.extract_strided_slice %602 {offsets = [0, 0], sizes = [1, 32], strides = [1, 1]} : vector<1x96xf32> to vector<1x32xf32>
    %605 = arith.addf %603, %604 : vector<1x32xf32>
    %606 = arith.negf %605 : vector<1x32xf32>
    %607 = math.exp %606 : vector<1x32xf32>
    %cst_156 = arith.constant 1.000000e+00 : f32
    %608 = vector.broadcast %cst_156 : f32 to vector<1x32xf32>
    %609 = arith.addf %608, %607 : vector<1x32xf32>
    %610 = arith.divf %608, %609 : vector<1x32xf32>
    %611 = vector.extract_strided_slice %600 {offsets = [0, 32], sizes = [1, 32], strides = [1, 1]} : vector<1x96xf32> to vector<1x32xf32>
    %612 = vector.extract_strided_slice %602 {offsets = [0, 32], sizes = [1, 32], strides = [1, 1]} : vector<1x96xf32> to vector<1x32xf32>
    %613 = arith.addf %611, %612 : vector<1x32xf32>
    %614 = arith.negf %613 : vector<1x32xf32>
    %615 = math.exp %614 : vector<1x32xf32>
    %cst_157 = arith.constant 1.000000e+00 : f32
    %616 = vector.broadcast %cst_157 : f32 to vector<1x32xf32>
    %617 = arith.addf %616, %615 : vector<1x32xf32>
    %618 = arith.divf %616, %617 : vector<1x32xf32>
    %619 = vector.extract_strided_slice %600 {offsets = [0, 64], sizes = [1, 32], strides = [1, 1]} : vector<1x96xf32> to vector<1x32xf32>
    %620 = vector.extract_strided_slice %602 {offsets = [0, 64], sizes = [1, 32], strides = [1, 1]} : vector<1x96xf32> to vector<1x32xf32>
    %621 = arith.mulf %610, %620 : vector<1x32xf32>
    %622 = arith.addf %619, %621 : vector<1x32xf32>
    %623 = math.tanh %622 : vector<1x32xf32>
    %cst_158 = arith.constant 1.000000e+00 : f32
    %624 = vector.broadcast %cst_158 : f32 to vector<1x32xf32>
    %625 = arith.subf %624, %618 : vector<1x32xf32>
    %626 = arith.mulf %625, %623 : vector<1x32xf32>
    %627 = arith.mulf %618, %595 : vector<1x32xf32>
    %628 = arith.addf %626, %627 : vector<1x32xf32>
    %c0_159 = arith.constant 0 : index
    %c1_160 = arith.constant 1 : index
    %c64_161 = arith.constant 64 : index
    %629 = vector.load %arg7[%c0_159, %c1_160, %c64_161] : memref<1x8x128xf32, #tpu.memory_space<vmem>>, vector<1x1x32xf32>
    %630 = vector.shape_cast %629 : vector<1x1x32xf32> to vector<1x32xf32>
    %631 = vector.shape_cast %628 : vector<1x32xf32> to vector<1x1x32xf32>
    tpu.vector_store %arg7[%c0_159, %c1_160, %c64_161], %631 {strides = array<i32>} : memref<1x8x128xf32, #tpu.memory_space<vmem>>, vector<1x1x32xf32>,
    %632 = vector.extract_strided_slice %559 {offsets = [0, 2, 0], sizes = [1, 1, 96], strides = [1, 1, 1]} : vector<1x8x192xf32> to vector<1x1x96xf32>
    %633 = vector.shape_cast %632 : vector<1x1x96xf32> to vector<1x96xf32>
    %cst_162 = arith.constant dense<0.000000e+00> : vector<1x96xf32>
    %634 = tpu.matmul %628, %561, %cst_162 {dimension_numbers = #tpu.dot_dimension_numbers<[1], [1], [0], [0], [0, 0, 1, 0], [], []>} : vector<1x32xf32>, vector<96x32xf32>, vector<1x96xf32> -> vector<1x96xf32>
    %635 = arith.addf %634, %563 : vector<1x96xf32>
    %636 = vector.extract_strided_slice %633 {offsets = [0, 0], sizes = [1, 32], strides = [1, 1]} : vector<1x96xf32> to vector<1x32xf32>
    %637 = vector.extract_strided_slice %635 {offsets = [0, 0], sizes = [1, 32], strides = [1, 1]} : vector<1x96xf32> to vector<1x32xf32>
    %638 = arith.addf %636, %637 : vector<1x32xf32>
    %639 = arith.negf %638 : vector<1x32xf32>
    %640 = math.exp %639 : vector<1x32xf32>
    %cst_163 = arith.constant 1.000000e+00 : f32
    %641 = vector.broadcast %cst_163 : f32 to vector<1x32xf32>
    %642 = arith.addf %641, %640 : vector<1x32xf32>
    %643 = arith.divf %641, %642 : vector<1x32xf32>
    %644 = vector.extract_strided_slice %633 {offsets = [0, 32], sizes = [1, 32], strides = [1, 1]} : vector<1x96xf32> to vector<1x32xf32>
    %645 = vector.extract_strided_slice %635 {offsets = [0, 32], sizes = [1, 32], strides = [1, 1]} : vector<1x96xf32> to vector<1x32xf32>
    %646 = arith.addf %644, %645 : vector<1x32xf32>
    %647 = arith.negf %646 : vector<1x32xf32>
    %648 = math.exp %647 : vector<1x32xf32>
    %cst_164 = arith.constant 1.000000e+00 : f32
    %649 = vector.broadcast %cst_164 : f32 to vector<1x32xf32>
    %650 = arith.addf %649, %648 : vector<1x32xf32>
    %651 = arith.divf %649, %650 : vector<1x32xf32>
    %652 = vector.extract_strided_slice %633 {offsets = [0, 64], sizes = [1, 32], strides = [1, 1]} : vector<1x96xf32> to vector<1x32xf32>
    %653 = vector.extract_strided_slice %635 {offsets = [0, 64], sizes = [1, 32], strides = [1, 1]} : vector<1x96xf32> to vector<1x32xf32>
    %654 = arith.mulf %643, %653 : vector<1x32xf32>
    %655 = arith.addf %652, %654 : vector<1x32xf32>
    %656 = math.tanh %655 : vector<1x32xf32>
    %cst_165 = arith.constant 1.000000e+00 : f32
    %657 = vector.broadcast %cst_165 : f32 to vector<1x32xf32>
    %658 = arith.subf %657, %651 : vector<1x32xf32>
    %659 = arith.mulf %658, %656 : vector<1x32xf32>
    %660 = arith.mulf %651, %628 : vector<1x32xf32>
    %661 = arith.addf %659, %660 : vector<1x32xf32>
    %c0_166 = arith.constant 0 : index
    %c2_167 = arith.constant 2 : index
    %c64_168 = arith.constant 64 : index
    %662 = vector.load %arg7[%c0_166, %c2_167, %c64_168] : memref<1x8x128xf32, #tpu.memory_space<vmem>>, vector<1x1x32xf32>
    %663 = vector.shape_cast %662 : vector<1x1x32xf32> to vector<1x32xf32>
    %664 = vector.shape_cast %661 : vector<1x32xf32> to vector<1x1x32xf32>
    tpu.vector_store %arg7[%c0_166, %c2_167, %c64_168], %664 {strides = array<i32>} : memref<1x8x128xf32, #tpu.memory_space<vmem>>, vector<1x1x32xf32>,
    %665 = vector.extract_strided_slice %559 {offsets = [0, 3, 0], sizes = [1, 1, 96], strides = [1, 1, 1]} : vector<1x8x192xf32> to vector<1x1x96xf32>
    %666 = vector.shape_cast %665 : vector<1x1x96xf32> to vector<1x96xf32>
    %cst_169 = arith.constant dense<0.000000e+00> : vector<1x96xf32>
    %667 = tpu.matmul %661, %561, %cst_169 {dimension_numbers = #tpu.dot_dimension_numbers<[1], [1], [0], [0], [0, 0, 1, 0], [], []>} : vector<1x32xf32>, vector<96x32xf32>, vector<1x96xf32> -> vector<1x96xf32>
    %668 = arith.addf %667, %563 : vector<1x96xf32>
    %669 = vector.extract_strided_slice %666 {offsets = [0, 0], sizes = [1, 32], strides = [1, 1]} : vector<1x96xf32> to vector<1x32xf32>
    %670 = vector.extract_strided_slice %668 {offsets = [0, 0], sizes = [1, 32], strides = [1, 1]} : vector<1x96xf32> to vector<1x32xf32>
    %671 = arith.addf %669, %670 : vector<1x32xf32>
    %672 = arith.negf %671 : vector<1x32xf32>
    %673 = math.exp %672 : vector<1x32xf32>
    %cst_170 = arith.constant 1.000000e+00 : f32
    %674 = vector.broadcast %cst_170 : f32 to vector<1x32xf32>
    %675 = arith.addf %674, %673 : vector<1x32xf32>
    %676 = arith.divf %674, %675 : vector<1x32xf32>
    %677 = vector.extract_strided_slice %666 {offsets = [0, 32], sizes = [1, 32], strides = [1, 1]} : vector<1x96xf32> to vector<1x32xf32>
    %678 = vector.extract_strided_slice %668 {offsets = [0, 32], sizes = [1, 32], strides = [1, 1]} : vector<1x96xf32> to vector<1x32xf32>
    %679 = arith.addf %677, %678 : vector<1x32xf32>
    %680 = arith.negf %679 : vector<1x32xf32>
    %681 = math.exp %680 : vector<1x32xf32>
    %cst_171 = arith.constant 1.000000e+00 : f32
    %682 = vector.broadcast %cst_171 : f32 to vector<1x32xf32>
    %683 = arith.addf %682, %681 : vector<1x32xf32>
    %684 = arith.divf %682, %683 : vector<1x32xf32>
    %685 = vector.extract_strided_slice %666 {offsets = [0, 64], sizes = [1, 32], strides = [1, 1]} : vector<1x96xf32> to vector<1x32xf32>
    %686 = vector.extract_strided_slice %668 {offsets = [0, 64], sizes = [1, 32], strides = [1, 1]} : vector<1x96xf32> to vector<1x32xf32>
    %687 = arith.mulf %676, %686 : vector<1x32xf32>
    %688 = arith.addf %685, %687 : vector<1x32xf32>
    %689 = math.tanh %688 : vector<1x32xf32>
    %cst_172 = arith.constant 1.000000e+00 : f32
    %690 = vector.broadcast %cst_172 : f32 to vector<1x32xf32>
    %691 = arith.subf %690, %684 : vector<1x32xf32>
    %692 = arith.mulf %691, %689 : vector<1x32xf32>
    %693 = arith.mulf %684, %661 : vector<1x32xf32>
    %694 = arith.addf %692, %693 : vector<1x32xf32>
    %c0_173 = arith.constant 0 : index
    %c3_174 = arith.constant 3 : index
    %c64_175 = arith.constant 64 : index
    %695 = vector.load %arg7[%c0_173, %c3_174, %c64_175] : memref<1x8x128xf32, #tpu.memory_space<vmem>>, vector<1x1x32xf32>
    %696 = vector.shape_cast %695 : vector<1x1x32xf32> to vector<1x32xf32>
    %697 = vector.shape_cast %694 : vector<1x32xf32> to vector<1x1x32xf32>
    tpu.vector_store %arg7[%c0_173, %c3_174, %c64_175], %697 {strides = array<i32>} : memref<1x8x128xf32, #tpu.memory_space<vmem>>, vector<1x1x32xf32>,
    %698 = vector.extract_strided_slice %559 {offsets = [0, 4, 0], sizes = [1, 1, 96], strides = [1, 1, 1]} : vector<1x8x192xf32> to vector<1x1x96xf32>
    %699 = vector.shape_cast %698 : vector<1x1x96xf32> to vector<1x96xf32>
    %cst_176 = arith.constant dense<0.000000e+00> : vector<1x96xf32>
    %700 = tpu.matmul %694, %561, %cst_176 {dimension_numbers = #tpu.dot_dimension_numbers<[1], [1], [0], [0], [0, 0, 1, 0], [], []>} : vector<1x32xf32>, vector<96x32xf32>, vector<1x96xf32> -> vector<1x96xf32>
    %701 = arith.addf %700, %563 : vector<1x96xf32>
    %702 = vector.extract_strided_slice %699 {offsets = [0, 0], sizes = [1, 32], strides = [1, 1]} : vector<1x96xf32> to vector<1x32xf32>
    %703 = vector.extract_strided_slice %701 {offsets = [0, 0], sizes = [1, 32], strides = [1, 1]} : vector<1x96xf32> to vector<1x32xf32>
    %704 = arith.addf %702, %703 : vector<1x32xf32>
    %705 = arith.negf %704 : vector<1x32xf32>
    %706 = math.exp %705 : vector<1x32xf32>
    %cst_177 = arith.constant 1.000000e+00 : f32
    %707 = vector.broadcast %cst_177 : f32 to vector<1x32xf32>
    %708 = arith.addf %707, %706 : vector<1x32xf32>
    %709 = arith.divf %707, %708 : vector<1x32xf32>
    %710 = vector.extract_strided_slice %699 {offsets = [0, 32], sizes = [1, 32], strides = [1, 1]} : vector<1x96xf32> to vector<1x32xf32>
    %711 = vector.extract_strided_slice %701 {offsets = [0, 32], sizes = [1, 32], strides = [1, 1]} : vector<1x96xf32> to vector<1x32xf32>
    %712 = arith.addf %710, %711 : vector<1x32xf32>
    %713 = arith.negf %712 : vector<1x32xf32>
    %714 = math.exp %713 : vector<1x32xf32>
    %cst_178 = arith.constant 1.000000e+00 : f32
    %715 = vector.broadcast %cst_178 : f32 to vector<1x32xf32>
    %716 = arith.addf %715, %714 : vector<1x32xf32>
    %717 = arith.divf %715, %716 : vector<1x32xf32>
    %718 = vector.extract_strided_slice %699 {offsets = [0, 64], sizes = [1, 32], strides = [1, 1]} : vector<1x96xf32> to vector<1x32xf32>
    %719 = vector.extract_strided_slice %701 {offsets = [0, 64], sizes = [1, 32], strides = [1, 1]} : vector<1x96xf32> to vector<1x32xf32>
    %720 = arith.mulf %709, %719 : vector<1x32xf32>
    %721 = arith.addf %718, %720 : vector<1x32xf32>
    %722 = math.tanh %721 : vector<1x32xf32>
    %cst_179 = arith.constant 1.000000e+00 : f32
    %723 = vector.broadcast %cst_179 : f32 to vector<1x32xf32>
    %724 = arith.subf %723, %717 : vector<1x32xf32>
    %725 = arith.mulf %724, %722 : vector<1x32xf32>
    %726 = arith.mulf %717, %694 : vector<1x32xf32>
    %727 = arith.addf %725, %726 : vector<1x32xf32>
    %c0_180 = arith.constant 0 : index
    %c4_181 = arith.constant 4 : index
    %c64_182 = arith.constant 64 : index
    %728 = vector.load %arg7[%c0_180, %c4_181, %c64_182] : memref<1x8x128xf32, #tpu.memory_space<vmem>>, vector<1x1x32xf32>
    %729 = vector.shape_cast %728 : vector<1x1x32xf32> to vector<1x32xf32>
    %730 = vector.shape_cast %727 : vector<1x32xf32> to vector<1x1x32xf32>
    tpu.vector_store %arg7[%c0_180, %c4_181, %c64_182], %730 {strides = array<i32>} : memref<1x8x128xf32, #tpu.memory_space<vmem>>, vector<1x1x32xf32>,
    %731 = vector.extract_strided_slice %559 {offsets = [0, 5, 0], sizes = [1, 1, 96], strides = [1, 1, 1]} : vector<1x8x192xf32> to vector<1x1x96xf32>
    %732 = vector.shape_cast %731 : vector<1x1x96xf32> to vector<1x96xf32>
    %cst_183 = arith.constant dense<0.000000e+00> : vector<1x96xf32>
    %733 = tpu.matmul %727, %561, %cst_183 {dimension_numbers = #tpu.dot_dimension_numbers<[1], [1], [0], [0], [0, 0, 1, 0], [], []>} : vector<1x32xf32>, vector<96x32xf32>, vector<1x96xf32> -> vector<1x96xf32>
    %734 = arith.addf %733, %563 : vector<1x96xf32>
    %735 = vector.extract_strided_slice %732 {offsets = [0, 0], sizes = [1, 32], strides = [1, 1]} : vector<1x96xf32> to vector<1x32xf32>
    %736 = vector.extract_strided_slice %734 {offsets = [0, 0], sizes = [1, 32], strides = [1, 1]} : vector<1x96xf32> to vector<1x32xf32>
    %737 = arith.addf %735, %736 : vector<1x32xf32>
    %738 = arith.negf %737 : vector<1x32xf32>
    %739 = math.exp %738 : vector<1x32xf32>
    %cst_184 = arith.constant 1.000000e+00 : f32
    %740 = vector.broadcast %cst_184 : f32 to vector<1x32xf32>
    %741 = arith.addf %740, %739 : vector<1x32xf32>
    %742 = arith.divf %740, %741 : vector<1x32xf32>
    %743 = vector.extract_strided_slice %732 {offsets = [0, 32], sizes = [1, 32], strides = [1, 1]} : vector<1x96xf32> to vector<1x32xf32>
    %744 = vector.extract_strided_slice %734 {offsets = [0, 32], sizes = [1, 32], strides = [1, 1]} : vector<1x96xf32> to vector<1x32xf32>
    %745 = arith.addf %743, %744 : vector<1x32xf32>
    %746 = arith.negf %745 : vector<1x32xf32>
    %747 = math.exp %746 : vector<1x32xf32>
    %cst_185 = arith.constant 1.000000e+00 : f32
    %748 = vector.broadcast %cst_185 : f32 to vector<1x32xf32>
    %749 = arith.addf %748, %747 : vector<1x32xf32>
    %750 = arith.divf %748, %749 : vector<1x32xf32>
    %751 = vector.extract_strided_slice %732 {offsets = [0, 64], sizes = [1, 32], strides = [1, 1]} : vector<1x96xf32> to vector<1x32xf32>
    %752 = vector.extract_strided_slice %734 {offsets = [0, 64], sizes = [1, 32], strides = [1, 1]} : vector<1x96xf32> to vector<1x32xf32>
    %753 = arith.mulf %742, %752 : vector<1x32xf32>
    %754 = arith.addf %751, %753 : vector<1x32xf32>
    %755 = math.tanh %754 : vector<1x32xf32>
    %cst_186 = arith.constant 1.000000e+00 : f32
    %756 = vector.broadcast %cst_186 : f32 to vector<1x32xf32>
    %757 = arith.subf %756, %750 : vector<1x32xf32>
    %758 = arith.mulf %757, %755 : vector<1x32xf32>
    %759 = arith.mulf %750, %727 : vector<1x32xf32>
    %760 = arith.addf %758, %759 : vector<1x32xf32>
    %c0_187 = arith.constant 0 : index
    %c5_188 = arith.constant 5 : index
    %c64_189 = arith.constant 64 : index
    %761 = vector.load %arg7[%c0_187, %c5_188, %c64_189] : memref<1x8x128xf32, #tpu.memory_space<vmem>>, vector<1x1x32xf32>
    %762 = vector.shape_cast %761 : vector<1x1x32xf32> to vector<1x32xf32>
    %763 = vector.shape_cast %760 : vector<1x32xf32> to vector<1x1x32xf32>
    tpu.vector_store %arg7[%c0_187, %c5_188, %c64_189], %763 {strides = array<i32>} : memref<1x8x128xf32, #tpu.memory_space<vmem>>, vector<1x1x32xf32>,
    %764 = vector.extract_strided_slice %559 {offsets = [0, 6, 0], sizes = [1, 1, 96], strides = [1, 1, 1]} : vector<1x8x192xf32> to vector<1x1x96xf32>
    %765 = vector.shape_cast %764 : vector<1x1x96xf32> to vector<1x96xf32>
    %cst_190 = arith.constant dense<0.000000e+00> : vector<1x96xf32>
    %766 = tpu.matmul %760, %561, %cst_190 {dimension_numbers = #tpu.dot_dimension_numbers<[1], [1], [0], [0], [0, 0, 1, 0], [], []>} : vector<1x32xf32>, vector<96x32xf32>, vector<1x96xf32> -> vector<1x96xf32>
    %767 = arith.addf %766, %563 : vector<1x96xf32>
    %768 = vector.extract_strided_slice %765 {offsets = [0, 0], sizes = [1, 32], strides = [1, 1]} : vector<1x96xf32> to vector<1x32xf32>
    %769 = vector.extract_strided_slice %767 {offsets = [0, 0], sizes = [1, 32], strides = [1, 1]} : vector<1x96xf32> to vector<1x32xf32>
    %770 = arith.addf %768, %769 : vector<1x32xf32>
    %771 = arith.negf %770 : vector<1x32xf32>
    %772 = math.exp %771 : vector<1x32xf32>
    %cst_191 = arith.constant 1.000000e+00 : f32
    %773 = vector.broadcast %cst_191 : f32 to vector<1x32xf32>
    %774 = arith.addf %773, %772 : vector<1x32xf32>
    %775 = arith.divf %773, %774 : vector<1x32xf32>
    %776 = vector.extract_strided_slice %765 {offsets = [0, 32], sizes = [1, 32], strides = [1, 1]} : vector<1x96xf32> to vector<1x32xf32>
    %777 = vector.extract_strided_slice %767 {offsets = [0, 32], sizes = [1, 32], strides = [1, 1]} : vector<1x96xf32> to vector<1x32xf32>
    %778 = arith.addf %776, %777 : vector<1x32xf32>
    %779 = arith.negf %778 : vector<1x32xf32>
    %780 = math.exp %779 : vector<1x32xf32>
    %cst_192 = arith.constant 1.000000e+00 : f32
    %781 = vector.broadcast %cst_192 : f32 to vector<1x32xf32>
    %782 = arith.addf %781, %780 : vector<1x32xf32>
    %783 = arith.divf %781, %782 : vector<1x32xf32>
    %784 = vector.extract_strided_slice %765 {offsets = [0, 64], sizes = [1, 32], strides = [1, 1]} : vector<1x96xf32> to vector<1x32xf32>
    %785 = vector.extract_strided_slice %767 {offsets = [0, 64], sizes = [1, 32], strides = [1, 1]} : vector<1x96xf32> to vector<1x32xf32>
    %786 = arith.mulf %775, %785 : vector<1x32xf32>
    %787 = arith.addf %784, %786 : vector<1x32xf32>
    %788 = math.tanh %787 : vector<1x32xf32>
    %cst_193 = arith.constant 1.000000e+00 : f32
    %789 = vector.broadcast %cst_193 : f32 to vector<1x32xf32>
    %790 = arith.subf %789, %783 : vector<1x32xf32>
    %791 = arith.mulf %790, %788 : vector<1x32xf32>
    %792 = arith.mulf %783, %760 : vector<1x32xf32>
    %793 = arith.addf %791, %792 : vector<1x32xf32>
    %c0_194 = arith.constant 0 : index
    %c6_195 = arith.constant 6 : index
    %c64_196 = arith.constant 64 : index
    %794 = vector.load %arg7[%c0_194, %c6_195, %c64_196] : memref<1x8x128xf32, #tpu.memory_space<vmem>>, vector<1x1x32xf32>
    %795 = vector.shape_cast %794 : vector<1x1x32xf32> to vector<1x32xf32>
    %796 = vector.shape_cast %793 : vector<1x32xf32> to vector<1x1x32xf32>
    tpu.vector_store %arg7[%c0_194, %c6_195, %c64_196], %796 {strides = array<i32>} : memref<1x8x128xf32, #tpu.memory_space<vmem>>, vector<1x1x32xf32>,
    %797 = vector.extract_strided_slice %559 {offsets = [0, 7, 0], sizes = [1, 1, 96], strides = [1, 1, 1]} : vector<1x8x192xf32> to vector<1x1x96xf32>
    %798 = vector.shape_cast %797 : vector<1x1x96xf32> to vector<1x96xf32>
    %cst_197 = arith.constant dense<0.000000e+00> : vector<1x96xf32>
    %799 = tpu.matmul %793, %561, %cst_197 {dimension_numbers = #tpu.dot_dimension_numbers<[1], [1], [0], [0], [0, 0, 1, 0], [], []>} : vector<1x32xf32>, vector<96x32xf32>, vector<1x96xf32> -> vector<1x96xf32>
    %800 = arith.addf %799, %563 : vector<1x96xf32>
    %801 = vector.extract_strided_slice %798 {offsets = [0, 0], sizes = [1, 32], strides = [1, 1]} : vector<1x96xf32> to vector<1x32xf32>
    %802 = vector.extract_strided_slice %800 {offsets = [0, 0], sizes = [1, 32], strides = [1, 1]} : vector<1x96xf32> to vector<1x32xf32>
    %803 = arith.addf %801, %802 : vector<1x32xf32>
    %804 = arith.negf %803 : vector<1x32xf32>
    %805 = math.exp %804 : vector<1x32xf32>
    %cst_198 = arith.constant 1.000000e+00 : f32
    %806 = vector.broadcast %cst_198 : f32 to vector<1x32xf32>
    %807 = arith.addf %806, %805 : vector<1x32xf32>
    %808 = arith.divf %806, %807 : vector<1x32xf32>
    %809 = vector.extract_strided_slice %798 {offsets = [0, 32], sizes = [1, 32], strides = [1, 1]} : vector<1x96xf32> to vector<1x32xf32>
    %810 = vector.extract_strided_slice %800 {offsets = [0, 32], sizes = [1, 32], strides = [1, 1]} : vector<1x96xf32> to vector<1x32xf32>
    %811 = arith.addf %809, %810 : vector<1x32xf32>
    %812 = arith.negf %811 : vector<1x32xf32>
    %813 = math.exp %812 : vector<1x32xf32>
    %cst_199 = arith.constant 1.000000e+00 : f32
    %814 = vector.broadcast %cst_199 : f32 to vector<1x32xf32>
    %815 = arith.addf %814, %813 : vector<1x32xf32>
    %816 = arith.divf %814, %815 : vector<1x32xf32>
    %817 = vector.extract_strided_slice %798 {offsets = [0, 64], sizes = [1, 32], strides = [1, 1]} : vector<1x96xf32> to vector<1x32xf32>
    %818 = vector.extract_strided_slice %800 {offsets = [0, 64], sizes = [1, 32], strides = [1, 1]} : vector<1x96xf32> to vector<1x32xf32>
    %819 = arith.mulf %808, %818 : vector<1x32xf32>
    %820 = arith.addf %817, %819 : vector<1x32xf32>
    %821 = math.tanh %820 : vector<1x32xf32>
    %cst_200 = arith.constant 1.000000e+00 : f32
    %822 = vector.broadcast %cst_200 : f32 to vector<1x32xf32>
    %823 = arith.subf %822, %816 : vector<1x32xf32>
    %824 = arith.mulf %823, %821 : vector<1x32xf32>
    %825 = arith.mulf %816, %793 : vector<1x32xf32>
    %826 = arith.addf %824, %825 : vector<1x32xf32>
    %c0_201 = arith.constant 0 : index
    %c7_202 = arith.constant 7 : index
    %c64_203 = arith.constant 64 : index
    %827 = vector.load %arg7[%c0_201, %c7_202, %c64_203] : memref<1x8x128xf32, #tpu.memory_space<vmem>>, vector<1x1x32xf32>
    %828 = vector.shape_cast %827 : vector<1x1x32xf32> to vector<1x32xf32>
    %829 = vector.shape_cast %826 : vector<1x32xf32> to vector<1x1x32xf32>
    tpu.vector_store %arg7[%c0_201, %c7_202, %c64_203], %829 {strides = array<i32>} : memref<1x8x128xf32, #tpu.memory_space<vmem>>, vector<1x1x32xf32>,
    %c3_204 = arith.constant 3 : index
    %c0_205 = arith.constant 0 : index
    %c0_206 = arith.constant 0 : index
    %830 = vector.load %arg3[%c3_204, %c0_205, %c0_206] : memref<4x96x32xf32, #tpu.memory_space<vmem>>, vector<1x96x32xf32>
    %831 = vector.shape_cast %830 : vector<1x96x32xf32> to vector<96x32xf32>
    %c3_207 = arith.constant 3 : index
    %c0_208 = arith.constant 0 : index
    %c0_209 = arith.constant 0 : index
    %832 = vector.load %arg5[%c3_207, %c0_208, %c0_209] : memref<4x1x96xf32, #tpu.memory_space<vmem>>, vector<1x1x96xf32>
    %833 = vector.shape_cast %832 : vector<1x1x96xf32> to vector<1x96xf32>
    %c3_210 = arith.constant 3 : index
    %c0_211 = arith.constant 0 : index
    %c0_212 = arith.constant 0 : index
    %834 = vector.load %arg6[%c3_210, %c0_211, %c0_212] : memref<4x1x32xf32, #tpu.memory_space<vmem>>, vector<1x1x32xf32>
    %835 = vector.shape_cast %834 : vector<1x1x32xf32> to vector<1x32xf32>
    %836 = vector.extract_strided_slice %559 {offsets = [0, 7, 96], sizes = [1, 1, 96], strides = [1, 1, 1]} : vector<1x8x192xf32> to vector<1x1x96xf32>
    %837 = vector.shape_cast %836 : vector<1x1x96xf32> to vector<1x96xf32>
    %cst_213 = arith.constant dense<0.000000e+00> : vector<1x96xf32>
    %838 = tpu.matmul %835, %831, %cst_213 {dimension_numbers = #tpu.dot_dimension_numbers<[1], [1], [0], [0], [0, 0, 1, 0], [], []>} : vector<1x32xf32>, vector<96x32xf32>, vector<1x96xf32> -> vector<1x96xf32>
    %839 = arith.addf %838, %833 : vector<1x96xf32>
    %840 = vector.extract_strided_slice %837 {offsets = [0, 0], sizes = [1, 32], strides = [1, 1]} : vector<1x96xf32> to vector<1x32xf32>
    %841 = vector.extract_strided_slice %839 {offsets = [0, 0], sizes = [1, 32], strides = [1, 1]} : vector<1x96xf32> to vector<1x32xf32>
    %842 = arith.addf %840, %841 : vector<1x32xf32>
    %843 = arith.negf %842 : vector<1x32xf32>
    %844 = math.exp %843 : vector<1x32xf32>
    %cst_214 = arith.constant 1.000000e+00 : f32
    %845 = vector.broadcast %cst_214 : f32 to vector<1x32xf32>
    %846 = arith.addf %845, %844 : vector<1x32xf32>
    %847 = arith.divf %845, %846 : vector<1x32xf32>
    %848 = vector.extract_strided_slice %837 {offsets = [0, 32], sizes = [1, 32], strides = [1, 1]} : vector<1x96xf32> to vector<1x32xf32>
    %849 = vector.extract_strided_slice %839 {offsets = [0, 32], sizes = [1, 32], strides = [1, 1]} : vector<1x96xf32> to vector<1x32xf32>
    %850 = arith.addf %848, %849 : vector<1x32xf32>
    %851 = arith.negf %850 : vector<1x32xf32>
    %852 = math.exp %851 : vector<1x32xf32>
    %cst_215 = arith.constant 1.000000e+00 : f32
    %853 = vector.broadcast %cst_215 : f32 to vector<1x32xf32>
    %854 = arith.addf %853, %852 : vector<1x32xf32>
    %855 = arith.divf %853, %854 : vector<1x32xf32>
    %856 = vector.extract_strided_slice %837 {offsets = [0, 64], sizes = [1, 32], strides = [1, 1]} : vector<1x96xf32> to vector<1x32xf32>
    %857 = vector.extract_strided_slice %839 {offsets = [0, 64], sizes = [1, 32], strides = [1, 1]} : vector<1x96xf32> to vector<1x32xf32>
    %858 = arith.mulf %847, %857 : vector<1x32xf32>
    %859 = arith.addf %856, %858 : vector<1x32xf32>
    %860 = math.tanh %859 : vector<1x32xf32>
    %cst_216 = arith.constant 1.000000e+00 : f32
    %861 = vector.broadcast %cst_216 : f32 to vector<1x32xf32>
    %862 = arith.subf %861, %855 : vector<1x32xf32>
    %863 = arith.mulf %862, %860 : vector<1x32xf32>
    %864 = arith.mulf %855, %835 : vector<1x32xf32>
    %865 = arith.addf %863, %864 : vector<1x32xf32>
    %c0_217 = arith.constant 0 : index
    %c7_218 = arith.constant 7 : index
    %c96 = arith.constant 96 : index
    %866 = vector.load %arg7[%c0_217, %c7_218, %c96] : memref<1x8x128xf32, #tpu.memory_space<vmem>>, vector<1x1x32xf32>
    %867 = vector.shape_cast %866 : vector<1x1x32xf32> to vector<1x32xf32>
    %868 = vector.shape_cast %865 : vector<1x32xf32> to vector<1x1x32xf32>
    tpu.vector_store %arg7[%c0_217, %c7_218, %c96], %868 {strides = array<i32>} : memref<1x8x128xf32, #tpu.memory_space<vmem>>, vector<1x1x32xf32>,
    %869 = vector.extract_strided_slice %559 {offsets = [0, 6, 96], sizes = [1, 1, 96], strides = [1, 1, 1]} : vector<1x8x192xf32> to vector<1x1x96xf32>
    %870 = vector.shape_cast %869 : vector<1x1x96xf32> to vector<1x96xf32>
    %cst_219 = arith.constant dense<0.000000e+00> : vector<1x96xf32>
    %871 = tpu.matmul %865, %831, %cst_219 {dimension_numbers = #tpu.dot_dimension_numbers<[1], [1], [0], [0], [0, 0, 1, 0], [], []>} : vector<1x32xf32>, vector<96x32xf32>, vector<1x96xf32> -> vector<1x96xf32>
    %872 = arith.addf %871, %833 : vector<1x96xf32>
    %873 = vector.extract_strided_slice %870 {offsets = [0, 0], sizes = [1, 32], strides = [1, 1]} : vector<1x96xf32> to vector<1x32xf32>
    %874 = vector.extract_strided_slice %872 {offsets = [0, 0], sizes = [1, 32], strides = [1, 1]} : vector<1x96xf32> to vector<1x32xf32>
    %875 = arith.addf %873, %874 : vector<1x32xf32>
    %876 = arith.negf %875 : vector<1x32xf32>
    %877 = math.exp %876 : vector<1x32xf32>
    %cst_220 = arith.constant 1.000000e+00 : f32
    %878 = vector.broadcast %cst_220 : f32 to vector<1x32xf32>
    %879 = arith.addf %878, %877 : vector<1x32xf32>
    %880 = arith.divf %878, %879 : vector<1x32xf32>
    %881 = vector.extract_strided_slice %870 {offsets = [0, 32], sizes = [1, 32], strides = [1, 1]} : vector<1x96xf32> to vector<1x32xf32>
    %882 = vector.extract_strided_slice %872 {offsets = [0, 32], sizes = [1, 32], strides = [1, 1]} : vector<1x96xf32> to vector<1x32xf32>
    %883 = arith.addf %881, %882 : vector<1x32xf32>
    %884 = arith.negf %883 : vector<1x32xf32>
    %885 = math.exp %884 : vector<1x32xf32>
    %cst_221 = arith.constant 1.000000e+00 : f32
    %886 = vector.broadcast %cst_221 : f32 to vector<1x32xf32>
    %887 = arith.addf %886, %885 : vector<1x32xf32>
    %888 = arith.divf %886, %887 : vector<1x32xf32>
    %889 = vector.extract_strided_slice %870 {offsets = [0, 64], sizes = [1, 32], strides = [1, 1]} : vector<1x96xf32> to vector<1x32xf32>
    %890 = vector.extract_strided_slice %872 {offsets = [0, 64], sizes = [1, 32], strides = [1, 1]} : vector<1x96xf32> to vector<1x32xf32>
    %891 = arith.mulf %880, %890 : vector<1x32xf32>
    %892 = arith.addf %889, %891 : vector<1x32xf32>
    %893 = math.tanh %892 : vector<1x32xf32>
    %cst_222 = arith.constant 1.000000e+00 : f32
    %894 = vector.broadcast %cst_222 : f32 to vector<1x32xf32>
    %895 = arith.subf %894, %888 : vector<1x32xf32>
    %896 = arith.mulf %895, %893 : vector<1x32xf32>
    %897 = arith.mulf %888, %865 : vector<1x32xf32>
    %898 = arith.addf %896, %897 : vector<1x32xf32>
    %c0_223 = arith.constant 0 : index
    %c6_224 = arith.constant 6 : index
    %c96_225 = arith.constant 96 : index
    %899 = vector.load %arg7[%c0_223, %c6_224, %c96_225] : memref<1x8x128xf32, #tpu.memory_space<vmem>>, vector<1x1x32xf32>
    %900 = vector.shape_cast %899 : vector<1x1x32xf32> to vector<1x32xf32>
    %901 = vector.shape_cast %898 : vector<1x32xf32> to vector<1x1x32xf32>
    tpu.vector_store %arg7[%c0_223, %c6_224, %c96_225], %901 {strides = array<i32>} : memref<1x8x128xf32, #tpu.memory_space<vmem>>, vector<1x1x32xf32>,
    %902 = vector.extract_strided_slice %559 {offsets = [0, 5, 96], sizes = [1, 1, 96], strides = [1, 1, 1]} : vector<1x8x192xf32> to vector<1x1x96xf32>
    %903 = vector.shape_cast %902 : vector<1x1x96xf32> to vector<1x96xf32>
    %cst_226 = arith.constant dense<0.000000e+00> : vector<1x96xf32>
    %904 = tpu.matmul %898, %831, %cst_226 {dimension_numbers = #tpu.dot_dimension_numbers<[1], [1], [0], [0], [0, 0, 1, 0], [], []>} : vector<1x32xf32>, vector<96x32xf32>, vector<1x96xf32> -> vector<1x96xf32>
    %905 = arith.addf %904, %833 : vector<1x96xf32>
    %906 = vector.extract_strided_slice %903 {offsets = [0, 0], sizes = [1, 32], strides = [1, 1]} : vector<1x96xf32> to vector<1x32xf32>
    %907 = vector.extract_strided_slice %905 {offsets = [0, 0], sizes = [1, 32], strides = [1, 1]} : vector<1x96xf32> to vector<1x32xf32>
    %908 = arith.addf %906, %907 : vector<1x32xf32>
    %909 = arith.negf %908 : vector<1x32xf32>
    %910 = math.exp %909 : vector<1x32xf32>
    %cst_227 = arith.constant 1.000000e+00 : f32
    %911 = vector.broadcast %cst_227 : f32 to vector<1x32xf32>
    %912 = arith.addf %911, %910 : vector<1x32xf32>
    %913 = arith.divf %911, %912 : vector<1x32xf32>
    %914 = vector.extract_strided_slice %903 {offsets = [0, 32], sizes = [1, 32], strides = [1, 1]} : vector<1x96xf32> to vector<1x32xf32>
    %915 = vector.extract_strided_slice %905 {offsets = [0, 32], sizes = [1, 32], strides = [1, 1]} : vector<1x96xf32> to vector<1x32xf32>
    %916 = arith.addf %914, %915 : vector<1x32xf32>
    %917 = arith.negf %916 : vector<1x32xf32>
    %918 = math.exp %917 : vector<1x32xf32>
    %cst_228 = arith.constant 1.000000e+00 : f32
    %919 = vector.broadcast %cst_228 : f32 to vector<1x32xf32>
    %920 = arith.addf %919, %918 : vector<1x32xf32>
    %921 = arith.divf %919, %920 : vector<1x32xf32>
    %922 = vector.extract_strided_slice %903 {offsets = [0, 64], sizes = [1, 32], strides = [1, 1]} : vector<1x96xf32> to vector<1x32xf32>
    %923 = vector.extract_strided_slice %905 {offsets = [0, 64], sizes = [1, 32], strides = [1, 1]} : vector<1x96xf32> to vector<1x32xf32>
    %924 = arith.mulf %913, %923 : vector<1x32xf32>
    %925 = arith.addf %922, %924 : vector<1x32xf32>
    %926 = math.tanh %925 : vector<1x32xf32>
    %cst_229 = arith.constant 1.000000e+00 : f32
    %927 = vector.broadcast %cst_229 : f32 to vector<1x32xf32>
    %928 = arith.subf %927, %921 : vector<1x32xf32>
    %929 = arith.mulf %928, %926 : vector<1x32xf32>
    %930 = arith.mulf %921, %898 : vector<1x32xf32>
    %931 = arith.addf %929, %930 : vector<1x32xf32>
    %c0_230 = arith.constant 0 : index
    %c5_231 = arith.constant 5 : index
    %c96_232 = arith.constant 96 : index
    %932 = vector.load %arg7[%c0_230, %c5_231, %c96_232] : memref<1x8x128xf32, #tpu.memory_space<vmem>>, vector<1x1x32xf32>
    %933 = vector.shape_cast %932 : vector<1x1x32xf32> to vector<1x32xf32>
    %934 = vector.shape_cast %931 : vector<1x32xf32> to vector<1x1x32xf32>
    tpu.vector_store %arg7[%c0_230, %c5_231, %c96_232], %934 {strides = array<i32>} : memref<1x8x128xf32, #tpu.memory_space<vmem>>, vector<1x1x32xf32>,
    %935 = vector.extract_strided_slice %559 {offsets = [0, 4, 96], sizes = [1, 1, 96], strides = [1, 1, 1]} : vector<1x8x192xf32> to vector<1x1x96xf32>
    %936 = vector.shape_cast %935 : vector<1x1x96xf32> to vector<1x96xf32>
    %cst_233 = arith.constant dense<0.000000e+00> : vector<1x96xf32>
    %937 = tpu.matmul %931, %831, %cst_233 {dimension_numbers = #tpu.dot_dimension_numbers<[1], [1], [0], [0], [0, 0, 1, 0], [], []>} : vector<1x32xf32>, vector<96x32xf32>, vector<1x96xf32> -> vector<1x96xf32>
    %938 = arith.addf %937, %833 : vector<1x96xf32>
    %939 = vector.extract_strided_slice %936 {offsets = [0, 0], sizes = [1, 32], strides = [1, 1]} : vector<1x96xf32> to vector<1x32xf32>
    %940 = vector.extract_strided_slice %938 {offsets = [0, 0], sizes = [1, 32], strides = [1, 1]} : vector<1x96xf32> to vector<1x32xf32>
    %941 = arith.addf %939, %940 : vector<1x32xf32>
    %942 = arith.negf %941 : vector<1x32xf32>
    %943 = math.exp %942 : vector<1x32xf32>
    %cst_234 = arith.constant 1.000000e+00 : f32
    %944 = vector.broadcast %cst_234 : f32 to vector<1x32xf32>
    %945 = arith.addf %944, %943 : vector<1x32xf32>
    %946 = arith.divf %944, %945 : vector<1x32xf32>
    %947 = vector.extract_strided_slice %936 {offsets = [0, 32], sizes = [1, 32], strides = [1, 1]} : vector<1x96xf32> to vector<1x32xf32>
    %948 = vector.extract_strided_slice %938 {offsets = [0, 32], sizes = [1, 32], strides = [1, 1]} : vector<1x96xf32> to vector<1x32xf32>
    %949 = arith.addf %947, %948 : vector<1x32xf32>
    %950 = arith.negf %949 : vector<1x32xf32>
    %951 = math.exp %950 : vector<1x32xf32>
    %cst_235 = arith.constant 1.000000e+00 : f32
    %952 = vector.broadcast %cst_235 : f32 to vector<1x32xf32>
    %953 = arith.addf %952, %951 : vector<1x32xf32>
    %954 = arith.divf %952, %953 : vector<1x32xf32>
    %955 = vector.extract_strided_slice %936 {offsets = [0, 64], sizes = [1, 32], strides = [1, 1]} : vector<1x96xf32> to vector<1x32xf32>
    %956 = vector.extract_strided_slice %938 {offsets = [0, 64], sizes = [1, 32], strides = [1, 1]} : vector<1x96xf32> to vector<1x32xf32>
    %957 = arith.mulf %946, %956 : vector<1x32xf32>
    %958 = arith.addf %955, %957 : vector<1x32xf32>
    %959 = math.tanh %958 : vector<1x32xf32>
    %cst_236 = arith.constant 1.000000e+00 : f32
    %960 = vector.broadcast %cst_236 : f32 to vector<1x32xf32>
    %961 = arith.subf %960, %954 : vector<1x32xf32>
    %962 = arith.mulf %961, %959 : vector<1x32xf32>
    %963 = arith.mulf %954, %931 : vector<1x32xf32>
    %964 = arith.addf %962, %963 : vector<1x32xf32>
    %c0_237 = arith.constant 0 : index
    %c4_238 = arith.constant 4 : index
    %c96_239 = arith.constant 96 : index
    %965 = vector.load %arg7[%c0_237, %c4_238, %c96_239] : memref<1x8x128xf32, #tpu.memory_space<vmem>>, vector<1x1x32xf32>
    %966 = vector.shape_cast %965 : vector<1x1x32xf32> to vector<1x32xf32>
    %967 = vector.shape_cast %964 : vector<1x32xf32> to vector<1x1x32xf32>
    tpu.vector_store %arg7[%c0_237, %c4_238, %c96_239], %967 {strides = array<i32>} : memref<1x8x128xf32, #tpu.memory_space<vmem>>, vector<1x1x32xf32>,
    %968 = vector.extract_strided_slice %559 {offsets = [0, 3, 96], sizes = [1, 1, 96], strides = [1, 1, 1]} : vector<1x8x192xf32> to vector<1x1x96xf32>
    %969 = vector.shape_cast %968 : vector<1x1x96xf32> to vector<1x96xf32>
    %cst_240 = arith.constant dense<0.000000e+00> : vector<1x96xf32>
    %970 = tpu.matmul %964, %831, %cst_240 {dimension_numbers = #tpu.dot_dimension_numbers<[1], [1], [0], [0], [0, 0, 1, 0], [], []>} : vector<1x32xf32>, vector<96x32xf32>, vector<1x96xf32> -> vector<1x96xf32>
    %971 = arith.addf %970, %833 : vector<1x96xf32>
    %972 = vector.extract_strided_slice %969 {offsets = [0, 0], sizes = [1, 32], strides = [1, 1]} : vector<1x96xf32> to vector<1x32xf32>
    %973 = vector.extract_strided_slice %971 {offsets = [0, 0], sizes = [1, 32], strides = [1, 1]} : vector<1x96xf32> to vector<1x32xf32>
    %974 = arith.addf %972, %973 : vector<1x32xf32>
    %975 = arith.negf %974 : vector<1x32xf32>
    %976 = math.exp %975 : vector<1x32xf32>
    %cst_241 = arith.constant 1.000000e+00 : f32
    %977 = vector.broadcast %cst_241 : f32 to vector<1x32xf32>
    %978 = arith.addf %977, %976 : vector<1x32xf32>
    %979 = arith.divf %977, %978 : vector<1x32xf32>
    %980 = vector.extract_strided_slice %969 {offsets = [0, 32], sizes = [1, 32], strides = [1, 1]} : vector<1x96xf32> to vector<1x32xf32>
    %981 = vector.extract_strided_slice %971 {offsets = [0, 32], sizes = [1, 32], strides = [1, 1]} : vector<1x96xf32> to vector<1x32xf32>
    %982 = arith.addf %980, %981 : vector<1x32xf32>
    %983 = arith.negf %982 : vector<1x32xf32>
    %984 = math.exp %983 : vector<1x32xf32>
    %cst_242 = arith.constant 1.000000e+00 : f32
    %985 = vector.broadcast %cst_242 : f32 to vector<1x32xf32>
    %986 = arith.addf %985, %984 : vector<1x32xf32>
    %987 = arith.divf %985, %986 : vector<1x32xf32>
    %988 = vector.extract_strided_slice %969 {offsets = [0, 64], sizes = [1, 32], strides = [1, 1]} : vector<1x96xf32> to vector<1x32xf32>
    %989 = vector.extract_strided_slice %971 {offsets = [0, 64], sizes = [1, 32], strides = [1, 1]} : vector<1x96xf32> to vector<1x32xf32>
    %990 = arith.mulf %979, %989 : vector<1x32xf32>
    %991 = arith.addf %988, %990 : vector<1x32xf32>
    %992 = math.tanh %991 : vector<1x32xf32>
    %cst_243 = arith.constant 1.000000e+00 : f32
    %993 = vector.broadcast %cst_243 : f32 to vector<1x32xf32>
    %994 = arith.subf %993, %987 : vector<1x32xf32>
    %995 = arith.mulf %994, %992 : vector<1x32xf32>
    %996 = arith.mulf %987, %964 : vector<1x32xf32>
    %997 = arith.addf %995, %996 : vector<1x32xf32>
    %c0_244 = arith.constant 0 : index
    %c3_245 = arith.constant 3 : index
    %c96_246 = arith.constant 96 : index
    %998 = vector.load %arg7[%c0_244, %c3_245, %c96_246] : memref<1x8x128xf32, #tpu.memory_space<vmem>>, vector<1x1x32xf32>
    %999 = vector.shape_cast %998 : vector<1x1x32xf32> to vector<1x32xf32>
    %1000 = vector.shape_cast %997 : vector<1x32xf32> to vector<1x1x32xf32>
    tpu.vector_store %arg7[%c0_244, %c3_245, %c96_246], %1000 {strides = array<i32>} : memref<1x8x128xf32, #tpu.memory_space<vmem>>, vector<1x1x32xf32>,
    %1001 = vector.extract_strided_slice %559 {offsets = [0, 2, 96], sizes = [1, 1, 96], strides = [1, 1, 1]} : vector<1x8x192xf32> to vector<1x1x96xf32>
    %1002 = vector.shape_cast %1001 : vector<1x1x96xf32> to vector<1x96xf32>
    %cst_247 = arith.constant dense<0.000000e+00> : vector<1x96xf32>
    %1003 = tpu.matmul %997, %831, %cst_247 {dimension_numbers = #tpu.dot_dimension_numbers<[1], [1], [0], [0], [0, 0, 1, 0], [], []>} : vector<1x32xf32>, vector<96x32xf32>, vector<1x96xf32> -> vector<1x96xf32>
    %1004 = arith.addf %1003, %833 : vector<1x96xf32>
    %1005 = vector.extract_strided_slice %1002 {offsets = [0, 0], sizes = [1, 32], strides = [1, 1]} : vector<1x96xf32> to vector<1x32xf32>
    %1006 = vector.extract_strided_slice %1004 {offsets = [0, 0], sizes = [1, 32], strides = [1, 1]} : vector<1x96xf32> to vector<1x32xf32>
    %1007 = arith.addf %1005, %1006 : vector<1x32xf32>
    %1008 = arith.negf %1007 : vector<1x32xf32>
    %1009 = math.exp %1008 : vector<1x32xf32>
    %cst_248 = arith.constant 1.000000e+00 : f32
    %1010 = vector.broadcast %cst_248 : f32 to vector<1x32xf32>
    %1011 = arith.addf %1010, %1009 : vector<1x32xf32>
    %1012 = arith.divf %1010, %1011 : vector<1x32xf32>
    %1013 = vector.extract_strided_slice %1002 {offsets = [0, 32], sizes = [1, 32], strides = [1, 1]} : vector<1x96xf32> to vector<1x32xf32>
    %1014 = vector.extract_strided_slice %1004 {offsets = [0, 32], sizes = [1, 32], strides = [1, 1]} : vector<1x96xf32> to vector<1x32xf32>
    %1015 = arith.addf %1013, %1014 : vector<1x32xf32>
    %1016 = arith.negf %1015 : vector<1x32xf32>
    %1017 = math.exp %1016 : vector<1x32xf32>
    %cst_249 = arith.constant 1.000000e+00 : f32
    %1018 = vector.broadcast %cst_249 : f32 to vector<1x32xf32>
    %1019 = arith.addf %1018, %1017 : vector<1x32xf32>
    %1020 = arith.divf %1018, %1019 : vector<1x32xf32>
    %1021 = vector.extract_strided_slice %1002 {offsets = [0, 64], sizes = [1, 32], strides = [1, 1]} : vector<1x96xf32> to vector<1x32xf32>
    %1022 = vector.extract_strided_slice %1004 {offsets = [0, 64], sizes = [1, 32], strides = [1, 1]} : vector<1x96xf32> to vector<1x32xf32>
    %1023 = arith.mulf %1012, %1022 : vector<1x32xf32>
    %1024 = arith.addf %1021, %1023 : vector<1x32xf32>
    %1025 = math.tanh %1024 : vector<1x32xf32>
    %cst_250 = arith.constant 1.000000e+00 : f32
    %1026 = vector.broadcast %cst_250 : f32 to vector<1x32xf32>
    %1027 = arith.subf %1026, %1020 : vector<1x32xf32>
    %1028 = arith.mulf %1027, %1025 : vector<1x32xf32>
    %1029 = arith.mulf %1020, %997 : vector<1x32xf32>
    %1030 = arith.addf %1028, %1029 : vector<1x32xf32>
    %c0_251 = arith.constant 0 : index
    %c2_252 = arith.constant 2 : index
    %c96_253 = arith.constant 96 : index
    %1031 = vector.load %arg7[%c0_251, %c2_252, %c96_253] : memref<1x8x128xf32, #tpu.memory_space<vmem>>, vector<1x1x32xf32>
    %1032 = vector.shape_cast %1031 : vector<1x1x32xf32> to vector<1x32xf32>
    %1033 = vector.shape_cast %1030 : vector<1x32xf32> to vector<1x1x32xf32>
    tpu.vector_store %arg7[%c0_251, %c2_252, %c96_253], %1033 {strides = array<i32>} : memref<1x8x128xf32, #tpu.memory_space<vmem>>, vector<1x1x32xf32>,
    %1034 = vector.extract_strided_slice %559 {offsets = [0, 1, 96], sizes = [1, 1, 96], strides = [1, 1, 1]} : vector<1x8x192xf32> to vector<1x1x96xf32>
    %1035 = vector.shape_cast %1034 : vector<1x1x96xf32> to vector<1x96xf32>
    %cst_254 = arith.constant dense<0.000000e+00> : vector<1x96xf32>
    %1036 = tpu.matmul %1030, %831, %cst_254 {dimension_numbers = #tpu.dot_dimension_numbers<[1], [1], [0], [0], [0, 0, 1, 0], [], []>} : vector<1x32xf32>, vector<96x32xf32>, vector<1x96xf32> -> vector<1x96xf32>
    %1037 = arith.addf %1036, %833 : vector<1x96xf32>
    %1038 = vector.extract_strided_slice %1035 {offsets = [0, 0], sizes = [1, 32], strides = [1, 1]} : vector<1x96xf32> to vector<1x32xf32>
    %1039 = vector.extract_strided_slice %1037 {offsets = [0, 0], sizes = [1, 32], strides = [1, 1]} : vector<1x96xf32> to vector<1x32xf32>
    %1040 = arith.addf %1038, %1039 : vector<1x32xf32>
    %1041 = arith.negf %1040 : vector<1x32xf32>
    %1042 = math.exp %1041 : vector<1x32xf32>
    %cst_255 = arith.constant 1.000000e+00 : f32
    %1043 = vector.broadcast %cst_255 : f32 to vector<1x32xf32>
    %1044 = arith.addf %1043, %1042 : vector<1x32xf32>
    %1045 = arith.divf %1043, %1044 : vector<1x32xf32>
    %1046 = vector.extract_strided_slice %1035 {offsets = [0, 32], sizes = [1, 32], strides = [1, 1]} : vector<1x96xf32> to vector<1x32xf32>
    %1047 = vector.extract_strided_slice %1037 {offsets = [0, 32], sizes = [1, 32], strides = [1, 1]} : vector<1x96xf32> to vector<1x32xf32>
    %1048 = arith.addf %1046, %1047 : vector<1x32xf32>
    %1049 = arith.negf %1048 : vector<1x32xf32>
    %1050 = math.exp %1049 : vector<1x32xf32>
    %cst_256 = arith.constant 1.000000e+00 : f32
    %1051 = vector.broadcast %cst_256 : f32 to vector<1x32xf32>
    %1052 = arith.addf %1051, %1050 : vector<1x32xf32>
    %1053 = arith.divf %1051, %1052 : vector<1x32xf32>
    %1054 = vector.extract_strided_slice %1035 {offsets = [0, 64], sizes = [1, 32], strides = [1, 1]} : vector<1x96xf32> to vector<1x32xf32>
    %1055 = vector.extract_strided_slice %1037 {offsets = [0, 64], sizes = [1, 32], strides = [1, 1]} : vector<1x96xf32> to vector<1x32xf32>
    %1056 = arith.mulf %1045, %1055 : vector<1x32xf32>
    %1057 = arith.addf %1054, %1056 : vector<1x32xf32>
    %1058 = math.tanh %1057 : vector<1x32xf32>
    %cst_257 = arith.constant 1.000000e+00 : f32
    %1059 = vector.broadcast %cst_257 : f32 to vector<1x32xf32>
    %1060 = arith.subf %1059, %1053 : vector<1x32xf32>
    %1061 = arith.mulf %1060, %1058 : vector<1x32xf32>
    %1062 = arith.mulf %1053, %1030 : vector<1x32xf32>
    %1063 = arith.addf %1061, %1062 : vector<1x32xf32>
    %c0_258 = arith.constant 0 : index
    %c1_259 = arith.constant 1 : index
    %c96_260 = arith.constant 96 : index
    %1064 = vector.load %arg7[%c0_258, %c1_259, %c96_260] : memref<1x8x128xf32, #tpu.memory_space<vmem>>, vector<1x1x32xf32>
    %1065 = vector.shape_cast %1064 : vector<1x1x32xf32> to vector<1x32xf32>
    %1066 = vector.shape_cast %1063 : vector<1x32xf32> to vector<1x1x32xf32>
    tpu.vector_store %arg7[%c0_258, %c1_259, %c96_260], %1066 {strides = array<i32>} : memref<1x8x128xf32, #tpu.memory_space<vmem>>, vector<1x1x32xf32>,
    %1067 = vector.extract_strided_slice %559 {offsets = [0, 0, 96], sizes = [1, 1, 96], strides = [1, 1, 1]} : vector<1x8x192xf32> to vector<1x1x96xf32>
    %1068 = vector.shape_cast %1067 : vector<1x1x96xf32> to vector<1x96xf32>
    %cst_261 = arith.constant dense<0.000000e+00> : vector<1x96xf32>
    %1069 = tpu.matmul %1063, %831, %cst_261 {dimension_numbers = #tpu.dot_dimension_numbers<[1], [1], [0], [0], [0, 0, 1, 0], [], []>} : vector<1x32xf32>, vector<96x32xf32>, vector<1x96xf32> -> vector<1x96xf32>
    %1070 = arith.addf %1069, %833 : vector<1x96xf32>
    %1071 = vector.extract_strided_slice %1068 {offsets = [0, 0], sizes = [1, 32], strides = [1, 1]} : vector<1x96xf32> to vector<1x32xf32>
    %1072 = vector.extract_strided_slice %1070 {offsets = [0, 0], sizes = [1, 32], strides = [1, 1]} : vector<1x96xf32> to vector<1x32xf32>
    %1073 = arith.addf %1071, %1072 : vector<1x32xf32>
    %1074 = arith.negf %1073 : vector<1x32xf32>
    %1075 = math.exp %1074 : vector<1x32xf32>
    %cst_262 = arith.constant 1.000000e+00 : f32
    %1076 = vector.broadcast %cst_262 : f32 to vector<1x32xf32>
    %1077 = arith.addf %1076, %1075 : vector<1x32xf32>
    %1078 = arith.divf %1076, %1077 : vector<1x32xf32>
    %1079 = vector.extract_strided_slice %1068 {offsets = [0, 32], sizes = [1, 32], strides = [1, 1]} : vector<1x96xf32> to vector<1x32xf32>
    %1080 = vector.extract_strided_slice %1070 {offsets = [0, 32], sizes = [1, 32], strides = [1, 1]} : vector<1x96xf32> to vector<1x32xf32>
    %1081 = arith.addf %1079, %1080 : vector<1x32xf32>
    %1082 = arith.negf %1081 : vector<1x32xf32>
    %1083 = math.exp %1082 : vector<1x32xf32>
    %cst_263 = arith.constant 1.000000e+00 : f32
    %1084 = vector.broadcast %cst_263 : f32 to vector<1x32xf32>
    %1085 = arith.addf %1084, %1083 : vector<1x32xf32>
    %1086 = arith.divf %1084, %1085 : vector<1x32xf32>
    %1087 = vector.extract_strided_slice %1068 {offsets = [0, 64], sizes = [1, 32], strides = [1, 1]} : vector<1x96xf32> to vector<1x32xf32>
    %1088 = vector.extract_strided_slice %1070 {offsets = [0, 64], sizes = [1, 32], strides = [1, 1]} : vector<1x96xf32> to vector<1x32xf32>
    %1089 = arith.mulf %1078, %1088 : vector<1x32xf32>
    %1090 = arith.addf %1087, %1089 : vector<1x32xf32>
    %1091 = math.tanh %1090 : vector<1x32xf32>
    %cst_264 = arith.constant 1.000000e+00 : f32
    %1092 = vector.broadcast %cst_264 : f32 to vector<1x32xf32>
    %1093 = arith.subf %1092, %1086 : vector<1x32xf32>
    %1094 = arith.mulf %1093, %1091 : vector<1x32xf32>
    %1095 = arith.mulf %1086, %1063 : vector<1x32xf32>
    %1096 = arith.addf %1094, %1095 : vector<1x32xf32>
    %c0_265 = arith.constant 0 : index
    %c0_266 = arith.constant 0 : index
    %c96_267 = arith.constant 96 : index
    %1097 = vector.load %arg7[%c0_265, %c0_266, %c96_267] : memref<1x8x128xf32, #tpu.memory_space<vmem>>, vector<1x1x32xf32>
    %1098 = vector.shape_cast %1097 : vector<1x1x32xf32> to vector<1x32xf32>
    %1099 = vector.shape_cast %1096 : vector<1x32xf32> to vector<1x1x32xf32>
    tpu.vector_store %arg7[%c0_265, %c0_266, %c96_267], %1099 {strides = array<i32>} : memref<1x8x128xf32, #tpu.memory_space<vmem>>, vector<1x1x32xf32>,
    return
  }
  func.func @transform_0(%arg0: i32) -> (i32, i32, i32) {
    %c0_i32 = arith.constant 0 : i32
    %c0_i32_0 = arith.constant 0 : i32
    %c0_i32_1 = arith.constant 0 : i32
    return %arg0, %c0_i32, %c0_i32_0 : i32, i32, i32
  }
  func.func @transform_1(%arg0: i32) -> (i32, i32, i32) {
    %c0_i32 = arith.constant 0 : i32
    %c0_i32_0 = arith.constant 0 : i32
    %c0_i32_1 = arith.constant 0 : i32
    %c0_i32_2 = arith.constant 0 : i32
    return %c0_i32, %c0_i32_0, %c0_i32_1 : i32, i32, i32
  }
  func.func @transform_2(%arg0: i32) -> (i32, i32, i32) {
    %c0_i32 = arith.constant 0 : i32
    %c0_i32_0 = arith.constant 0 : i32
    %c0_i32_1 = arith.constant 0 : i32
    %c0_i32_2 = arith.constant 0 : i32
    return %c0_i32, %c0_i32_0, %c0_i32_1 : i32, i32, i32
  }
  func.func @transform_3(%arg0: i32) -> (i32, i32, i32) {
    %c0_i32 = arith.constant 0 : i32
    %c0_i32_0 = arith.constant 0 : i32
    %c0_i32_1 = arith.constant 0 : i32
    %c0_i32_2 = arith.constant 0 : i32
    return %c0_i32, %c0_i32_0, %c0_i32_1 : i32, i32, i32
  }
  func.func @transform_4(%arg0: i32) -> (i32, i32, i32) {
    %c0_i32 = arith.constant 0 : i32
    %c0_i32_0 = arith.constant 0 : i32
    %c0_i32_1 = arith.constant 0 : i32
    %c0_i32_2 = arith.constant 0 : i32
    return %c0_i32, %c0_i32_0, %c0_i32_1 : i32, i32, i32
  }
  func.func @transform_5(%arg0: i32) -> (i32, i32, i32) {
    %c0_i32 = arith.constant 0 : i32
    %c0_i32_0 = arith.constant 0 : i32
    %c0_i32_1 = arith.constant 0 : i32
    %c0_i32_2 = arith.constant 0 : i32
    return %c0_i32, %c0_i32_0, %c0_i32_1 : i32, i32, i32
  }
  func.func @transform_6(%arg0: i32) -> (i32, i32, i32) {
    %c0_i32 = arith.constant 0 : i32
    %c0_i32_0 = arith.constant 0 : i32
    %c0_i32_1 = arith.constant 0 : i32
    return %arg0, %c0_i32, %c0_i32_0 : i32, i32, i32
  }
}

</mosaic_0001>

<bundles_post_ra>
// kernel: tpu_custom_call.1
= control target key start
LH: loop header
LB: loop body
LE: loop exit
PB: predicated region body
PF: predicated region fallthrough
CT: control target
= control target key end

     0   :  { %11 = vsyncpa [#allocation3], 0  ;;  %s9638_s0 = inlined_call_operand.vmem [shape: f32[2,8,64], index: 0, kind: input, shape index: {}]   ;;  %s9639_s1 = inlined_call_operand.vmem [shape: f32[2,192,64], index: 1, kind: input, shape index: {}]   ;;  %s9640_s2 = inlined_call_operand.vmem [shape: f32[4,96,32], index: 2, kind: input, shape index: {}]   ;;  %s9641_s3 = inlined_call_operand.vmem [shape: f32[2,1,192], index: 3, kind: input, shape index: {}]   ;;  %s9642_s4 = inlined_call_operand.vmem [shape: f32[4,1,96], index: 4, kind: input, shape index: {}]   ;;  %s9643_s5 = inlined_call_operand.vmem [shape: f32[4,1,32], index: 5, kind: input, shape index: {}]   ;;  %s9644_s6 = inlined_call_operand.hbm [shape: f32[2,8,128], index: 6, kind: output, shape index: {}]  }
   0x1   :  { %13 = vsyncpa [#allocation3 + $0x1], 0  ;;  %s7708_s21 = smov 0   ;;  %s7710_s22 = smov 0  }
   0x2   :  { %s7712_s23 = smov 0   ;;  %s7714_s24 = smov 0  }
   0x3 LB: > { %s7729_s25 = sadd.s32 4294967295, %s7664_s24   ;;  %s4563_s26 = sadd.s32 4294967294, %s7664_s24   ;;  %s7664_s24 = sphi %s7714_s24, %s9654_s24   ;;  %s7660_s23 = sphi %s7712_s23, %s9653_s23   ;;  %s7656_s22 = sphi %s7710_s22, %s9652_s22   ;;  %s7652_s21 = sphi %s7708_s21, %s9651_s21  }
   0x4   : > { %s7733_s27 = sadd.s32 1, %s7664_s24   ;;  %s157_s28 = sadd.s32 1, %s7660_s23 }
   0x5   : > { %s154_s29 = ssub.s32 %s7664_s24, %s7733_s27  ;;  %p167_p0 = scmp.ne.s32.totalorder %s7660_s23, %s7656_s22 }
   0x6   : > { %p155_p1 = scmp.eq.s32.totalorder %s154_s29, 0  ;;  %p168_p2 = scmp.eq.s32.totalorder %s7729_s25, 1 }
   0x7   : > { %p173_p3 = scmp.ne.s32.totalorder %s7656_s22, %s7652_s21  ;;  %p174_p4 = scmp.eq.s32.totalorder %s4563_s26, 1 }
   0x8   : > { %s7744_s30 = scalar_select %p155_p1, %s7660_s23, %s157_s28  }
   0x9   : > { %p7746_p5 = por %p168_p2, %p167_p0  ;;  %p7750_p6 = por %p174_p4, %p173_p3 }
   0xa   : > { %p4566_p7 = scmp.ge.s32.totalorder %s7664_s24, 1  ;;  %p214_p8 = scmp.lt.s32.totalorder %s7664_s24, 3 }
   0xc   : > { %p215_p9 = pnand %p4566_p7, %p214_p8 }
   0xd   : > { %v248_v0 = vld [vmem:[%s9639_s1] sm:$0xff] (!%p215_p9)  ;;  %v249_v1 = vld [vmem:[%s9639_s1 + $0x8] sm:$0xff] (!%p215_p9)  ;;  %vm284_vm0 = vcmask (!%p215_p9), 523264   ;;  %vm445_vm1 = vcmask (!%p215_p9), 261120   ;;  %v7666_v3 = vmov (!%p215_p9), 0.0|0.0   ;;  %vm7667_vm4 = vmmov (!%p215_p9), 0  }
   0xe   : > { %218 = sbr.rel (%p215_p9) target bundleno = 18611 (0x48b3), region = 44  ;;  %v431_v2 = vld [vmem:[%s9640_s2] sm:$0xff] (!%p215_p9)  ;;  %6434 = vmatprep.subr.bf16.mxu0 (!%p215_p9), %v7666_v3  ;;  %6482 = vmatprep.subr.bf16.mxu1 (!%p215_p9), %v7666_v3  ;;  %v6435_v4 = vpack.c.bf16 (!%p215_p9), %v249_v1, %v248_v0  ;;  %vm7769_vm2 = vmpackc.low (!%p215_p9), %vm284_vm0, %vm284_vm0  ;;  %v432_v6 = vld [vmem:[%s9640_s2 + $0x8] sm:$0xff] (!%p215_p9)  ;;  %v7668_v9 = vmov (!%p215_p9), 0.0   ;;  %p243_p10 = scmp.lt.s32.totalorder (!%p215_p9), %s7729_s25, 1  ;;  %v274_v60 = vlaneseq (!%p215_p9)  ;;  %vm592_vm5 = vcmask (!%p215_p9), 253952  }
   0xf   : > { %v7776_v7 = vpack.c.bf16 (!%p215_p9), %v432_v6, %v431_v2  ;;  %vm7780_vm3 = vmpackc.low (!%p215_p9), %vm445_vm1, %vm445_vm1  ;;  %5594 = vmatprep.mubr.msk.f32.mxu1 (!%p215_p9), %vm7667_vm4, %v7668_v9  ;;  %424 = vmatprep.mubr.f32.mxu0 (!%p215_p9), %v7668_v9  ;;  %v250_v10 = vld [vmem:[%s9639_s1 + $0x10] sm:$0xff] (!%p215_p9)  ;;  %v251_v11 = vld [vmem:[%s9639_s1 + $0x18] sm:$0xff] (!%p215_p9)  ;;  %s7669_s19 = smov (!%p215_p9), 64   ;;  %s7670_s20 = smov (!%p215_p9), 96   ;;  %vm700_vm6 = vcmask (!%p215_p9), 254977   ;;  %vm922_vm7 = vcmask (!%p215_p9), 257027  }
  0x10   : > { %6437 = vmatpush1.bf16.xpose.msk.msra.mxu0 (!%p215_p9), %vm7769_vm2, %v6435_v4  ;;  %v433_v12 = vld [vmem:[%s9640_s2 + $0x10] sm:$0xff] (!%p215_p9)  ;;  %v434_v13 = vld [vmem:[%s9640_s2 + $0x18] sm:$0xff] (!%p215_p9)  ;;  %v6439_v14 = vpack.c.bf16 (!%p215_p9), %v251_v11, %v250_v10  ;;  %v252_v16 = vld [vmem:[%s9639_s1 + $0x20] sm:$0xff] (!%p215_p9)  ;;  %v275_v61 = vshrl.u32 (!%p215_p9), %v274_v60, 7  ;;  %s7671_s26 = smov (!%p215_p9), 32   ;;  %s240_s28 = sand.u32 (!%p215_p9), 1, %s7656_s22  }
  0x11   : > { %6485 = vmatpush3.bf16.xpose.msk.msra.mxu1 (!%p215_p9), %vm7780_vm3, %v7776_v7  ;;  %6438 = vmatprep.subr.bf16.mxu0 (!%p215_p9), %v7666_v3  ;;  %v7806_v15 = vpack.c.bf16 (!%p215_p9), %v434_v13, %v433_v12  ;;  %v253_v17 = vld [vmem:[%s9639_s1 + $0x28] sm:$0xff] (!%p215_p9)  ;;  %v435_v18 = vld [vmem:[%s9640_s2 + $0x20] sm:$0xff] (!%p215_p9)  ;;  %v254_v22 = vld [vmem:[%s9639_s1 + $0x30] sm:$0xff] (!%p215_p9)  ;;  %vm1144_vm8 = vcmask (!%p215_p9), 259077   ;;  %vm1366_vm9 = vcmask (!%p215_p9), 261127   ;;  %vm811_vm10 = vcmask (!%p215_p9), 256002  }
  0x12   : > { %6486 = vmatprep.subr.bf16.mxu1 (!%p215_p9), %v7666_v3  ;;  %v436_v19 = vld [vmem:[%s9640_s2 + $0x28] sm:$0xff] (!%p215_p9)  ;;  %v6443_v20 = vpack.c.bf16 (!%p215_p9), %v253_v17, %v252_v16  ;;  %v255_v23 = vld [vmem:[%s9639_s1 + $0x38] sm:$0xff] (!%p215_p9)  ;;  %v437_v24 = vld [vmem:[%s9640_s2 + $0x30] sm:$0xff] (!%p215_p9)  ;;  %v280_v62 = vsub.s32 (!%p215_p9), 1, %v275_v61  ;;  %v8035_v16 = vsub.s32 (!%p215_p9), 0, %v275_v61  ;;  %vm2130_vm11 = vcmask (!%p215_p9), 518402  }
  0x13   : > { %v7827_v21 = vpack.c.bf16 (!%p215_p9), %v436_v19, %v435_v18  ;;  %v438_v25 = vld [vmem:[%s9640_s2 + $0x38] sm:$0xff] (!%p215_p9)  ;;  %v6447_v26 = vpack.c.bf16 (!%p215_p9), %v255_v23, %v254_v22  ;;  %v256_v28 = vld [vmem:[%s9639_s1 + $0x40] sm:$0xff] (!%p215_p9)  ;;  %v257_v29 = vld [vmem:[%s9639_s1 + $0x48] sm:$0xff] (!%p215_p9)  ;;  %vm1033_vm12 = vcmask (!%p215_p9), 258052   ;;  %vm1894_vm13 = vcmask (!%p215_p9), 520452   ;;  %s4491_s10 = scalar_lea.sflag (!%p215_p9), [#allocation3], %s240_s28 }
  0x14   : > { %v7848_v27 = vpack.c.bf16 (!%p215_p9), %v438_v25, %v437_v24  ;;  %v439_v30 = vld [vmem:[%s9640_s2 + $0x40] sm:$0xff] (!%p215_p9)  ;;  %v440_v31 = vld [vmem:[%s9640_s2 + $0x48] sm:$0xff] (!%p215_p9)  ;;  %v6451_v32 = vpack.c.bf16 (!%p215_p9), %v257_v29, %v256_v28  ;;  %v258_v34 = vld [vmem:[%s9639_s1 + $0x50] sm:$0xff] (!%p215_p9)  ;;  %vm1255_vm14 = vcmask (!%p215_p9), 260102   ;;  %vm1658_vm15 = vcmask (!%p215_p9), 522502  }
  0x15   : > { %v7869_v33 = vpack.c.bf16 %v440_v31, %v439_v30  ;;  %v259_v35 = vld [vmem:[%s9639_s1 + $0x58] sm:$0xff]  ;;  %v441_v36 = vld [vmem:[%s9640_s2 + $0x50] sm:$0xff]  ;;  %v260_v40 = vld [vmem:[%s9639_s1 + $0x60] sm:$0xff]  ;;  %s244_s29 = scalar_select %p243_p10, %s7729_s25, 1 }
  0x16   : > { %v442_v37 = vld [vmem:[%s9640_s2 + $0x58] sm:$0xff]  ;;  %v6455_v38 = vpack.c.bf16 %v259_v35, %v258_v34  ;;  %v261_v41 = vld [vmem:[%s9639_s1 + $0x68] sm:$0xff]  ;;  %v7908_v43 = vld [vmem:[%s9643_s5] sm:$0x1] }
  0x17   : > { %v7890_v39 = vpack.c.bf16 %v442_v37, %v441_v36  ;;  %v6459_v42 = vpack.c.bf16 %v261_v41, %v260_v40  ;;  %v262_v44 = vld [vmem:[%s9639_s1 + $0x70] sm:$0xff]  ;;  %v263_v45 = vld [vmem:[%s9639_s1 + $0x78] sm:$0xff]  ;;  %v264_v47 = vld [vmem:[%s9639_s1 + $0x80] sm:$0xff]  ;;  %s4568_s9 = sshll.u32 %s244_s29, 3  ;;  %v582_v31 = vrot.slane %v7908_v43, %v8035_v16  ;;  %s4567_s29 = sshll.u32 %s240_s28, 3 }
  0x18   : > { %6441 = vmatpush1.bf16.xpose.msk.msra.mxu0 %vm7769_vm2, %v6439_v14  ;;  %v6463_v46 = vpack.c.bf16 %v263_v45, %v262_v44  ;;  %v265_v48 = vld [vmem:[%s9639_s1 + $0x88] sm:$0xff]  ;;  %v266_v50 = vld [vmem:[%s9639_s1 + $0x90] sm:$0xff]  ;;  %v267_v51 = vld [vmem:[%s9639_s1 + $0x98] sm:$0xff]  ;;  %s246_s12 = scalar_lea.vmem %s9638_s0, %s4568_s9  ;;  %s8051_s9 = scalar_lea.vmem [#allocation2], %s4567_s29 }
  0x19   : > { %6489 = vmatpush3.bf16.xpose.msk.msra.mxu1 %vm7780_vm3, %v7806_v15  ;;  %6442 = vmatprep.subr.bf16.mxu0 %v7666_v3  ;;  %v6467_v49 = vpack.c.bf16 %v265_v48, %v264_v47  ;;  %v6471_v52 = vpack.c.bf16 %v267_v51, %v266_v50  ;;  %v268_v53 = vld [vmem:[%s9639_s1 + $0xa0] sm:$0xff]  ;;  %v269_v54 = vld [vmem:[%s9639_s1 + $0xa8] sm:$0xff]  ;;  %v270_v56 = vld [vmem:[%s9639_s1 + $0xb0] sm:$0xff] }
  0x1a   : > { %6490 = vmatprep.subr.bf16.mxu1 %v7666_v3  ;;  %v6475_v55 = vpack.c.bf16 %v269_v54, %v268_v53  ;;  %v271_v57 = vld [vmem:[%s9639_s1 + $0xb8] sm:$0xff]  ;;  %v247_v59 = vld [vmem:[%s246_s12] sm:$0xff] }
  0x1b   : > { %v6479_v58 = vpack.c.bf16 %v271_v57, %v270_v56  ;;  %v272_v63 = vld [vmem:[%s9641_s3] sm:$0x3]  ;;  %v4864_v0 = vld [vmem:[%s9641_s3 + $0x2] sm:$0x3] }
  0x1c   : > { %v281_v1 = vrot.slane %v272_v63, %v280_v62  ;;  %v8024_v2 = vrot.slane %v4864_v0, %v280_v62  ;;  %v8029_v4 = vld [vmem:[%s9642_s4] sm:$0x1]  ;;  %v277_v17 = vrot.slane %v272_v63, %v8035_v16 }
  0x20   : > { %6445 = vmatpush1.bf16.xpose.msk.msra.mxu0 %vm7769_vm2, %v6443_v20 }
  0x21   : > { %6493 = vmatpush3.bf16.xpose.msk.msra.mxu1 %vm7780_vm3, %v7827_v21  ;;  %6446 = vmatprep.subr.bf16.mxu0 %v7666_v3 }
  0x22   : > { %6494 = vmatprep.subr.bf16.mxu1 %v7666_v3 }
  0x28   : > { %6449 = vmatpush1.bf16.xpose.msk.msra.mxu0 %vm7769_vm2, %v6447_v26 }
  0x29   : > { %6497 = vmatpush3.bf16.xpose.msk.msra.mxu1 %vm7780_vm3, %v7848_v27  ;;  %6450 = vmatprep.subr.bf16.mxu0 %v7666_v3 }
  0x2a   : > { %6498 = vmatprep.subr.bf16.mxu1 %v7666_v3 }
  0x30   : > { %6453 = vmatpush1.bf16.xpose.msk.msra.mxu0 %vm7769_vm2, %v6451_v32 }
  0x31   : > { %6501 = vmatpush3.bf16.xpose.msk.msra.mxu1 %vm7780_vm3, %v7869_v33  ;;  %6454 = vmatprep.subr.bf16.mxu0 %v7666_v3 }
  0x32   : > { %6502 = vmatprep.subr.bf16.mxu1 %v7666_v3 }
  0x38   : > { %6457 = vmatpush1.bf16.xpose.msk.msra.mxu0 %vm7769_vm2, %v6455_v38 }
  0x39   : > { %6505 = vmatpush3.bf16.xpose.msk.msra.mxu1 %vm7780_vm3, %v7890_v39  ;;  %6458 = vmatprep.subr.bf16.mxu0 %v7666_v3 }
  0x3a   : > { %6506 = vmatprep.subr.bf16.mxu1 %v7666_v3 }
  0x40   : > { %5595 = vmatmul.mubr.msk.f32.vlgmr.msra.gmra.mrb[0].mxu1 %vm445_vm1, %v7908_v43  ;;  %6461 = vmatpush1.bf16.xpose.msk.msra.mxu0 %vm7769_vm2, %v6459_v42 }
  0x41   : > { %6462 = vmatprep.subr.bf16.mxu0 %v7666_v3  ;;  %6509 = vmatpush3.bf16.xpose.msk.msra.mxu1 %vm7780_vm3, %v7776_v7 }
  0x42   : > { %6510 = vmatprep.subr.bf16.mxu1 %v7666_v3  ;;  %5621 = vmatprep.mubr.msk.f32.mxu1 %vm7667_vm4, %v7668_v9 }
  0x48   : > { %6465 = vmatpush1.bf16.xpose.msk.msra.mxu0 %vm7769_vm2, %v6463_v46 }
  0x49   : > { %6466 = vmatprep.subr.bf16.mxu0 %v7666_v3  ;;  %6513 = vmatpush3.bf16.xpose.msk.msra.mxu1 %vm7780_vm3, %v7806_v15 }
  0x4a   : > { %6514 = vmatprep.subr.bf16.mxu1 %v7666_v3 }
  0x50   : > { %6469 = vmatpush1.bf16.xpose.msk.msra.mxu0 %vm7769_vm2, %v6467_v49 }
  0x51   : > { %6470 = vmatprep.subr.bf16.mxu0 %v7666_v3  ;;  %6517 = vmatpush3.bf16.xpose.msk.msra.mxu1 %vm7780_vm3, %v7827_v21 }
  0x52   : > { %6518 = vmatprep.subr.bf16.mxu1 %v7666_v3 }
  0x58   : > { %6473 = vmatpush1.bf16.xpose.msk.msra.mxu0 %vm7769_vm2, %v6471_v52 }
  0x59   : > { %6474 = vmatprep.subr.bf16.mxu0 %v7666_v3  ;;  %6521 = vmatpush3.bf16.xpose.msk.msra.mxu1 %vm7780_vm3, %v7848_v27 }
  0x5a   : > { %6522 = vmatprep.subr.bf16.mxu1 %v7666_v3 }
  0x60   : > { %6477 = vmatpush1.bf16.xpose.msk.msra.mxu0 %vm7769_vm2, %v6475_v55 }
  0x61   : > { %6478 = vmatprep.subr.bf16.mxu0 %v7666_v3  ;;  %6525 = vmatpush3.bf16.xpose.msk.msra.mxu1 %vm7780_vm3, %v7869_v33 }
  0x62   : > { %6526 = vmatprep.subr.bf16.mxu1 %v7666_v3 }
  0x68   : > { %6481 = vmatpush1.bf16.xpose.msk.msra.mxu0 %vm7769_vm2, %v6479_v58 }
  0x69   : > { %6529 = vmatpush3.bf16.xpose.msk.msra.mxu1 %vm7780_vm3, %v7890_v39  ;;  %6530 = vmatprep.subr.bf16.mxu0 %v7666_v3 }
  0x6a   : > { %6554 = vmatprep.subr.bf16.mxu1 %v7666_v3 }
  0x6f   : > { %4593 = vmatmul.mubr.msk.f32.vlgmr.msra.gmra.mrb[0].mxu0 %vm284_vm0, %v247_v59 }
  0x70   : > { %6533 = vmatpush3.bf16.xpose.msk.msra.mxu0 %vm7780_vm3, %v7776_v7  ;;  %5648 = vmatprep.mubr.msk.f32.mxu0 %vm7667_vm4, %v7668_v9 }
  0x71   : > { %6534 = vmatprep.subr.bf16.mxu0 %v7666_v3 }
  0x78   : > { %6537 = vmatpush3.bf16.xpose.msk.msra.mxu0 %vm7780_vm3, %v7806_v15 }
  0x79   : > { %6538 = vmatprep.subr.bf16.mxu0 %v7666_v3 }
  0x80   : > { %6541 = vmatpush3.bf16.xpose.msk.msra.mxu0 %vm7780_vm3, %v7827_v21 }
  0x81   : > { %6542 = vmatprep.subr.bf16.mxu0 %v7666_v3 }
  0x88   : > { %6545 = vmatpush3.bf16.xpose.msk.msra.mxu0 %vm7780_vm3, %v7848_v27 }
  0x89   : > { %6546 = vmatprep.subr.bf16.mxu0 %v7666_v3 }
  0x90   : > { %6549 = vmatpush3.bf16.xpose.msk.msra.mxu0 %vm7780_vm3, %v7869_v33 }
  0x91   : > { %6550 = vmatprep.subr.bf16.mxu0 %v7666_v3 }
  0x98   : > { %6553 = vmatpush3.bf16.xpose.msk.msra.mxu0 %vm7780_vm3, %v7890_v39 }
  0x99   : > { %6578 = vmatprep.subr.bf16.mxu0 %v7666_v3 }
 0x113   : > { %v551_v6 = vpop.f32.mrb[0].mxu1 }
 0x114   : > { %v552_v10 = vadd.f32 %v551_v6, %v8029_v4  ;;  %v5596_v11 = vpop.f32.mrb[1].mxu1 }
 0x116   : > { %563 = vrot.lane.b32.xlu0 %v552_v10, %s7669_s19 }
 0x142   : > { %v426_v12 = vpop.f32.mrb[0].mxu0 }
 0x143   : > { %v428_v13 = vpop.f32.mrb[1].mxu0  ;;  %v8038_v18 = vadd.f32 %v426_v12, %v277_v17 }
 0x144   : > { %v8033_v14 = vadd.f32 %v428_v13, %v281_v1 }
 0x145   : > { %v555_v19 = vadd.f32 %v552_v10, %v8038_v18 }
 0x147   : > { %v4607_v20 = vmul.f32 -1.442695, %v555_v19 }
 0x149   : > { %7343 = vpow2.f32 %v4607_v20 }
 0x153   : > { %v7344_v22 = vpop.eup %7343 }
 0x154   : > { %v559_v23 = vadd.f32 1.0, %v7344_v22 }
 0x156   : > { %7345 = vrcp.f32 %v559_v23 }
 0x160   : > { %v7346_v24 = vpop.eup %7345 }
 0x161   : > { %v573_v34 = vsub.f32 1.0, %v7346_v24 }
 0x188   : > { %v564_v25 = vpop.permute.xlu0 %563 }
 0x189   : > { %v566_v26 = vmul.f32 %v7346_v24, %v564_v25 }
 0x18b   : > { %568 = vrot.lane.b32.xlu0 %v566_v26, %s7669_s19 }
 0x1fd   : > { %v569_v28 = vpop.permute.xlu0 %568 }
 0x1fe   : > { %v571_v29 = vadd.f32 %v569_v28, %v8038_v18 }
 0x200   : > { %7347 = vtanh.f32 %v571_v29 }
 0x20a   : > { %v7348_v30 = vpop.eup %7347 }
 0x20b   : > { %575 = vrot.lane.b32.xlu1 %v7348_v30, %s7670_s20 }
 0x20f   : > { %583 = vrot.lane.b32.xlu1 %v582_v31, %s7671_s26 }
 0x27d   : > { %v576_v32 = vpop.permute.xlu1 %575 }
 0x27e   : > { %v578_v36 = vmul.f32 %v576_v32, %v573_v34 }
 0x281   : > { %v584_v35 = vpop.permute.xlu1 %583 }
 0x282   : > { %v586_v37 = vmul.f32 %v7346_v24, %v584_v35 }
 0x284   : > { %v587_v38 = vadd.f32 %v586_v37, %v578_v36 }
 0x286   : > { %589 = vrot.lane.b32.xlu0 %v587_v38, %s7670_s20  ;;  %v692_v55 = vrot.slane %v587_v38, 7 }
 0x2f8   : > { %v590_v40 = vpop.permute.xlu0 %589 }
 0x2f9   : > { %593 = vst.msk [vmem:[%s8051_s9] sm:$0x1] %vm592_vm5, %v590_v40  ;;  %5622 = vmatmul.mubr.msk.f32.vlgmr.msra.gmra.mrb[2].mxu1 %vm445_vm1, %v590_v40  ;;  %vm1776_vm5 = vcmask 521477  }
 0x2fa   : > { %6557 = vmatpush3.bf16.xpose.msk.msra.mxu1 %vm7780_vm3, %v7776_v7  ;;  %5675 = vmatprep.mubr.msk.f32.mxu1 %vm7667_vm4, %v7668_v9 }
 0x2fb   : > { %6558 = vmatprep.subr.bf16.mxu1 %v7666_v3 }
 0x302   : > { %6561 = vmatpush3.bf16.xpose.msk.msra.mxu1 %vm7780_vm3, %v7806_v15 }
 0x303   : > { %6562 = vmatprep.subr.bf16.mxu1 %v7666_v3 }
 0x30a   : > { %6565 = vmatpush3.bf16.xpose.msk.msra.mxu1 %vm7780_vm3, %v7827_v21 }
 0x30b   : > { %6566 = vmatprep.subr.bf16.mxu1 %v7666_v3 }
 0x312   : > { %6569 = vmatpush3.bf16.xpose.msk.msra.mxu1 %vm7780_vm3, %v7848_v27 }
 0x313   : > { %6570 = vmatprep.subr.bf16.mxu1 %v7666_v3 }
 0x31a   : > { %6573 = vmatpush3.bf16.xpose.msk.msra.mxu1 %vm7780_vm3, %v7869_v33 }
 0x31b   : > { %6574 = vmatprep.subr.bf16.mxu1 %v7666_v3 }
 0x322   : > { %6577 = vmatpush3.bf16.xpose.msk.msra.mxu1 %vm7780_vm3, %v7890_v39 }
 0x323   : > { %6602 = vmatprep.subr.bf16.mxu1 %v7666_v3 }
 0x3cc   : > { %v662_v41 = vpop.f32.mrb[2].mxu1 }
 0x3cd   : > { %v663_v42 = vadd.f32 %v662_v41, %v8029_v4  ;;  %v5623_v43 = vpop.f32.mrb[3].mxu1 }
 0x3cf   : > { %v667_v44 = vrot.slane %v663_v42, 7 }
 0x3d1   : > { %676 = vrot.lane.b32.xlu1 %v667_v44, %s7669_s19  ;;  %v669_v45 = vadd.f32 %v667_v44, %v8038_v18 }
 0x3d3   : > { %v4621_v46 = vmul.f32 -1.442695, %v669_v45 }
 0x3d5   : > { %7349 = vpow2.f32 %v4621_v46 }
 0x3df   : > { %v7350_v47 = vpop.eup %7349 }
 0x3e0   : > { %v673_v48 = vadd.f32 1.0, %v7350_v47 }
 0x3e2   : > { %7351 = vrcp.f32 %v673_v48 }
 0x3ec   : > { %v7352_v49 = vpop.eup %7351 }
 0x3ed   : > { %v686_v56 = vsub.f32 1.0, %v7352_v49  ;;  %v694_v59 = vmul.f32 %v7352_v49, %v692_v55 }
 0x443   : > { %v677_v50 = vpop.permute.xlu1 %676 }
 0x444   : > { %v679_v51 = vmul.f32 %v7352_v49, %v677_v50 }
 0x446   : > { %681 = vrot.lane.b32.xlu0 %v679_v51, %s7669_s19 }
 0x4b8   : > { %v682_v52 = vpop.permute.xlu0 %681 }
 0x4b9   : > { %v684_v53 = vadd.f32 %v682_v52, %v8038_v18 }
 0x4bb   : > { %7353 = vtanh.f32 %v684_v53 }
 0x4c5   : > { %v7354_v54 = vpop.eup %7353 }
 0x4c6   : > { %688 = vrot.lane.b32.xlu1 %v7354_v54, %s7670_s20 }
 0x538   : > { %v689_v57 = vpop.permute.xlu1 %688 }
 0x539   : > { %v691_v58 = vmul.f32 %v689_v57, %v686_v56 }
 0x53b   : > { %v8087_v60 = vadd.f32 %v694_v59, %v691_v58 }
 0x53d   : > { %v702_v61 = vrot.slane %v8087_v60, 1  ;;  %v803_v26 = vrot.slane %v8087_v60, 7 }
 0x53f   : > { %703 = vrot.lane.b32.xlu0 %v702_v61, %s7670_s20 }
 0x5b1   : > { %v704_v62 = vpop.permute.xlu0 %703 }
 0x5b2   : > { %5649 = vmatmul.mubr.msk.f32.vlgmr.msra.gmra.mrb[2].mxu0 %vm445_vm1, %v704_v62 }
 0x5b3   : > { %6581 = vmatpush3.bf16.xpose.msk.msra.mxu0 %vm7780_vm3, %v7776_v7  ;;  %5702 = vmatprep.mubr.msk.f32.mxu0 %vm7667_vm4, %v7668_v9 }
 0x5b4   : > { %6582 = vmatprep.subr.bf16.mxu0 %v7666_v3 }
 0x5bb   : > { %6585 = vmatpush3.bf16.xpose.msk.msra.mxu0 %vm7780_vm3, %v7806_v15 }
 0x5bc   : > { %6586 = vmatprep.subr.bf16.mxu0 %v7666_v3 }
 0x5c3   : > { %6589 = vmatpush3.bf16.xpose.msk.msra.mxu0 %vm7780_vm3, %v7827_v21 }
 0x5c4   : > { %6590 = vmatprep.subr.bf16.mxu0 %v7666_v3 }
 0x5cb   : > { %6593 = vmatpush3.bf16.xpose.msk.msra.mxu0 %vm7780_vm3, %v7848_v27 }
 0x5cc   : > { %6594 = vmatprep.subr.bf16.mxu0 %v7666_v3 }
 0x5d3   : > { %6597 = vmatpush3.bf16.xpose.msk.msra.mxu0 %vm7780_vm3, %v7869_v33 }
 0x5d4   : > { %6598 = vmatprep.subr.bf16.mxu0 %v7666_v3 }
 0x5db   : > { %6601 = vmatpush3.bf16.xpose.msk.msra.mxu0 %vm7780_vm3, %v7890_v39 }
 0x5dc   : > { %6626 = vmatprep.subr.bf16.mxu0 %v7666_v3 }
 0x685   : > { %v773_v63 = vpop.f32.mrb[2].mxu0 }
 0x686   : > { %v774_v0 = vadd.f32 %v773_v63, %v8029_v4  ;;  %v5650_v1 = vpop.f32.mrb[3].mxu0 }
 0x688   : > { %v778_v6 = vrot.slane %v774_v0, 6 }
 0x68a   : > { %787 = vrot.lane.b32.xlu1 %v778_v6, %s7669_s19  ;;  %v780_v10 = vadd.f32 %v778_v6, %v8038_v18 }
 0x68c   : > { %v4635_v11 = vmul.f32 -1.442695, %v780_v10 }
 0x68e   : > { %7355 = vpow2.f32 %v4635_v11 }
 0x698   : > { %v7356_v12 = vpop.eup %7355 }
 0x699   : > { %v784_v13 = vadd.f32 1.0, %v7356_v12 }
 0x69b   : > { %7357 = vrcp.f32 %v784_v13 }
 0x6a5   : > { %v7358_v17 = vpop.eup %7357 }
 0x6a6   : > { %v797_v25 = vsub.f32 1.0, %v7358_v17  ;;  %v805_v29 = vmul.f32 %v7358_v17, %v803_v26 }
 0x6fc   : > { %v788_v19 = vpop.permute.xlu1 %787 }
 0x6fd   : > { %v790_v20 = vmul.f32 %v7358_v17, %v788_v19 }
 0x6ff   : > { %792 = vrot.lane.b32.xlu0 %v790_v20, %s7669_s19 }
 0x771   : > { %v793_v22 = vpop.permute.xlu0 %792 }
 0x772   : > { %v795_v23 = vadd.f32 %v793_v22, %v8038_v18 }
 0x774   : > { %7359 = vtanh.f32 %v795_v23 }
 0x77e   : > { %v7360_v24 = vpop.eup %7359 }
 0x77f   : > { %799 = vrot.lane.b32.xlu1 %v7360_v24, %s7670_s20 }
 0x7f1   : > { %v800_v28 = vpop.permute.xlu1 %799 }
 0x7f2   : > { %v802_v30 = vmul.f32 %v800_v28, %v797_v25 }
 0x7f4   : > { %v8125_v31 = vadd.f32 %v805_v29, %v802_v30 }
 0x7f6   : > { %v813_v32 = vrot.slane %v8125_v31, 2  ;;  %v914_v51 = vrot.slane %v8125_v31, 7 }
 0x7f8   : > { %814 = vrot.lane.b32.xlu0 %v813_v32, %s7670_s20 }
 0x86a   : > { %v815_v34 = vpop.permute.xlu0 %814 }
 0x86b   : > { %5676 = vmatmul.mubr.msk.f32.vlgmr.msra.gmra.mrb[4].mxu1 %vm445_vm1, %v815_v34 }
 0x86c   : > { %6605 = vmatpush3.bf16.xpose.msk.msra.mxu1 %vm7780_vm3, %v7776_v7  ;;  %5729 = vmatprep.mubr.msk.f32.mxu1 %vm7667_vm4, %v7668_v9 }
 0x86d   : > { %6606 = vmatprep.subr.bf16.mxu1 %v7666_v3 }
 0x874   : > { %6609 = vmatpush3.bf16.xpose.msk.msra.mxu1 %vm7780_vm3, %v7806_v15 }
 0x875   : > { %6610 = vmatprep.subr.bf16.mxu1 %v7666_v3 }
 0x87c   : > { %6613 = vmatpush3.bf16.xpose.msk.msra.mxu1 %vm7780_vm3, %v7827_v21 }
 0x87d   : > { %6614 = vmatprep.subr.bf16.mxu1 %v7666_v3 }
 0x884   : > { %6617 = vmatpush3.bf16.xpose.msk.msra.mxu1 %vm7780_vm3, %v7848_v27 }
 0x885   : > { %6618 = vmatprep.subr.bf16.mxu1 %v7666_v3 }
 0x88c   : > { %6621 = vmatpush3.bf16.xpose.msk.msra.mxu1 %vm7780_vm3, %v7869_v33 }
 0x88d   : > { %6622 = vmatprep.subr.bf16.mxu1 %v7666_v3 }
 0x894   : > { %6625 = vmatpush3.bf16.xpose.msk.msra.mxu1 %vm7780_vm3, %v7890_v39 }
 0x895   : > { %6650 = vmatprep.subr.bf16.mxu1 %v7666_v3 }
 0x93e   : > { %v884_v35 = vpop.f32.mrb[4].mxu1 }
 0x93f   : > { %v885_v36 = vadd.f32 %v884_v35, %v8029_v4  ;;  %v5677_v37 = vpop.f32.mrb[5].mxu1 }
 0x941   : > { %v889_v38 = vrot.slane %v885_v36, 5 }
 0x943   : > { %898 = vrot.lane.b32.xlu1 %v889_v38, %s7669_s19  ;;  %v891_v40 = vadd.f32 %v889_v38, %v8038_v18 }
 0x945   : > { %v4649_v41 = vmul.f32 -1.442695, %v891_v40 }
 0x947   : > { %7361 = vpow2.f32 %v4649_v41 }
 0x951   : > { %v7362_v42 = vpop.eup %7361 }
 0x952   : > { %v895_v43 = vadd.f32 1.0, %v7362_v42 }
 0x954   : > { %7363 = vrcp.f32 %v895_v43 }
 0x95e   : > { %v7364_v44 = vpop.eup %7363 }
 0x95f   : > { %v908_v50 = vsub.f32 1.0, %v7364_v44  ;;  %v916_v53 = vmul.f32 %v7364_v44, %v914_v51 }
 0x9b5   : > { %v899_v45 = vpop.permute.xlu1 %898 }
 0x9b6   : > { %v901_v46 = vmul.f32 %v7364_v44, %v899_v45 }
 0x9b8   : > { %903 = vrot.lane.b32.xlu0 %v901_v46, %s7669_s19 }
 0xa2a   : > { %v904_v47 = vpop.permute.xlu0 %903 }
 0xa2b   : > { %v906_v48 = vadd.f32 %v904_v47, %v8038_v18 }
 0xa2d   : > { %7365 = vtanh.f32 %v906_v48  ;;  %v4706_v48 = vld [vmem:[%s9640_s2 + $0x60] sm:$0xff] }
 0xa37   : > { %v7366_v49 = vpop.eup %7365 }
 0xa38   : > { %910 = vrot.lane.b32.xlu1 %v7366_v49, %s7670_s20  ;;  %v4707_v49 = vld [vmem:[%s9640_s2 + $0x68] sm:$0xff] }
 0xaaa   : > { %v911_v52 = vpop.permute.xlu1 %910 }
 0xaab   : > { %v913_v54 = vmul.f32 %v911_v52, %v908_v50  ;;  %v8249_v50 = vpack.c.bf16 %v4707_v49, %v4706_v48  ;;  %v4708_v52 = vld [vmem:[%s9640_s2 + $0x70] sm:$0xff] }
 0xaad   : > { %v8163_v55 = vadd.f32 %v916_v53, %v913_v54  ;;  %v4709_v53 = vld [vmem:[%s9640_s2 + $0x78] sm:$0xff] }
 0xaae   : > { %v8264_v54 = vpack.c.bf16 %v4709_v53, %v4708_v52 }
 0xaaf   : > { %v924_v56 = vrot.slane %v8163_v55, 3  ;;  %v1025_v22 = vrot.slane %v8163_v55, 7 }
 0xab1   : > { %925 = vrot.lane.b32.xlu0 %v924_v56, %s7670_s20  ;;  %v4710_v56 = vld [vmem:[%s9640_s2 + $0x80] sm:$0xff] }
 0xb23   : > { %v926_v57 = vpop.permute.xlu0 %925 }
 0xb24   : > { %5703 = vmatmul.mubr.msk.f32.vlgmr.msra.gmra.mrb[4].mxu0 %vm445_vm1, %v926_v57  ;;  %v4711_v57 = vld [vmem:[%s9640_s2 + $0x88] sm:$0xff] }
 0xb25   : > { %6629 = vmatpush3.bf16.xpose.msk.msra.mxu0 %vm7780_vm3, %v7776_v7  ;;  %5756 = vmatprep.mubr.msk.f32.mxu0 %vm7667_vm4, %v7668_v9 }
 0xb26   : > { %6630 = vmatprep.subr.bf16.mxu0 %v7666_v3 }
 0xb2d   : > { %6633 = vmatpush3.bf16.xpose.msk.msra.mxu0 %vm7780_vm3, %v7806_v15 }
 0xb2e   : > { %6634 = vmatprep.subr.bf16.mxu0 %v7666_v3 }
 0xb35   : > { %6637 = vmatpush3.bf16.xpose.msk.msra.mxu0 %vm7780_vm3, %v7827_v21 }
 0xb36   : > { %6638 = vmatprep.subr.bf16.mxu0 %v7666_v3 }
 0xb3d   : > { %6641 = vmatpush3.bf16.xpose.msk.msra.mxu0 %vm7780_vm3, %v7848_v27 }
 0xb3e   : > { %6642 = vmatprep.subr.bf16.mxu0 %v7666_v3 }
 0xb45   : > { %6645 = vmatpush3.bf16.xpose.msk.msra.mxu0 %vm7780_vm3, %v7869_v33 }
 0xb46   : > { %6646 = vmatprep.subr.bf16.mxu0 %v7666_v3 }
 0xb4d   : > { %6649 = vmatpush3.bf16.xpose.msk.msra.mxu0 %vm7780_vm3, %v7890_v39 }
 0xb4e   : > { %6674 = vmatprep.subr.bf16.mxu0 %v7666_v3 }
 0xbf7   : > { %v995_v58 = vpop.f32.mrb[4].mxu0 }
 0xbf8   : > { %v996_v59 = vadd.f32 %v995_v58, %v8029_v4  ;;  %v5704_v61 = vpop.f32.mrb[5].mxu0  ;;  %v8276_v58 = vpack.c.bf16 %v4711_v57, %v4710_v56 }
 0xbf9   : > { %v4713_v61 = vld [vmem:[%s9640_s2 + $0x98] sm:$0xff] }
 0xbfa   : > { %v1000_v62 = vrot.slane %v996_v59, 4  ;;  %v4712_v59 = vld [vmem:[%s9640_s2 + $0x90] sm:$0xff] }
 0xbfc   : > { %1009 = vrot.lane.b32.xlu1 %v1000_v62, %s7669_s19  ;;  %v1002_v63 = vadd.f32 %v1000_v62, %v8038_v18  ;;  %v8288_v62 = vpack.c.bf16 %v4713_v61, %v4712_v59 }
 0xbfe   : > { %v4663_v0 = vmul.f32 -1.442695, %v1002_v63  ;;  %v4714_v63 = vld [vmem:[%s9640_s2 + $0xa0] sm:$0xff] }
 0xc00   : > { %7367 = vpow2.f32 %v4663_v0  ;;  %v4715_v0 = vld [vmem:[%s9640_s2 + $0xa8] sm:$0xff] }
 0xc0a   : > { %v7368_v1 = vpop.eup %7367 }
 0xc0b   : > { %v1006_v6 = vadd.f32 1.0, %v7368_v1  ;;  %v8300_v1 = vpack.c.bf16 %v4715_v0, %v4714_v63 }
 0xc0d   : > { %7369 = vrcp.f32 %v1006_v6  ;;  %v4716_v6 = vld [vmem:[%s9640_s2 + $0xb0] sm:$0xff] }
 0xc17   : > { %v7370_v10 = vpop.eup %7369 }
 0xc18   : > { %v1019_v20 = vsub.f32 1.0, %v7370_v10  ;;  %v1027_v24 = vmul.f32 %v7370_v10, %v1025_v22  ;;  %v8356_v22 = vld [vmem:[%s9642_s4 + $0x1] sm:$0x1] }
 0xc6e   : > { %v1010_v11 = vpop.permute.xlu1 %1009 }
 0xc6f   : > { %v1012_v12 = vmul.f32 %v7370_v10, %v1010_v11  ;;  %v4717_v10 = vld [vmem:[%s9640_s2 + $0xb8] sm:$0xff] }
 0xc70   : > { %v8312_v11 = vpack.c.bf16 %v4717_v10, %v4716_v6 }
 0xc71   : > { %1014 = vrot.lane.b32.xlu0 %v1012_v12, %s7669_s19  ;;  %v8321_v12 = vld [vmem:[%s9643_s5 + $0x1] sm:$0x1] }
 0xce3   : > { %v1015_v13 = vpop.permute.xlu0 %1014 }
 0xce4   : > { %v1017_v17 = vadd.f32 %v1015_v13, %v8038_v18 }
 0xce6   : > { %7371 = vtanh.f32 %v1017_v17 }
 0xcf0   : > { %v7372_v19 = vpop.eup %7371 }
 0xcf1   : > { %1021 = vrot.lane.b32.xlu1 %v7372_v19, %s7670_s20 }
 0xd63   : > { %v1022_v23 = vpop.permute.xlu1 %1021 }
 0xd64   : > { %v1024_v25 = vmul.f32 %v1022_v23, %v1019_v20 }
 0xd66   : > { %v8201_v26 = vadd.f32 %v1027_v24, %v1024_v25 }
 0xd68   : > { %v1035_v28 = vrot.slane %v8201_v26, 4  ;;  %v1136_v42 = vrot.slane %v8201_v26, 7 }
 0xd6a   : > { %1036 = vrot.lane.b32.xlu0 %v1035_v28, %s7670_s20 }
 0xddc   : > { %v1037_v29 = vpop.permute.xlu0 %1036 }
 0xddd   : > { %5730 = vmatmul.mubr.msk.f32.vlgmr.msra.gmra.mrb[6].mxu1 %vm445_vm1, %v1037_v29 }
 0xdde   : > { %6653 = vmatpush3.bf16.xpose.msk.msra.mxu1 %vm7780_vm3, %v7776_v7  ;;  %5783 = vmatprep.mubr.msk.f32.mxu1 %vm7667_vm4, %v7668_v9 }
 0xddf   : > { %6654 = vmatprep.subr.bf16.mxu1 %v7666_v3 }
 0xde6   : > { %6657 = vmatpush3.bf16.xpose.msk.msra.mxu1 %vm7780_vm3, %v7806_v15 }
 0xde7   : > { %6658 = vmatprep.subr.bf16.mxu1 %v7666_v3 }
 0xdee   : > { %6661 = vmatpush3.bf16.xpose.msk.msra.mxu1 %vm7780_vm3, %v7827_v21 }
 0xdef   : > { %6662 = vmatprep.subr.bf16.mxu1 %v7666_v3 }
 0xdf6   : > { %6665 = vmatpush3.bf16.xpose.msk.msra.mxu1 %vm7780_vm3, %v7848_v27 }
 0xdf7   : > { %6666 = vmatprep.subr.bf16.mxu1 %v7666_v3 }
 0xdfe   : > { %6669 = vmatpush3.bf16.xpose.msk.msra.mxu1 %vm7780_vm3, %v7869_v33 }
 0xdff   : > { %6670 = vmatprep.subr.bf16.mxu1 %v7666_v3 }
 0xe06   : > { %6673 = vmatpush3.bf16.xpose.msk.msra.mxu1 %vm7780_vm3, %v7890_v39 }
 0xe07   : > { %6698 = vmatprep.subr.bf16.mxu1 %v7666_v3 }
 0xeb0   : > { %v1106_v7 = vpop.f32.mrb[6].mxu1 }
 0xeb1   : > { %v1107_v15 = vadd.f32 %v1106_v7, %v8029_v4  ;;  %v5731_v21 = vpop.f32.mrb[7].mxu1 }
 0xeb3   : > { %v1111_v30 = vrot.slane %v1107_v15, 3 }
 0xeb5   : > { %1120 = vrot.lane.b32.xlu1 %v1111_v30, %s7669_s19  ;;  %v1113_v27 = vadd.f32 %v1111_v30, %v8038_v18 }
 0xeb7   : > { %v4677_v32 = vmul.f32 -1.442695, %v1113_v27 }
 0xeb9   : > { %7373 = vpow2.f32 %v4677_v32 }
 0xec3   : > { %v7374_v33 = vpop.eup %7373 }
 0xec4   : > { %v1117_v34 = vadd.f32 1.0, %v7374_v33 }
 0xec6   : > { %7375 = vrcp.f32 %v1117_v34 }
 0xed0   : > { %v7376_v35 = vpop.eup %7375 }
 0xed1   : > { %v1130_v41 = vsub.f32 1.0, %v7376_v35  ;;  %v1138_v44 = vmul.f32 %v7376_v35, %v1136_v42 }
 0xf27   : > { %v1121_v36 = vpop.permute.xlu1 %1120 }
 0xf28   : > { %v1123_v37 = vmul.f32 %v7376_v35, %v1121_v36 }
 0xf2a   : > { %1125 = vrot.lane.b32.xlu0 %v1123_v37, %s7669_s19 }
 0xf9c   : > { %v1126_v39 = vpop.permute.xlu0 %1125 }
 0xf9d   : > { %v1128_v38 = vadd.f32 %v1126_v39, %v8038_v18 }
 0xf9f   : > { %7377 = vtanh.f32 %v1128_v38 }
 0xfa9   : > { %v7378_v40 = vpop.eup %7377 }
 0xfaa   : > { %1132 = vrot.lane.b32.xlu1 %v7378_v40, %s7670_s20 }
0x101c   : > { %v1133_v43 = vpop.permute.xlu1 %1132 }
0x101d   : > { %v1135_v45 = vmul.f32 %v1133_v43, %v1130_v41 }
0x101f   : > { %v8239_v46 = vadd.f32 %v1138_v44, %v1135_v45 }
0x1021   : > { %v1146_v47 = vrot.slane %v8239_v46, 5 }
0x1023   : > { %1147 = vrot.lane.b32.xlu0 %v1146_v47, %s7670_s20  ;;  %v1247_v47 = vrot.slane %v8239_v46, 7 }
0x1095   : > { %v1148_v51 = vpop.permute.xlu0 %1147 }
0x1096   : > { %5757 = vmatmul.mubr.msk.f32.vlgmr.msra.gmra.mrb[6].mxu0 %vm445_vm1, %v1148_v51 }
0x1097   : > { %6677 = vmatpush3.bf16.xpose.msk.msra.mxu0 %vm7780_vm3, %v8249_v50  ;;  %5810 = vmatprep.mubr.msk.f32.mxu0 %vm7667_vm4, %v7668_v9 }
0x1098   : > { %6678 = vmatprep.subr.bf16.mxu0 %v7666_v3 }
0x109f   : > { %6681 = vmatpush3.bf16.xpose.msk.msra.mxu0 %vm7780_vm3, %v8264_v54 }
0x10a0   : > { %6682 = vmatprep.subr.bf16.mxu0 %v7666_v3 }
0x10a7   : > { %6685 = vmatpush3.bf16.xpose.msk.msra.mxu0 %vm7780_vm3, %v8276_v58 }
0x10a8   : > { %6686 = vmatprep.subr.bf16.mxu0 %v7666_v3 }
0x10af   : > { %6689 = vmatpush3.bf16.xpose.msk.msra.mxu0 %vm7780_vm3, %v8288_v62 }
0x10b0   : > { %6690 = vmatprep.subr.bf16.mxu0 %v7666_v3 }
0x10b7   : > { %6693 = vmatpush3.bf16.xpose.msk.msra.mxu0 %vm7780_vm3, %v8300_v1 }
0x10b8   : > { %6694 = vmatprep.subr.bf16.mxu0 %v7666_v3 }
0x10bf   : > { %6697 = vmatpush3.bf16.xpose.msk.msra.mxu0 %vm7780_vm3, %v8312_v11 }
0x10c0   : > { %6722 = vmatprep.subr.bf16.mxu0 %v7666_v3 }
0x10c6   : > { %5811 = vmatmul.mubr.msk.f32.vlgmr.msra.gmra.mrb[8].mxu0 %vm445_vm1, %v8321_v12 }
0x10c7   : > { %6725 = vmatpush3.bf16.xpose.msk.msra.mxu0 %vm7780_vm3, %v8249_v50  ;;  %5864 = vmatprep.mubr.msk.f32.mxu0 %vm7667_vm4, %v7668_v9 }
0x10c8   : > { %6726 = vmatprep.subr.bf16.mxu0 %v7666_v3 }
0x10cf   : > { %6729 = vmatpush3.bf16.xpose.msk.msra.mxu0 %vm7780_vm3, %v8264_v54 }
0x10d0   : > { %6730 = vmatprep.subr.bf16.mxu0 %v7666_v3 }
0x10d7   : > { %6733 = vmatpush3.bf16.xpose.msk.msra.mxu0 %vm7780_vm3, %v8276_v58 }
0x10d8   : > { %6734 = vmatprep.subr.bf16.mxu0 %v7666_v3 }
0x10df   : > { %6737 = vmatpush3.bf16.xpose.msk.msra.mxu0 %vm7780_vm3, %v8288_v62 }
0x10e0   : > { %6738 = vmatprep.subr.bf16.mxu0 %v7666_v3 }
0x10e7   : > { %6741 = vmatpush3.bf16.xpose.msk.msra.mxu0 %vm7780_vm3, %v8300_v1 }
0x10e8   : > { %6742 = vmatprep.subr.bf16.mxu0 %v7666_v3 }
0x10ef   : > { %6745 = vmatpush3.bf16.xpose.msk.msra.mxu0 %vm7780_vm3, %v8312_v11 }
0x10f0   : > { %6770 = vmatprep.subr.bf16.mxu0 %v7666_v3 }
0x1169   : > { %v1217_v13 = vpop.f32.mrb[6].mxu0 }
0x116a   : > { %v1218_v17 = vadd.f32 %v1217_v13, %v8029_v4  ;;  %v5758_v19 = vpop.f32.mrb[7].mxu0  ;;  %v1532_v13 = vrot.slane %v8321_v12, %v8035_v16 }
0x116c   : > { %v1222_v20 = vrot.slane %v1218_v17, 2 }
0x116e   : > { %1231 = vrot.lane.b32.xlu1 %v1222_v20, %s7669_s19  ;;  %v1224_v29 = vadd.f32 %v1222_v20, %v8038_v18 }
0x1170   : > { %v4691_v7 = vmul.f32 -1.442695, %v1224_v29 }
0x1172   : > { %7379 = vpow2.f32 %v4691_v7 }
0x117c   : > { %v7380_v4 = vpop.eup %7379 }
0x117d   : > { %v1228_v15 = vadd.f32 1.0, %v7380_v4 }
0x117f   : > { %7381 = vrcp.f32 %v1228_v15 }
0x1189   : > { %v7382_v21 = vpop.eup %7381 }
0x118a   : > { %v1241_v45 = vsub.f32 1.0, %v7382_v21  ;;  %v1249_v49 = vmul.f32 %v7382_v21, %v1247_v47 }
0x1199   : > { %v1490_v23 = vpop.f32.mrb[8].mxu0 }
0x119a   : > { %v1491_v24 = vadd.f32 %v8356_v22, %v1490_v23  ;;  %v5812_v25 = vpop.f32.mrb[9].mxu0 }
0x119c   : > { %v1495_v28 = vrot.slane %v1491_v24, 1 }
0x119e   : > { %1496 = vrot.lane.b32.xlu1 %v1495_v28, %s7670_s20 }
0x11e0   : > { %v1232_v30 = vpop.permute.xlu1 %1231 }
0x11e1   : > { %v1234_v27 = vmul.f32 %v7382_v21, %v1232_v30 }
0x11e3   : > { %1236 = vrot.lane.b32.xlu0 %v1234_v27, %s7669_s19 }
0x11e7   : > { %1513 = vrot.lane.b32.xlu0 %v1495_v28, %s7671_s26 }
0x1210   : > { %v1497_v32 = vpop.permute.xlu1 %1496 }
0x1211   : > { %v1499_v33 = vadd.f32 %v1497_v32, %v8038_v18  ;;  %v1506_v57 = vadd.f32 %v1497_v32, %v8033_v14 }
0x1213   : > { %v4733_v34 = vmul.f32 -1.442695, %v1499_v33  ;;  %v4734_v61 = vmul.f32 -1.442695, %v1506_v57 }
0x1215   : > { %7383 = vpow2.f32 %v4733_v34 }
0x121f   : > { %v7384_v35 = vpop.eup %7383 }
0x1220   : > { %v1503_v36 = vadd.f32 1.0, %v7384_v35 }
0x1222   : > { %7385 = vrcp.f32 %v1503_v36 }
0x122c   : > { %v7386_v38 = vpop.eup %7385 }
0x1255   : > { %v1237_v37 = vpop.permute.xlu0 %1236 }
0x1256   : > { %v1239_v39 = vadd.f32 %v1237_v37, %v8038_v18 }
0x1258   : > { %7387 = vtanh.f32 %v1239_v39 }
0x1259   : > { %v1514_v40 = vpop.permute.xlu0 %1513 }
0x125a   : > { %v1516_v41 = vmul.f32 %v7386_v38, %v1514_v40 }
0x125c   : > { %1518 = vrot.lane.b32.xlu0 %v1516_v41, %s7669_s19 }
0x1262   : > { %v7388_v42 = vpop.eup %7387 }
0x1263   : > { %1243 = vrot.lane.b32.xlu1 %v7388_v42, %s7670_s20 }
0x12ce   : > { %v1519_v43 = vpop.permute.xlu0 %1518 }
0x12cf   : > { %v1521_v44 = vadd.f32 %v1519_v43, %v8033_v14 }
0x12d1   : > { %7389 = vtanh.f32 %v1521_v44 }
0x12d2   : > { %7391 = vpow2.f32 %v4734_v61 }
0x12d5   : > { %v1244_v48 = vpop.permute.xlu1 %1243 }
0x12d6   : > { %v1246_v51 = vmul.f32 %v1244_v48, %v1241_v45 }
0x12d8   : > { %v8369_v52 = vadd.f32 %v1249_v49, %v1246_v51 }
0x12da   : > { %v1257_v53 = vrot.slane %v8369_v52, 6 }
0x12db   : > { %v7390_v56 = vpop.eup %7389 }
0x12dc   : > { %1525 = vrot.lane.b32.xlu0 %v7390_v56, %s7670_s20  ;;  %1258 = vrot.lane.b32.xlu1 %v1257_v53, %s7670_s20  ;;  %v7392_v63 = vpop.eup %7391 }
0x12dd   : > { %v1510_v0 = vadd.f32 1.0, %v7392_v63 }
0x12df   : > { %7393 = vrcp.f32 %v1510_v0 }
0x12e9   : > { %v7394_v6 = vpop.eup %7393 }
0x12ea   : > { %v1523_v17 = vsub.f32 1.0, %v7394_v6  ;;  %v1534_v20 = vmul.f32 %v7394_v6, %v1532_v13 }
0x134e   : > { %v1259_v59 = vpop.permute.xlu1 %1258  ;;  %v1526_v10 = vpop.permute.xlu0 %1525 }
0x134f   : > { %5784 = vmatmul.mubr.msk.f32.vlgmr.msra.gmra.mrb[8].mxu1 %vm445_vm1, %v1259_v59  ;;  %v1528_v19 = vmul.f32 %v1526_v10, %v1523_v17 }
0x1350   : > { %6701 = vmatpush3.bf16.xpose.msk.msra.mxu1 %vm7780_vm3, %v8249_v50  ;;  %5837 = vmatprep.mubr.msk.f32.mxu1 %vm7667_vm4, %v7668_v9 }
0x1351   : > { %6702 = vmatprep.subr.bf16.mxu1 %v7666_v3  ;;  %v8403_v23 = vadd.f32 %v1534_v20, %v1528_v19 }
0x1353   : > { %v1542_v24 = vrot.slane %v8403_v23, 7  ;;  %v1650_v45 = vrot.slane %v8403_v23, 1 }
0x1358   : > { %6705 = vmatpush3.bf16.xpose.msk.msra.mxu1 %vm7780_vm3, %v8264_v54 }
0x1359   : > { %6706 = vmatprep.subr.bf16.mxu1 %v7666_v3 }
0x1360   : > { %6709 = vmatpush3.bf16.xpose.msk.msra.mxu1 %vm7780_vm3, %v8276_v58 }
0x1361   : > { %6710 = vmatprep.subr.bf16.mxu1 %v7666_v3 }
0x1368   : > { %6713 = vmatpush3.bf16.xpose.msk.msra.mxu1 %vm7780_vm3, %v8288_v62 }
0x1369   : > { %6714 = vmatprep.subr.bf16.mxu1 %v7666_v3 }
0x1370   : > { %6717 = vmatpush3.bf16.xpose.msk.msra.mxu1 %vm7780_vm3, %v8300_v1 }
0x1371   : > { %6718 = vmatprep.subr.bf16.mxu1 %v7666_v3 }
0x1378   : > { %6721 = vmatpush3.bf16.xpose.msk.msra.mxu1 %vm7780_vm3, %v8312_v11 }
0x1379   : > { %6746 = vmatprep.subr.bf16.mxu1 %v7666_v3 }
0x137f   : > { %5838 = vmatmul.mubr.msk.f32.vlgmr.msra.gmra.mrb[10].mxu1 %vm445_vm1, %v1542_v24 }
0x1380   : > { %6749 = vmatpush3.bf16.xpose.msk.msra.mxu1 %vm7780_vm3, %v8249_v50  ;;  %5891 = vmatprep.mubr.msk.f32.mxu1 %vm7667_vm4, %v7668_v9 }
0x1381   : > { %6750 = vmatprep.subr.bf16.mxu1 %v7666_v3 }
0x1388   : > { %6753 = vmatpush3.bf16.xpose.msk.msra.mxu1 %vm7780_vm3, %v8264_v54 }
0x1389   : > { %6754 = vmatprep.subr.bf16.mxu1 %v7666_v3 }
0x1390   : > { %6757 = vmatpush3.bf16.xpose.msk.msra.mxu1 %vm7780_vm3, %v8276_v58 }
0x1391   : > { %6758 = vmatprep.subr.bf16.mxu1 %v7666_v3 }
0x1398   : > { %6761 = vmatpush3.bf16.xpose.msk.msra.mxu1 %vm7780_vm3, %v8288_v62 }
0x1399   : > { %6762 = vmatprep.subr.bf16.mxu1 %v7666_v3 }
0x13a0   : > { %6765 = vmatpush3.bf16.xpose.msk.msra.mxu1 %vm7780_vm3, %v8300_v1 }
0x13a1   : > { %6766 = vmatprep.subr.bf16.mxu1 %v7666_v3 }
0x13a8   : > { %6769 = vmatpush3.bf16.xpose.msk.msra.mxu1 %vm7780_vm3, %v8312_v11 }
0x13a9   : > { %6794 = vmatprep.subr.bf16.mxu1 %v7666_v3 }
0x1422   : > { %v8434_v12 = vpop.f32.mrb[8].mxu1 }
0x1423   : > { %v5785_v25 = vpop.f32.mrb[9].mxu1 }
0x1452   : > { %v1611_v28 = vpop.f32.mrb[10].mxu1 }
0x1453   : > { %v1612_v29 = vadd.f32 %v8356_v22, %v1611_v28  ;;  %v5839_v7 = vpop.f32.mrb[11].mxu1 }
0x1455   : > { %v1616_v4 = vrot.slane %v1612_v29, 2 }
0x1457   : > { %1634 = vrot.lane.b32.xlu0 %v1616_v4, %s7671_s26  ;;  %1617 = vrot.lane.b32.xlu1 %v1616_v4, %s7670_s20 }
0x14c9   : > { %v1618_v15 = vpop.permute.xlu1 %1617  ;;  %v1635_v34 = vpop.permute.xlu0 %1634 }
0x14ca   : > { %v1620_v21 = vadd.f32 %v1618_v15, %v8038_v18  ;;  %v1627_v38 = vadd.f32 %v1618_v15, %v8033_v14 }
0x14cc   : > { %v4748_v30 = vmul.f32 -1.442695, %v1620_v21  ;;  %v4749_v40 = vmul.f32 -1.442695, %v1627_v38 }
0x14ce   : > { %7395 = vpow2.f32 %v4748_v30 }
0x14d8   : > { %v7396_v27 = vpop.eup %7395 }
0x14d9   : > { %v1624_v32 = vadd.f32 1.0, %v7396_v27 }
0x14db   : > { %7397 = vrcp.f32 %v1624_v32 }
0x14e5   : > { %v7398_v33 = vpop.eup %7397 }
0x14e6   : > { %v1637_v35 = vmul.f32 %v7398_v33, %v1635_v34 }
0x14e8   : > { %1639 = vrot.lane.b32.xlu1 %v1637_v35, %s7669_s19 }
0x155a   : > { %v1640_v36 = vpop.permute.xlu1 %1639 }
0x155b   : > { %v1642_v37 = vadd.f32 %v1640_v36, %v8033_v14 }
0x155d   : > { %7399 = vtanh.f32 %v1642_v37 }
0x155e   : > { %7401 = vpow2.f32 %v4749_v40 }
0x1567   : > { %v7400_v39 = vpop.eup %7399 }
0x1568   : > { %1646 = vrot.lane.b32.xlu0 %v7400_v39, %s7670_s20  ;;  %v7402_v41 = vpop.eup %7401 }
0x1569   : > { %v1631_v42 = vadd.f32 1.0, %v7402_v41 }
0x156b   : > { %7403 = vrcp.f32 %v1631_v42 }
0x1575   : > { %v7404_v43 = vpop.eup %7403 }
0x1576   : > { %v1644_v44 = vsub.f32 1.0, %v7404_v43  ;;  %v1652_v48 = vmul.f32 %v7404_v43, %v1650_v45 }
0x15da   : > { %v1647_v47 = vpop.permute.xlu0 %1646 }
0x15db   : > { %v1649_v49 = vmul.f32 %v1647_v47, %v1644_v44 }
0x15dd   : > { %v8445_v51 = vadd.f32 %v1652_v48, %v1649_v49 }
0x15df   : > { %v1660_v53 = vrot.slane %v8445_v51, 6  ;;  %v1768_v27 = vrot.slane %v8445_v51, 1 }
0x15e1   : > { %5865 = vmatmul.mubr.msk.f32.vlgmr.msra.gmra.mrb[10].mxu0 %vm445_vm1, %v1660_v53 }
0x15e2   : > { %6773 = vmatpush3.bf16.xpose.msk.msra.mxu0 %vm7780_vm3, %v8249_v50  ;;  %5918 = vmatprep.mubr.msk.f32.mxu0 %vm7667_vm4, %v7668_v9 }
0x15e3   : > { %6774 = vmatprep.subr.bf16.mxu0 %v7666_v3 }
0x15ea   : > { %6777 = vmatpush3.bf16.xpose.msk.msra.mxu0 %vm7780_vm3, %v8264_v54 }
0x15eb   : > { %6778 = vmatprep.subr.bf16.mxu0 %v7666_v3 }
0x15f2   : > { %6781 = vmatpush3.bf16.xpose.msk.msra.mxu0 %vm7780_vm3, %v8276_v58 }
0x15f3   : > { %6782 = vmatprep.subr.bf16.mxu0 %v7666_v3 }
0x15fa   : > { %6785 = vmatpush3.bf16.xpose.msk.msra.mxu0 %vm7780_vm3, %v8288_v62 }
0x15fb   : > { %6786 = vmatprep.subr.bf16.mxu0 %v7666_v3 }
0x1602   : > { %6789 = vmatpush3.bf16.xpose.msk.msra.mxu0 %vm7780_vm3, %v8300_v1 }
0x1603   : > { %6790 = vmatprep.subr.bf16.mxu0 %v7666_v3 }
0x160a   : > { %6793 = vmatpush3.bf16.xpose.msk.msra.mxu0 %vm7780_vm3, %v8312_v11 }
0x160b   : > { %6818 = vmatprep.subr.bf16.mxu0 %v7666_v3 }
0x16b4   : > { %v1729_v56 = vpop.f32.mrb[10].mxu0 }
0x16b5   : > { %v1730_v57 = vadd.f32 %v8356_v22, %v1729_v56  ;;  %v5866_v59 = vpop.f32.mrb[11].mxu0 }
0x16b7   : > { %v1734_v61 = vrot.slane %v1730_v57, 3 }
0x16b9   : > { %1752 = vrot.lane.b32.xlu0 %v1734_v61, %s7671_s26  ;;  %1735 = vrot.lane.b32.xlu1 %v1734_v61, %s7670_s20 }
0x172b   : > { %v1736_v63 = vpop.permute.xlu1 %1735  ;;  %v1753_v19 = vpop.permute.xlu0 %1752 }
0x172c   : > { %v1738_v0 = vadd.f32 %v1736_v63, %v8038_v18  ;;  %v1745_v29 = vadd.f32 %v1736_v63, %v8033_v14 }
0x172e   : > { %v4763_v6 = vmul.f32 -1.442695, %v1738_v0  ;;  %v4764_v7 = vmul.f32 -1.442695, %v1745_v29 }
0x1730   : > { %7405 = vpow2.f32 %v4763_v6 }
0x173a   : > { %v7406_v10 = vpop.eup %7405 }
0x173b   : > { %v1742_v13 = vadd.f32 1.0, %v7406_v10 }
0x173d   : > { %7407 = vrcp.f32 %v1742_v13 }
0x1747   : > { %v7408_v17 = vpop.eup %7407 }
0x1748   : > { %v1755_v20 = vmul.f32 %v7408_v17, %v1753_v19 }
0x174a   : > { %1757 = vrot.lane.b32.xlu1 %v1755_v20, %s7669_s19 }
0x17bc   : > { %v1758_v24 = vpop.permute.xlu1 %1757 }
0x17bd   : > { %v1760_v25 = vadd.f32 %v1758_v24, %v8033_v14 }
0x17bf   : > { %7409 = vtanh.f32 %v1760_v25 }
0x17c0   : > { %7411 = vpow2.f32 %v4764_v7 }
0x17c9   : > { %v7410_v28 = vpop.eup %7409 }
0x17ca   : > { %1764 = vrot.lane.b32.xlu0 %v7410_v28, %s7670_s20  ;;  %v7412_v4 = vpop.eup %7411 }
0x17cb   : > { %v1749_v15 = vadd.f32 1.0, %v7412_v4 }
0x17cd   : > { %7413 = vrcp.f32 %v1749_v15 }
0x17d7   : > { %v7414_v21 = vpop.eup %7413 }
0x17d8   : > { %v1762_v30 = vsub.f32 1.0, %v7414_v21  ;;  %v1770_v33 = vmul.f32 %v7414_v21, %v1768_v27 }
0x183c   : > { %v1765_v32 = vpop.permute.xlu0 %1764 }
0x183d   : > { %v1767_v34 = vmul.f32 %v1765_v32, %v1762_v30 }
0x183f   : > { %v8484_v35 = vadd.f32 %v1770_v33, %v1767_v34 }
0x1841   : > { %v1778_v36 = vrot.slane %v8484_v35, 5  ;;  %v1886_v13 = vrot.slane %v8484_v35, 1 }
0x1843   : > { %5892 = vmatmul.mubr.msk.f32.vlgmr.msra.gmra.mrb[12].mxu1 %vm445_vm1, %v1778_v36 }
0x1844   : > { %6797 = vmatpush3.bf16.xpose.msk.msra.mxu1 %vm7780_vm3, %v8249_v50  ;;  %5945 = vmatprep.mubr.msk.f32.mxu1 %vm7667_vm4, %v7668_v9 }
0x1845   : > { %6798 = vmatprep.subr.bf16.mxu1 %v7666_v3 }
0x184c   : > { %6801 = vmatpush3.bf16.xpose.msk.msra.mxu1 %vm7780_vm3, %v8264_v54 }
0x184d   : > { %6802 = vmatprep.subr.bf16.mxu1 %v7666_v3 }
0x1854   : > { %6805 = vmatpush3.bf16.xpose.msk.msra.mxu1 %vm7780_vm3, %v8276_v58 }
0x1855   : > { %6806 = vmatprep.subr.bf16.mxu1 %v7666_v3 }
0x185c   : > { %6809 = vmatpush3.bf16.xpose.msk.msra.mxu1 %vm7780_vm3, %v8288_v62 }
0x185d   : > { %6810 = vmatprep.subr.bf16.mxu1 %v7666_v3 }
0x1864   : > { %6813 = vmatpush3.bf16.xpose.msk.msra.mxu1 %vm7780_vm3, %v8300_v1 }
0x1865   : > { %6814 = vmatprep.subr.bf16.mxu1 %v7666_v3 }
0x186c   : > { %6817 = vmatpush3.bf16.xpose.msk.msra.mxu1 %vm7780_vm3, %v8312_v11 }
0x186d   : > { %6842 = vmatprep.subr.bf16.mxu1 %v7666_v3 }
0x1916   : > { %v1847_v37 = vpop.f32.mrb[12].mxu1 }
0x1917   : > { %v1848_v39 = vadd.f32 %v8356_v22, %v1847_v37  ;;  %v5893_v38 = vpop.f32.mrb[13].mxu1 }
0x1919   : > { %v1852_v40 = vrot.slane %v1848_v39, 4 }
0x191b   : > { %1870 = vrot.lane.b32.xlu0 %v1852_v40, %s7671_s26  ;;  %1853 = vrot.lane.b32.xlu1 %v1852_v40, %s7670_s20 }
0x198d   : > { %v1854_v41 = vpop.permute.xlu1 %1853  ;;  %v1871_v48 = vpop.permute.xlu0 %1870 }
0x198e   : > { %v1856_v42 = vadd.f32 %v1854_v41, %v8038_v18  ;;  %v1863_v59 = vadd.f32 %v1854_v41, %v8033_v14 }
0x1990   : > { %v4778_v43 = vmul.f32 -1.442695, %v1856_v42  ;;  %v4779_v61 = vmul.f32 -1.442695, %v1863_v59 }
0x1992   : > { %7415 = vpow2.f32 %v4778_v43 }
0x199c   : > { %v7416_v44 = vpop.eup %7415 }
0x199d   : > { %v1860_v45 = vadd.f32 1.0, %v7416_v44 }
0x199f   : > { %7417 = vrcp.f32 %v1860_v45 }
0x19a9   : > { %v7418_v47 = vpop.eup %7417 }
0x19aa   : > { %v1873_v49 = vmul.f32 %v7418_v47, %v1871_v48 }
0x19ac   : > { %1875 = vrot.lane.b32.xlu1 %v1873_v49, %s7669_s19 }
0x1a1e   : > { %v1876_v53 = vpop.permute.xlu1 %1875 }
0x1a1f   : > { %v1878_v56 = vadd.f32 %v1876_v53, %v8033_v14 }
0x1a21   : > { %7419 = vtanh.f32 %v1878_v56 }
0x1a22   : > { %7421 = vpow2.f32 %v4779_v61 }
0x1a2b   : > { %v7420_v57 = vpop.eup %7419 }
0x1a2c   : > { %1882 = vrot.lane.b32.xlu0 %v7420_v57, %s7670_s20  ;;  %v7422_v63 = vpop.eup %7421 }
0x1a2d   : > { %v1867_v0 = vadd.f32 1.0, %v7422_v63 }
0x1a2f   : > { %7423 = vrcp.f32 %v1867_v0 }
0x1a39   : > { %v7424_v6 = vpop.eup %7423 }
0x1a3a   : > { %v1880_v10 = vsub.f32 1.0, %v7424_v6  ;;  %v1888_v19 = vmul.f32 %v7424_v6, %v1886_v13 }
0x1a9e   : > { %v1883_v17 = vpop.permute.xlu0 %1882 }
0x1a9f   : > { %v1885_v20 = vmul.f32 %v1883_v17, %v1880_v10 }
0x1aa1   : > { %v8523_v24 = vadd.f32 %v1888_v19, %v1885_v20 }
0x1aa3   : > { %v1896_v25 = vrot.slane %v8523_v24, 4  ;;  %v2004_v47 = vrot.slane %v8523_v24, 1 }
0x1aa5   : > { %5919 = vmatmul.mubr.msk.f32.vlgmr.msra.gmra.mrb[12].mxu0 %vm445_vm1, %v1896_v25 }
0x1aa6   : > { %6821 = vmatpush3.bf16.xpose.msk.msra.mxu0 %vm7780_vm3, %v8249_v50  ;;  %5972 = vmatprep.mubr.msk.f32.mxu0 %vm7667_vm4, %v7668_v9 }
0x1aa7   : > { %6822 = vmatprep.subr.bf16.mxu0 %v7666_v3 }
0x1aae   : > { %6825 = vmatpush3.bf16.xpose.msk.msra.mxu0 %vm7780_vm3, %v8264_v54 }
0x1aaf   : > { %6826 = vmatprep.subr.bf16.mxu0 %v7666_v3 }
0x1ab6   : > { %6829 = vmatpush3.bf16.xpose.msk.msra.mxu0 %vm7780_vm3, %v8276_v58 }
0x1ab7   : > { %6830 = vmatprep.subr.bf16.mxu0 %v7666_v3 }
0x1abe   : > { %6833 = vmatpush3.bf16.xpose.msk.msra.mxu0 %vm7780_vm3, %v8288_v62 }
0x1abf   : > { %6834 = vmatprep.subr.bf16.mxu0 %v7666_v3 }
0x1ac6   : > { %6837 = vmatpush3.bf16.xpose.msk.msra.mxu0 %vm7780_vm3, %v8300_v1 }
0x1ac7   : > { %6838 = vmatprep.subr.bf16.mxu0 %v7666_v3 }
0x1ace   : > { %6841 = vmatpush3.bf16.xpose.msk.msra.mxu0 %vm7780_vm3, %v8312_v11 }
0x1acf   : > { %6866 = vmatprep.subr.bf16.mxu0 %v7666_v3 }
0x1b78   : > { %v1965_v28 = vpop.f32.mrb[12].mxu0 }
0x1b79   : > { %v1966_v29 = vadd.f32 %v8356_v22, %v1965_v28  ;;  %v5920_v7 = vpop.f32.mrb[13].mxu0 }
0x1b7b   : > { %v1970_v4 = vrot.slane %v1966_v29, 5 }
0x1b7d   : > { %1988 = vrot.lane.b32.xlu0 %v1970_v4, %s7671_s26  ;;  %1971 = vrot.lane.b32.xlu1 %v1970_v4, %s7670_s20 }
0x1bef   : > { %v1972_v15 = vpop.permute.xlu1 %1971  ;;  %v1989_v34 = vpop.permute.xlu0 %1988 }
0x1bf0   : > { %v1974_v21 = vadd.f32 %v1972_v15, %v8038_v18  ;;  %v1981_v40 = vadd.f32 %v1972_v15, %v8033_v14 }
0x1bf2   : > { %v4793_v30 = vmul.f32 -1.442695, %v1974_v21  ;;  %v4794_v41 = vmul.f32 -1.442695, %v1981_v40 }
0x1bf4   : > { %7425 = vpow2.f32 %v4793_v30 }
0x1bfe   : > { %v7426_v27 = vpop.eup %7425 }
0x1bff   : > { %v1978_v32 = vadd.f32 1.0, %v7426_v27 }
0x1c01   : > { %7427 = vrcp.f32 %v1978_v32 }
0x1c0b   : > { %v7428_v33 = vpop.eup %7427 }
0x1c0c   : > { %v1991_v36 = vmul.f32 %v7428_v33, %v1989_v34 }
0x1c0e   : > { %1993 = vrot.lane.b32.xlu1 %v1991_v36, %s7669_s19 }
0x1c80   : > { %v1994_v37 = vpop.permute.xlu1 %1993 }
0x1c81   : > { %v1996_v39 = vadd.f32 %v1994_v37, %v8033_v14 }
0x1c83   : > { %7429 = vtanh.f32 %v1996_v39 }
0x1c84   : > { %7431 = vpow2.f32 %v4794_v41 }
0x1c8d   : > { %v7430_v38 = vpop.eup %7429 }
0x1c8e   : > { %2000 = vrot.lane.b32.xlu0 %v7430_v38, %s7670_s20  ;;  %v7432_v42 = vpop.eup %7431 }
0x1c8f   : > { %v1985_v43 = vadd.f32 1.0, %v7432_v42 }
0x1c91   : > { %7433 = vrcp.f32 %v1985_v43 }
0x1c9b   : > { %v7434_v44 = vpop.eup %7433 }
0x1c9c   : > { %v1998_v45 = vsub.f32 1.0, %v7434_v44  ;;  %v2006_v49 = vmul.f32 %v7434_v44, %v2004_v47 }
0x1d00   : > { %v2001_v48 = vpop.permute.xlu0 %2000 }
0x1d01   : > { %v2003_v53 = vmul.f32 %v2001_v48, %v1998_v45 }
0x1d03   : > { %v8562_v56 = vadd.f32 %v2006_v49, %v2003_v53  ;;  %v7599_v53 = vld [vmem:[%s9642_s4] sm:$0x1] }
0x1d05   : > { %v2014_v57 = vrot.slane %v8562_v56, 3  ;;  %v2122_v15 = vrot.slane %v8562_v56, 1 }
0x1d07   : > { %5946 = vmatmul.mubr.msk.f32.vlgmr.msra.gmra.mrb[14].mxu1 %vm445_vm1, %v2014_v57  ;;  %v1329_v57 = vadd.f32 %v7599_v53, %v8434_v12  ;;  %v4893_v53 = vld [vmem:[%s9640_s2 + $0xd8] sm:$0xff] }
0x1d08   : > { %6845 = vmatpush3.bf16.xpose.msk.msra.mxu1 %vm7780_vm3, %v8249_v50  ;;  %5999 = vmatprep.mubr.msk.f32.mxu1 %vm7667_vm4, %v7668_v9 }
0x1d09   : > { %6846 = vmatprep.subr.bf16.mxu1 %v7666_v3 }
0x1d10   : > { %6849 = vmatpush3.bf16.xpose.msk.msra.mxu1 %vm7780_vm3, %v8264_v54 }
0x1d11   : > { %6850 = vmatprep.subr.bf16.mxu1 %v7666_v3 }
0x1d18   : > { %6853 = vmatpush3.bf16.xpose.msk.msra.mxu1 %vm7780_vm3, %v8276_v58 }
0x1d19   : > { %6854 = vmatprep.subr.bf16.mxu1 %v7666_v3 }
0x1d20   : > { %6857 = vmatpush3.bf16.xpose.msk.msra.mxu1 %vm7780_vm3, %v8288_v62 }
0x1d21   : > { %6858 = vmatprep.subr.bf16.mxu1 %v7666_v3 }
0x1d28   : > { %6861 = vmatpush3.bf16.xpose.msk.msra.mxu1 %vm7780_vm3, %v8300_v1 }
0x1d29   : > { %6862 = vmatprep.subr.bf16.mxu1 %v7666_v3 }
0x1d30   : > { %6865 = vmatpush3.bf16.xpose.msk.msra.mxu1 %vm7780_vm3, %v8312_v11 }
0x1d31   : > { %6914 = vmatprep.subr.bf16.mxu1 %v7666_v3 }
0x1dda   : > { %v2083_v50 = vpop.f32.mrb[14].mxu1 }
0x1ddb   : > { %v2084_v54 = vadd.f32 %v8356_v22, %v2083_v50  ;;  %v5947_v58 = vpop.f32.mrb[15].mxu1 }
0x1ddd   : > { %v2088_v59 = vrot.slane %v2084_v54, 6  ;;  %v1333_v54 = vrot.slane %v1329_v57, 1 }
0x1ddf   : > { %2106 = vrot.lane.b32.xlu0 %v2088_v59, %s7671_s26  ;;  %2089 = vrot.lane.b32.xlu1 %v2088_v59, %s7670_s20 }
0x1e51   : > { %v2090_v62 = vpop.permute.xlu1 %2089  ;;  %v2107_v6 = vpop.permute.xlu0 %2106 }
0x1e52   : > { %v2092_v1 = vadd.f32 %v2090_v62, %v8038_v18  ;;  %v2099_v20 = vadd.f32 %v2090_v62, %v8033_v14  ;;  %v1335_v62 = vadd.f32 %v1333_v54, %v8038_v18 }
0x1e54   : > { %v4808_v61 = vmul.f32 -1.442695, %v2092_v1  ;;  %v4809_v25 = vmul.f32 -1.442695, %v2099_v20  ;;  %v4705_v1 = vmul.f32 -1.442695, %v1335_v62 }
0x1e56   : > { %7435 = vpow2.f32 %v4808_v61 }
0x1e60   : > { %v7436_v63 = vpop.eup %7435 }
0x1e61   : > { %v2096_v0 = vadd.f32 1.0, %v7436_v63 }
0x1e63   : > { %7437 = vrcp.f32 %v2096_v0 }
0x1e6d   : > { %v7438_v11 = vpop.eup %7437 }
0x1e6e   : > { %v2109_v10 = vmul.f32 %v7438_v11, %v2107_v6 }
0x1e70   : > { %2111 = vrot.lane.b32.xlu1 %v2109_v10, %s7669_s19 }
0x1ee2   : > { %v2112_v13 = vpop.permute.xlu1 %2111 }
0x1ee3   : > { %v2114_v17 = vadd.f32 %v2112_v13, %v8033_v14 }
0x1ee5   : > { %7439 = vtanh.f32 %v2114_v17 }
0x1ee6   : > { %7441 = vpow2.f32 %v4809_v25 }
0x1eef   : > { %v7440_v19 = vpop.eup %7439 }
0x1ef0   : > { %2118 = vrot.lane.b32.xlu0 %v7440_v19, %s7670_s20  ;;  %v7442_v28 = vpop.eup %7441 }
0x1ef1   : > { %v2103_v29 = vadd.f32 1.0, %v7442_v28 }
0x1ef3   : > { %7443 = vrcp.f32 %v2103_v29 }
0x1efd   : > { %v7444_v7 = vpop.eup %7443 }
0x1efe   : > { %v2116_v4 = vsub.f32 1.0, %v7444_v7  ;;  %v2124_v30 = vmul.f32 %v7444_v7, %v2122_v15 }
0x1f62   : > { %v2119_v21 = vpop.permute.xlu0 %2118 }
0x1f63   : > { %v2121_v27 = vmul.f32 %v2119_v21, %v2116_v4 }
0x1f65   : > { %v8601_v32 = vadd.f32 %v2124_v30, %v2121_v27 }
0x1f67   : > { %v2132_v33 = vrot.slane %v8601_v32, 2  ;;  %v2240_v10 = vrot.slane %v8601_v32, 1 }
0x1f69   : > { %5973 = vmatmul.mubr.msk.f32.vlgmr.msra.gmra.mrb[14].mxu0 %vm445_vm1, %v2132_v33 }
0x1f6a   : > { %2544 = vmatprep.mubr.f32.mxu0 %v7668_v9 }
0x203c   : > { %v2201_v34 = vpop.f32.mrb[14].mxu0 }
0x203d   : > { %v2202_v36 = vadd.f32 %v8356_v22, %v2201_v34  ;;  %v5974_v37 = vpop.f32.mrb[15].mxu0 }
0x203f   : > { %v2206_v39 = vrot.slane %v2202_v36, 7 }
0x2041   : > { %2224 = vrot.lane.b32.xlu0 %v2206_v39, %s7671_s26  ;;  %2207 = vrot.lane.b32.xlu1 %v2206_v39, %s7670_s20 }
0x20b3   : > { %v2208_v38 = vpop.permute.xlu1 %2207  ;;  %v2225_v45 = vpop.permute.xlu0 %2224 }
0x20b4   : > { %v2210_v40 = vadd.f32 %v2208_v38, %v8038_v18  ;;  %v2217_v58 = vadd.f32 %v2208_v38, %v8033_v14 }
0x20b6   : > { %v4823_v41 = vmul.f32 -1.442695, %v2210_v40  ;;  %v4824_v59 = vmul.f32 -1.442695, %v2217_v58  ;;  %v4894_v58 = vld [vmem:[%s9640_s2 + $0xe0] sm:$0xff] }
0x20b8   : > { %7445 = vpow2.f32 %v4823_v41 }
0x20c2   : > { %v7446_v42 = vpop.eup %7445 }
0x20c3   : > { %v2214_v43 = vadd.f32 1.0, %v7446_v42 }
0x20c5   : > { %7447 = vrcp.f32 %v2214_v43 }
0x20cf   : > { %v7448_v44 = vpop.eup %7447 }
0x20d0   : > { %v2227_v47 = vmul.f32 %v7448_v44, %v2225_v45 }
0x20d2   : > { %2229 = vrot.lane.b32.xlu1 %v2227_v47, %s7669_s19 }
0x2144   : > { %v2230_v48 = vpop.permute.xlu1 %2229 }
0x2145   : > { %v2232_v49 = vadd.f32 %v2230_v48, %v8033_v14 }
0x2147   : > { %7449 = vtanh.f32 %v2232_v49  ;;  %v4892_v49 = vld [vmem:[%s9640_s2 + $0xd0] sm:$0xff] }
0x2148   : > { %7451 = vpow2.f32 %v4824_v59  ;;  %v4895_v59 = vld [vmem:[%s9640_s2 + $0xe8] sm:$0xff] }
0x2149   : > { %7453 = vpow2.f32 %v4705_v1  ;;  %v8689_v62 = vpack.c.bf16 %v4895_v59, %v4894_v58 }
0x2151   : > { %v7450_v50 = vpop.eup %7449 }
0x2152   : > { %2236 = vrot.lane.b32.xlu0 %v7450_v50, %s7670_s20  ;;  %v7452_v61 = vpop.eup %7451  ;;  %v8676_v50 = vpack.c.bf16 %v4893_v53, %v4892_v49  ;;  %v4862_v53 = vld [vmem:[%s9639_s1 + $0x170] sm:$0xff] }
0x2153   : > { %v2221_v63 = vadd.f32 1.0, %v7452_v61  ;;  %v7454_v0 = vpop.eup %7453  ;;  %v4896_v61 = vld [vmem:[%s9640_s2 + $0xf0] sm:$0xff] }
0x2154   : > { %v1339_v11 = vadd.f32 1.0, %v7454_v0 }
0x2155   : > { %7455 = vrcp.f32 %v2221_v63  ;;  %v4897_v63 = vld [vmem:[%s9640_s2 + $0xf8] sm:$0xff] }
0x2156   : > { %1342 = vrot.lane.b32.xlu0 %v1333_v54, %s7669_s19  ;;  %7457 = vrcp.f32 %v1339_v11  ;;  %v8702_v0 = vpack.c.bf16 %v4897_v63, %v4896_v61  ;;  %v4898_v11 = vld [vmem:[%s9640_s2 + $0x100] sm:$0xff] }
0x215f   : > { %v7456_v12 = vpop.eup %7455 }
0x2160   : > { %v2234_v6 = vsub.f32 1.0, %v7456_v12  ;;  %v2242_v17 = vmul.f32 %v7456_v12, %v2240_v10  ;;  %v7458_v25 = vpop.eup %7457  ;;  %v4899_v12 = vld [vmem:[%s9640_s2 + $0x108] sm:$0xff]  ;;  %v4900_v10 = vld [vmem:[%s9640_s2 + $0x110] sm:$0xff] }
0x2161   : > { %v1352_v34 = vsub.f32 1.0, %v7458_v25 }
0x21c4   : > { %v2237_v13 = vpop.permute.xlu0 %2236 }
0x21c5   : > { %v2239_v19 = vmul.f32 %v2237_v13, %v2234_v6  ;;  %v8718_v6 = vpack.c.bf16 %v4899_v12, %v4898_v11  ;;  %v4901_v13 = vld [vmem:[%s9640_s2 + $0x118] sm:$0xff] }
0x21c7   : > { %v8621_v20 = vadd.f32 %v2242_v17, %v2239_v19  ;;  %v8740_v17 = vpack.c.bf16 %v4901_v13, %v4900_v10  ;;  %v4842_v19 = vld [vmem:[%s9639_s1 + $0xd0] sm:$0xff] }
0x21c8   : > { %v1343_v28 = vpop.permute.xlu0 %1342 }
0x21c9   : > { %v2250_v29 = vrot.slane %v8621_v20, 1  ;;  %v1345_v7 = vmul.f32 %v7458_v25, %v1343_v28  ;;  %v8762_v28 = vld [vmem:[%s9643_s5 + $0x2] sm:$0x1] }
0x21cb   : > { %6000 = vmatmul.mubr.msk.f32.vlgmr.msra.gmra.mrb[16].mxu1 %vm445_vm1, %v2250_v29  ;;  %1347 = vrot.lane.b32.xlu0 %v1345_v7, %s7669_s19 }
0x21cc   : > { %6026 = vmatprep.mubr.msk.f32.mxu1 %vm7667_vm4, %v7668_v9 }
0x223d   : > { %v1348_v4 = vpop.permute.xlu0 %1347 }
0x223e   : > { %v1350_v15 = vadd.f32 %v1348_v4, %v8038_v18  ;;  %v4846_v4 = vld [vmem:[%s9639_s1 + $0xf0] sm:$0xff] }
0x2240   : > { %7459 = vtanh.f32 %v1350_v15  ;;  %v4847_v15 = vld [vmem:[%s9639_s1 + $0xf8] sm:$0xff] }
0x224a   : > { %v7460_v21 = vpop.eup %7459 }
0x224b   : > { %1354 = vrot.lane.b32.xlu0 %v7460_v21, %s7670_s20  ;;  %v6879_v21 = vpack.c.bf16 %v4847_v15, %v4846_v4  ;;  %v7600_v15 = vld [vmem:[%s9641_s3 + $0x2] sm:$0x3] }
0x224f   : > { %697 = vrot.lane.b32.xlu0 %v8087_v60, %s7670_s20  ;;  %v1358_v60 = vrot.slane %v8369_v52, 7 }
0x2251   : > { %v1360_v37 = vmul.f32 %v7458_v25, %v1358_v60  ;;  %v4851_v60 = vld [vmem:[%s9639_s1 + $0x118] sm:$0xff] }
0x2253   : > { %919 = vrot.lane.b32.xlu0 %v8163_v55, %s7670_s20 }
0x2257   : > { %1141 = vrot.lane.b32.xlu0 %v8239_v46, %s7670_s20 }
0x229e   : > { %v2319_v30 = vpop.f32.mrb[16].mxu1 }
0x229f   : > { %v2320_v27 = vadd.f32 %v8356_v22, %v2319_v30  ;;  %v6001_v33 = vpop.f32.mrb[17].mxu1  ;;  %v4848_v30 = vld [vmem:[%s9639_s1 + $0x100] sm:$0xff] }
0x22a1   : > { %2324 = vrot.lane.b32.xlu1 %v2320_v27, %s7670_s20 }
0x22a5   : > { %2341 = vrot.lane.b32.xlu1 %v2320_v27, %s7671_s26  ;;  %v4849_v27 = vld [vmem:[%s9639_s1 + $0x108] sm:$0xff] }
0x22a6   : > { %v6883_v33 = vpack.c.bf16 %v4849_v27, %v4848_v30 }
0x22bd   : > { %v1355_v36 = vpop.permute.xlu0 %1354 }
0x22be   : > { %v1357_v39 = vmul.f32 %v1355_v36, %v1352_v34  ;;  %v4850_v34 = vld [vmem:[%s9639_s1 + $0x110] sm:$0xff] }
0x22bf   : > { %v6887_v36 = vpack.c.bf16 %v4851_v60, %v4850_v34 }
0x22c0   : > { %v1361_v55 = vadd.f32 %v1360_v37, %v1357_v39  ;;  %v4852_v37 = vld [vmem:[%s9639_s1 + $0x120] sm:$0xff]  ;;  %v4853_v39 = vld [vmem:[%s9639_s1 + $0x128] sm:$0xff] }
0x22c1   : > { %v698_v38 = vpop.permute.xlu0 %697 }
0x22c2   : > { %701 = vst.msk [vmem:[%s8051_s9] sm:$0x2] %vm700_vm6, %v698_v38  ;;  %1363 = vrot.lane.b32.xlu0 %v1361_v55, %s7670_s20  ;;  %v6891_v55 = vpack.c.bf16 %v4853_v39, %v4852_v37  ;;  %v4854_v38 = vld [vmem:[%s9639_s1 + $0x130] sm:$0xff]  ;;  %vm2012_vm6 = vcmask 519427  }
0x22c5   : > { %v920_v46 = vpop.permute.xlu0 %919 }
0x22c6   : > { %923 = vst.msk [vmem:[%s8051_s9] sm:$0x8] %vm922_vm7, %v920_v46  ;;  %1655 = vrot.lane.b32.xlu0 %v8445_v51, %s7671_s26  ;;  %v4855_v46 = vld [vmem:[%s9639_s1 + $0x138] sm:$0xff]  ;;  %vm2248_vm7 = vcmask 517377  }
0x22c9   : > { %v1142_v22 = vpop.permute.xlu0 %1141 }
0x22ca   : > { %1145 = vst.msk [vmem:[%s8051_s9] sm:$0x20] %vm1144_vm8, %v1142_v22  ;;  %1891 = vrot.lane.b32.xlu0 %v8523_v24, %s7671_s26  ;;  %v6895_v22 = vpack.c.bf16 %v4855_v46, %v4854_v38  ;;  %vm2364_vm8 = vcmask 516352  }
0x22ce   : > { %2127 = vrot.lane.b32.xlu0 %v8601_v32, %s7671_s26  ;;  %v4890_v32 = vld [vmem:[%s9640_s2 + $0xc0] sm:$0xff] }
0x2313   : > { %v8652_v40 = vpop.permute.xlu1 %2324 }
0x2314   : > { %v2327_v41 = vadd.f32 %v8652_v40, %v8038_v18  ;;  %v4891_v18 = vld [vmem:[%s9640_s2 + $0xc8] sm:$0xff] }
0x2315   : > { %v8664_v48 = vpack.c.bf16 %v4891_v18, %v4890_v32 }
0x2316   : > { %v4838_v42 = vmul.f32 -1.442695, %v2327_v41  ;;  %v2334_v41 = vadd.f32 %v8652_v40, %v8033_v14  ;;  %v4859_v40 = vld [vmem:[%s9639_s1 + $0x158] sm:$0xff] }
0x2317   : > { %v2342_v45 = vpop.permute.xlu1 %2341  ;;  %6917 = vmatpush3.bf16.xpose.msk.msra.mxu1 %vm7780_vm3, %v8664_v48 }
0x2318   : > { %7461 = vpow2.f32 %v4838_v42  ;;  %6918 = vmatprep.subr.bf16.mxu1 %v7666_v3  ;;  %v4856_v42 = vld [vmem:[%s9639_s1 + $0x140] sm:$0xff] }
0x231f   : > { %6921 = vmatpush3.bf16.xpose.msk.msra.mxu1 %vm7780_vm3, %v8676_v50 }
0x2320   : > { %6922 = vmatprep.subr.bf16.mxu1 %v7666_v3 }
0x2322   : > { %v7462_v43 = vpop.eup %7461 }
0x2323   : > { %v2331_v44 = vadd.f32 1.0, %v7462_v43  ;;  %v4857_v43 = vld [vmem:[%s9639_s1 + $0x148] sm:$0xff] }
0x2325   : > { %7463 = vrcp.f32 %v2331_v44  ;;  %v6899_v44 = vpack.c.bf16 %v4857_v43, %v4856_v42 }
0x2327   : > { %6925 = vmatpush3.bf16.xpose.msk.msra.mxu1 %vm7780_vm3, %v8689_v62 }
0x2328   : > { %6926 = vmatprep.subr.bf16.mxu1 %v7666_v3 }
0x232f   : > { %v7464_v51 = vpop.eup %7463  ;;  %6929 = vmatpush3.bf16.xpose.msk.msra.mxu1 %vm7780_vm3, %v8702_v0 }
0x2330   : > { %v2344_v47 = vmul.f32 %v7464_v51, %v2342_v45  ;;  %6930 = vmatprep.subr.bf16.mxu1 %v7666_v3  ;;  %v4839_v51 = vmul.f32 -1.442695, %v2334_v41 }
0x2332   : > { %2346 = vrot.lane.b32.xlu1 %v2344_v47, %s7669_s19  ;;  %v4860_v47 = vld [vmem:[%s9639_s1 + $0x160] sm:$0xff] }
0x2334   : > { %v1364_v24 = vpop.permute.xlu0 %1363 }
0x2335   : > { %1367 = vst.msk [vmem:[%s8051_s9] sm:$0x80] %vm1366_vm9, %v1364_v24  ;;  %v4861_v24 = vld [vmem:[%s9639_s1 + $0x168] sm:$0xff]  ;;  %vm2824_vm9 = vcmask 779777  }
0x2336   : > { %v6907_v18 = vpack.c.bf16 %v4861_v24, %v4860_v47 }
0x2337   : > { %6933 = vmatpush3.bf16.xpose.msk.msra.mxu1 %vm7780_vm3, %v8718_v6 }
0x2338   : > { %6934 = vmatprep.subr.bf16.mxu1 %v7666_v3  ;;  %v1656_v58 = vpop.permute.xlu0 %1655 }
0x233f   : > { %6937 = vmatpush3.bf16.xpose.msk.msra.mxu1 %vm7780_vm3, %v8740_v17 }
0x2340   : > { %6938 = vmatprep.subr.bf16.mxu1 %v7666_v3 }
0x2346   : > { %6027 = vmatmul.mubr.msk.f32.vlgmr.msra.gmra.mrb[18].mxu1 %vm445_vm1, %v8762_v28 }
0x2347   : > { %6941 = vmatpush3.bf16.xpose.msk.msra.mxu1 %vm7780_vm3, %v8664_v48  ;;  %6053 = vmatprep.mubr.msk.f32.mxu1 %vm7667_vm4, %v7668_v9 }
0x2348   : > { %6942 = vmatprep.subr.bf16.mxu1 %v7666_v3 }
0x234f   : > { %6945 = vmatpush3.bf16.xpose.msk.msra.mxu1 %vm7780_vm3, %v8676_v50 }
0x2350   : > { %6946 = vmatprep.subr.bf16.mxu1 %v7666_v3 }
0x2357   : > { %6949 = vmatpush3.bf16.xpose.msk.msra.mxu1 %vm7780_vm3, %v8689_v62 }
0x2358   : > { %6950 = vmatprep.subr.bf16.mxu1 %v7666_v3 }
0x235f   : > { %6953 = vmatpush3.bf16.xpose.msk.msra.mxu1 %vm7780_vm3, %v8702_v0 }
0x2360   : > { %6954 = vmatprep.subr.bf16.mxu1 %v7666_v3 }
0x2367   : > { %6957 = vmatpush3.bf16.xpose.msk.msra.mxu1 %vm7780_vm3, %v8718_v6 }
0x2368   : > { %6958 = vmatprep.subr.bf16.mxu1 %v7666_v3 }
0x236f   : > { %6961 = vmatpush3.bf16.xpose.msk.msra.mxu1 %vm7780_vm3, %v8740_v17 }
0x2370   : > { %6986 = vmatprep.subr.bf16.mxu1 %v7666_v3 }
0x23a4   : > { %v2347_v57 = vpop.permute.xlu1 %2346 }
0x23a5   : > { %v2349_v54 = vadd.f32 %v2347_v57, %v8033_v14  ;;  %v4858_v14 = vld [vmem:[%s9639_s1 + $0x150] sm:$0xff]  ;;  %v4863_v57 = vld [vmem:[%s9639_s1 + $0x178] sm:$0xff] }
0x23a6   : > { %v6903_v45 = vpack.c.bf16 %v4859_v40, %v4858_v14 }
0x23a7   : > { %7465 = vtanh.f32 %v2349_v54  ;;  %v6911_v54 = vpack.c.bf16 %v4863_v57, %v4862_v53 }
0x23a8   : > { %7467 = vpow2.f32 %v4839_v51 }
0x23b1   : > { %v7466_v1 = vpop.eup %7465 }
0x23b2   : > { %2353 = vrot.lane.b32.xlu1 %v7466_v1, %s7670_s20  ;;  %v7468_v32 = vpop.eup %7467  ;;  %v1892_v1 = vpop.permute.xlu0 %1891 }
0x23b3   : > { %v2338_v49 = vadd.f32 1.0, %v7468_v32 }
0x23b5   : > { %7469 = vrcp.f32 %v2338_v49 }
0x23b6   : > { %808 = vrot.lane.b32.xlu1 %v8125_v31, %s7670_s20  ;;  %v4840_v31 = vld [vmem:[%s9639_s1 + $0xc0] sm:$0xff] }
0x23ba   : > { %1030 = vrot.lane.b32.xlu1 %v8201_v26, %s7670_s20  ;;  %v4841_v26 = vld [vmem:[%s9639_s1 + $0xc8] sm:$0xff] }
0x23be   : > { %1252 = vrot.lane.b32.xlu1 %v8369_v52, %s7670_s20  ;;  %v6867_v52 = vpack.c.bf16 %v4841_v26, %v4840_v31  ;;  %v2128_v26 = vpop.permute.xlu0 %2127 }
0x23bf   : > { %v7470_v59 = vpop.eup %7469 }
0x23c0   : > { %6869 = vmatpush1.bf16.xpose.msk.msra.mxu0 %vm7769_vm2, %v6867_v52  ;;  %v2351_v61 = vsub.f32 1.0, %v7470_v59  ;;  %v2358_v11 = vmul.f32 %v7470_v59, %v2250_v29 }
0x23c1   : > { %6870 = vmatprep.subr.bf16.mxu0 %v7666_v3 }
0x23c2   : > { %1537 = vrot.lane.b32.xlu1 %v8403_v23, %s7671_s26  ;;  %v4843_v23 = vld [vmem:[%s9639_s1 + $0xd8] sm:$0xff] }
0x23c3   : > { %v6871_v25 = vpack.c.bf16 %v4843_v23, %v4842_v19 }
0x23c6   : > { %1773 = vrot.lane.b32.xlu1 %v8484_v35, %s7671_s26  ;;  %v4844_v35 = vld [vmem:[%s9639_s1 + $0xe0] sm:$0xff] }
0x23c8   : > { %6873 = vmatpush1.bf16.xpose.msk.msra.mxu0 %vm7769_vm2, %v6871_v25  ;;  %v8906_v25 = vld [vmem:[%s9642_s4 + $0x2] sm:$0x1] }
0x23c9   : > { %6874 = vmatprep.subr.bf16.mxu0 %v7666_v3 }
0x23ca   : > { %2009 = vrot.lane.b32.xlu1 %v8562_v56, %s7671_s26  ;;  %v4845_v56 = vld [vmem:[%s9639_s1 + $0xe8] sm:$0xff] }
0x23cb   : > { %v6875_v7 = vpack.c.bf16 %v4845_v56, %v4844_v35 }
0x23ce   : > { %2245 = vrot.lane.b32.xlu1 %v8621_v20, %s7671_s26 }
0x23d0   : > { %6877 = vmatpush1.bf16.xpose.msk.msra.mxu0 %vm7769_vm2, %v6875_v7 }
0x23d1   : > { %6878 = vmatprep.subr.bf16.mxu0 %v7666_v3 }
0x23d8   : > { %6881 = vmatpush1.bf16.xpose.msk.msra.mxu0 %vm7769_vm2, %v6879_v21  ;;  %v2398_v21 = vrot.slane %v7600_v15, %v8035_v16 }
0x23d9   : > { %6882 = vmatprep.subr.bf16.mxu0 %v7666_v3 }
0x23e0   : > { %6885 = vmatpush1.bf16.xpose.msk.msra.mxu0 %vm7769_vm2, %v6883_v33 }
0x23e1   : > { %6886 = vmatprep.subr.bf16.mxu0 %v7666_v3 }
0x23e8   : > { %6889 = vmatpush1.bf16.xpose.msk.msra.mxu0 %vm7769_vm2, %v6887_v36 }
0x23e9   : > { %6890 = vmatprep.subr.bf16.mxu0 %v7666_v3 }
0x23f0   : > { %6893 = vmatpush1.bf16.xpose.msk.msra.mxu0 %vm7769_vm2, %v6891_v55 }
0x23f1   : > { %6894 = vmatprep.subr.bf16.mxu0 %v7666_v3 }
0x23f8   : > { %6897 = vmatpush1.bf16.xpose.msk.msra.mxu0 %vm7769_vm2, %v6895_v22  ;;  %v2704_v22 = vrot.slane %v8762_v28, %v8035_v16 }
0x23f9   : > { %6898 = vmatprep.subr.bf16.mxu0 %v7666_v3 }
0x2400   : > { %6901 = vmatpush1.bf16.xpose.msk.msra.mxu0 %vm7769_vm2, %v6899_v44 }
0x2401   : > { %6902 = vmatprep.subr.bf16.mxu0 %v7666_v3 }
0x2408   : > { %6905 = vmatpush1.bf16.xpose.msk.msra.mxu0 %vm7769_vm2, %v6903_v45 }
0x2409   : > { %6906 = vmatprep.subr.bf16.mxu0 %v7666_v3 }
0x2410   : > { %6909 = vmatpush1.bf16.xpose.msk.msra.mxu0 %vm7769_vm2, %v6907_v18 }
0x2411   : > { %6910 = vmatprep.subr.bf16.mxu0 %v7666_v3 }
0x2418   : > { %6913 = vmatpush1.bf16.xpose.msk.msra.mxu0 %vm7769_vm2, %v6911_v54  ;;  %vm1540_vm2 = vcmask 523527  }
0x2419   : > { %6962 = vmatprep.subr.bf16.mxu0 %v7666_v3  ;;  %v2673_v35 = vpop.f32.mrb[18].mxu1 }
0x241a   : > { %v2674_v56 = vadd.f32 %v8906_v25, %v2673_v35  ;;  %v6028_v7 = vpop.f32.mrb[19].mxu1 }
0x241c   : > { %2685 = vrot.lane.b32.xlu1 %v2674_v56, %s7669_s19 }
0x2424   : > { %v2354_v63 = vpop.permute.xlu1 %2353 }
0x2425   : > { %v2356_v12 = vmul.f32 %v2354_v63, %v2351_v61 }
0x2427   : > { %v2359_v31 = vadd.f32 %v2358_v11, %v2356_v12 }
0x2428   : > { %v809_v5 = vpop.permute.xlu1 %808 }
0x2429   : > { %812 = vst.msk [vmem:[%s8051_s9] sm:$0x4] %vm811_vm10, %v809_v5  ;;  %2361 = vrot.lane.b32.xlu0 %v2359_v31, %s7671_s26  ;;  %vm4372_vm10 = vcmask 1042177  }
0x242a   : > { %2131 = vst.msk [vmem:[%s8051_s9] sm:$0x4] %vm2130_vm11, %v2128_v26  ;;  %vm3046_vm11 = vcmask 781827  }
0x242c   : > { %v1031_v10 = vpop.permute.xlu1 %1030 }
0x242d   : > { %1034 = vst.msk [vmem:[%s8051_s9] sm:$0x10] %vm1033_vm12, %v1031_v10  ;;  %vm4136_vm12 = vcmask 1044227  }
0x242e   : > { %1895 = vst.msk [vmem:[%s8051_s9] sm:$0x10] %vm1894_vm13, %v1892_v1  ;;  %vm3268_vm13 = vcmask 783877  }
0x2430   : > { %v1253_v20 = vpop.permute.xlu1 %1252 }
0x2431   : > { %1256 = vst.msk [vmem:[%s8051_s9] sm:$0x40] %vm1255_vm14, %v1253_v20  ;;  %vm3900_vm14 = vcmask 1046277  }
0x2432   : > { %1659 = vst.msk [vmem:[%s8051_s9] sm:$0x40] %vm1658_vm15, %v1656_v58  ;;  %vm3490_vm15 = vcmask 785927  }
0x2434   : > { %v1538_v29 = vpop.permute.xlu1 %1537 }
0x2435   : > { %1541 = vst.msk [vmem:[%s8051_s9] sm:$0x80] %vm1540_vm2, %v1538_v29  ;;  %vm3664_vm2 = vcmask 1048327  }
0x2438   : > { %v1774_v52 = vpop.permute.xlu1 %1773 }
0x2439   : > { %1777 = vst.msk [vmem:[%s8051_s9] sm:$0x20] %vm1776_vm5, %v1774_v52  ;;  %vm3782_vm5 = vcmask 1047302  }
0x243c   : > { %v2010_v13 = vpop.permute.xlu1 %2009 }
0x243d   : > { %2013 = vst.msk [vmem:[%s8051_s9] sm:$0x8] %vm2012_vm6, %v2010_v13  ;;  %vm4018_vm6 = vcmask 1045252  }
0x2440   : > { %v2246_v19 = vpop.permute.xlu1 %2245 }
0x2441   : > { %2249 = vst.msk [vmem:[%s8051_s9] sm:$0x2] %vm2248_vm7, %v2246_v19  ;;  %vm4254_vm7 = vcmask 1043202  }
0x248e   : > { %v2686_v55 = vpop.permute.xlu1 %2685 }
0x249b   : > { %v2362_v23 = vpop.permute.xlu0 %2361 }
0x249c   : > { %2365 = vst.msk [vmem:[%s8051_s9] sm:$0x1] %vm2364_vm8, %v2362_v23  ;;  %vm4488_vm8 = vcmask 1041152  }
0x24a3   : > { %v2366_v4 = vld [vmem:[%s8051_s9] sm:$0xff] }
0x24a4   : > { %4889 = vmatmul.mubr.msk.f32.vlgmr.msra.gmra.mrb[16].mxu0 %vm284_vm0, %v2366_v4  ;;  %vm2714_vm0 = vcmask 778752  }
0x24a5   : > { %6965 = vmatpush3.bf16.xpose.msk.msra.mxu0 %vm7780_vm3, %v8664_v48  ;;  %6080 = vmatprep.mubr.msk.f32.mxu0 %vm7667_vm4, %v7668_v9 }
0x24a6   : > { %6966 = vmatprep.subr.bf16.mxu0 %v7666_v3 }
0x24ad   : > { %6969 = vmatpush3.bf16.xpose.msk.msra.mxu0 %vm7780_vm3, %v8676_v50 }
0x24ae   : > { %6970 = vmatprep.subr.bf16.mxu0 %v7666_v3 }
0x24b5   : > { %6973 = vmatpush3.bf16.xpose.msk.msra.mxu0 %vm7780_vm3, %v8689_v62 }
0x24b6   : > { %6974 = vmatprep.subr.bf16.mxu0 %v7666_v3 }
0x24bd   : > { %6977 = vmatpush3.bf16.xpose.msk.msra.mxu0 %vm7780_vm3, %v8702_v0 }
0x24be   : > { %6978 = vmatprep.subr.bf16.mxu0 %v7666_v3 }
0x24c5   : > { %6981 = vmatpush3.bf16.xpose.msk.msra.mxu0 %vm7780_vm3, %v8718_v6 }
0x24c6   : > { %6982 = vmatprep.subr.bf16.mxu0 %v7666_v3 }
0x24cd   : > { %6985 = vmatpush3.bf16.xpose.msk.msra.mxu0 %vm7780_vm3, %v8740_v17 }
0x24ce   : > { %7010 = vmatprep.subr.bf16.mxu0 %v7666_v3 }
0x2577   : > { %v2546_v30 = vpop.f32.mrb[16].mxu0 }
0x2578   : > { %v8942_v27 = vadd.f32 %v2546_v30, %v2398_v21  ;;  %v2548_v33 = vpop.f32.mrb[17].mxu0 }
0x2579   : > { %v8945_v34 = vadd.f32 %v2548_v33, %v8024_v2 }
0x257a   : > { %v2677_v60 = vadd.f32 %v2674_v56, %v8942_v27 }
0x257c   : > { %v4917_v36 = vmul.f32 -1.442695, %v2677_v60 }
0x257e   : > { %7471 = vpow2.f32 %v4917_v36 }
0x2588   : > { %v7472_v37 = vpop.eup %7471 }
0x2589   : > { %v2681_v39 = vadd.f32 1.0, %v7472_v37 }
0x258b   : > { %7473 = vrcp.f32 %v2681_v39 }
0x2595   : > { %v7474_v38 = vpop.eup %7473 }
0x2596   : > { %v2688_v46 = vmul.f32 %v7474_v38, %v2686_v55  ;;  %v2695_v44 = vsub.f32 1.0, %v7474_v38 }
0x2598   : > { %2690 = vrot.lane.b32.xlu0 %v2688_v46, %s7669_s19 }
0x259c   : > { %2705 = vrot.lane.b32.xlu0 %v2704_v22, %s7671_s26 }
0x260a   : > { %v2691_v41 = vpop.permute.xlu0 %2690 }
0x260b   : > { %v2693_v2 = vadd.f32 %v2691_v41, %v8942_v27 }
0x260d   : > { %7475 = vtanh.f32 %v2693_v2 }
0x260e   : > { %v2706_v43 = vpop.permute.xlu0 %2705 }
0x260f   : > { %v2708_v14 = vmul.f32 %v7474_v38, %v2706_v43 }
0x2617   : > { %v7476_v42 = vpop.eup %7475 }
0x2618   : > { %2697 = vrot.lane.b32.xlu1 %v7476_v42, %s7670_s20 }
0x268a   : > { %v2698_v51 = vpop.permute.xlu1 %2697 }
0x268b   : > { %v2700_v40 = vmul.f32 %v2698_v51, %v2695_v44 }
0x268d   : > { %v8954_v45 = vadd.f32 %v2708_v14, %v2700_v40 }
0x268f   : > { %2716 = vrot.lane.b32.xlu1 %v8954_v45, %s7670_s20  ;;  %v2816_v31 = vrot.slane %v8954_v45, 7 }
0x2701   : > { %v2717_v28 = vpop.permute.xlu1 %2716 }
0x2702   : > { %6054 = vmatmul.mubr.msk.f32.vlgmr.msra.gmra.mrb[20].mxu1 %vm445_vm1, %v2717_v28 }
0x2703   : > { %6989 = vmatpush3.bf16.xpose.msk.msra.mxu1 %vm7780_vm3, %v8664_v48  ;;  %6107 = vmatprep.mubr.msk.f32.mxu1 %vm7667_vm4, %v7668_v9 }
0x2704   : > { %6990 = vmatprep.subr.bf16.mxu1 %v7666_v3 }
0x270b   : > { %6993 = vmatpush3.bf16.xpose.msk.msra.mxu1 %vm7780_vm3, %v8676_v50 }
0x270c   : > { %6994 = vmatprep.subr.bf16.mxu1 %v7666_v3 }
0x2713   : > { %6997 = vmatpush3.bf16.xpose.msk.msra.mxu1 %vm7780_vm3, %v8689_v62 }
0x2714   : > { %6998 = vmatprep.subr.bf16.mxu1 %v7666_v3 }
0x271b   : > { %7001 = vmatpush3.bf16.xpose.msk.msra.mxu1 %vm7780_vm3, %v8702_v0 }
0x271c   : > { %7002 = vmatprep.subr.bf16.mxu1 %v7666_v3 }
0x2723   : > { %7005 = vmatpush3.bf16.xpose.msk.msra.mxu1 %vm7780_vm3, %v8718_v6 }
0x2724   : > { %7006 = vmatprep.subr.bf16.mxu1 %v7666_v3 }
0x272b   : > { %7009 = vmatpush3.bf16.xpose.msk.msra.mxu1 %vm7780_vm3, %v8740_v17 }
0x272c   : > { %7034 = vmatprep.subr.bf16.mxu1 %v7666_v3 }
0x27d5   : > { %v2786_v47 = vpop.f32.mrb[20].mxu1 }
0x27d6   : > { %v2787_v24 = vadd.f32 %v8906_v25, %v2786_v47  ;;  %v6055_v32 = vpop.f32.mrb[21].mxu1 }
0x27d8   : > { %v2791_v18 = vrot.slane %v2787_v24, 7 }
0x27da   : > { %2800 = vrot.lane.b32.xlu0 %v2791_v18, %s7669_s19  ;;  %v2793_v49 = vadd.f32 %v2791_v18, %v8942_v27 }
0x27dc   : > { %v4931_v53 = vmul.f32 -1.442695, %v2793_v49 }
0x27de   : > { %7477 = vpow2.f32 %v4931_v53 }
0x27e8   : > { %v7478_v57 = vpop.eup %7477 }
0x27e9   : > { %v2797_v54 = vadd.f32 1.0, %v7478_v57 }
0x27eb   : > { %7479 = vrcp.f32 %v2797_v54 }
0x27f5   : > { %v7480_v58 = vpop.eup %7479 }
0x27f6   : > { %v2810_v12 = vsub.f32 1.0, %v7480_v58  ;;  %v2818_v10 = vmul.f32 %v7480_v58, %v2816_v31 }
0x284c   : > { %v2801_v59 = vpop.permute.xlu0 %2800 }
0x284d   : > { %v2803_v1 = vmul.f32 %v7480_v58, %v2801_v59 }
0x284f   : > { %2805 = vrot.lane.b32.xlu1 %v2803_v1, %s7669_s19 }
0x28c1   : > { %v2806_v61 = vpop.permute.xlu1 %2805 }
0x28c2   : > { %v2808_v63 = vadd.f32 %v2806_v61, %v8942_v27 }
0x28c4   : > { %7481 = vtanh.f32 %v2808_v63 }
0x28ce   : > { %v7482_v11 = vpop.eup %7481 }
0x28cf   : > { %2812 = vrot.lane.b32.xlu0 %v7482_v11, %s7670_s20 }
0x2941   : > { %v2813_v5 = vpop.permute.xlu0 %2812 }
0x2942   : > { %v2815_v26 = vmul.f32 %v2813_v5, %v2810_v12 }
0x2944   : > { %v8992_v20 = vadd.f32 %v2818_v10, %v2815_v26 }
0x2946   : > { %v2826_v29 = vrot.slane %v8992_v20, 1  ;;  %v2927_v55 = vrot.slane %v8992_v20, 7 }
0x2948   : > { %2827 = vrot.lane.b32.xlu1 %v2826_v29, %s7670_s20 }
0x29ba   : > { %v2828_v52 = vpop.permute.xlu1 %2827 }
0x29bb   : > { %6081 = vmatmul.mubr.msk.f32.vlgmr.msra.gmra.mrb[18].mxu0 %vm445_vm1, %v2828_v52 }
0x29bc   : > { %7013 = vmatpush3.bf16.xpose.msk.msra.mxu0 %vm7780_vm3, %v8664_v48  ;;  %6134 = vmatprep.mubr.msk.f32.mxu0 %vm7667_vm4, %v7668_v9 }
0x29bd   : > { %7014 = vmatprep.subr.bf16.mxu0 %v7666_v3 }
0x29c4   : > { %7017 = vmatpush3.bf16.xpose.msk.msra.mxu0 %vm7780_vm3, %v8676_v50 }
0x29c5   : > { %7018 = vmatprep.subr.bf16.mxu0 %v7666_v3 }
0x29cc   : > { %7021 = vmatpush3.bf16.xpose.msk.msra.mxu0 %vm7780_vm3, %v8689_v62 }
0x29cd   : > { %7022 = vmatprep.subr.bf16.mxu0 %v7666_v3 }
0x29d4   : > { %7025 = vmatpush3.bf16.xpose.msk.msra.mxu0 %vm7780_vm3, %v8702_v0 }
0x29d5   : > { %7026 = vmatprep.subr.bf16.mxu0 %v7666_v3 }
0x29dc   : > { %7029 = vmatpush3.bf16.xpose.msk.msra.mxu0 %vm7780_vm3, %v8718_v6 }
0x29dd   : > { %7030 = vmatprep.subr.bf16.mxu0 %v7666_v3 }
0x29e4   : > { %7033 = vmatpush3.bf16.xpose.msk.msra.mxu0 %vm7780_vm3, %v8740_v17 }
0x29e5   : > { %7058 = vmatprep.subr.bf16.mxu0 %v7666_v3 }
0x2a8e   : > { %v2897_v13 = vpop.f32.mrb[18].mxu0 }
0x2a8f   : > { %v2898_v19 = vadd.f32 %v8906_v25, %v2897_v13  ;;  %v6082_v23 = vpop.f32.mrb[19].mxu0 }
0x2a91   : > { %v2902_v35 = vrot.slane %v2898_v19, 6 }
0x2a93   : > { %2911 = vrot.lane.b32.xlu0 %v2902_v35, %s7669_s19  ;;  %v2904_v56 = vadd.f32 %v2902_v35, %v8942_v27 }
0x2a95   : > { %v4945_v7 = vmul.f32 -1.442695, %v2904_v56 }
0x2a97   : > { %7483 = vpow2.f32 %v4945_v7 }
0x2aa1   : > { %v7484_v4 = vpop.eup %7483 }
0x2aa2   : > { %v2908_v15 = vadd.f32 1.0, %v7484_v4 }
0x2aa4   : > { %7485 = vrcp.f32 %v2908_v15 }
0x2aae   : > { %v7486_v21 = vpop.eup %7485 }
0x2aaf   : > { %v2921_v39 = vsub.f32 1.0, %v7486_v21  ;;  %v2929_v46 = vmul.f32 %v7486_v21, %v2927_v55 }
0x2b05   : > { %v2912_v30 = vpop.permute.xlu0 %2911 }
0x2b06   : > { %v2914_v33 = vmul.f32 %v7486_v21, %v2912_v30 }
0x2b08   : > { %2916 = vrot.lane.b32.xlu1 %v2914_v33, %s7669_s19 }
0x2b7a   : > { %v2917_v60 = vpop.permute.xlu1 %2916 }
0x2b7b   : > { %v2919_v36 = vadd.f32 %v2917_v60, %v8942_v27 }
0x2b7d   : > { %7487 = vtanh.f32 %v2919_v36 }
0x2b87   : > { %v7488_v37 = vpop.eup %7487 }
0x2b88   : > { %2923 = vrot.lane.b32.xlu0 %v7488_v37, %s7670_s20 }
0x2bfa   : > { %v2924_v38 = vpop.permute.xlu0 %2923 }
0x2bfb   : > { %v2926_v22 = vmul.f32 %v2924_v38, %v2921_v39 }
0x2bfd   : > { %v9030_v41 = vadd.f32 %v2929_v46, %v2926_v22 }
0x2bff   : > { %v2937_v2 = vrot.slane %v9030_v41, 2  ;;  %v3038_v59 = vrot.slane %v9030_v41, 7 }
0x2c01   : > { %2938 = vrot.lane.b32.xlu1 %v2937_v2, %s7670_s20 }
0x2c73   : > { %v2939_v42 = vpop.permute.xlu1 %2938 }
0x2c74   : > { %6108 = vmatmul.mubr.msk.f32.vlgmr.msra.gmra.mrb[22].mxu1 %vm445_vm1, %v2939_v42 }
0x2c75   : > { %7037 = vmatpush3.bf16.xpose.msk.msra.mxu1 %vm7780_vm3, %v8664_v48  ;;  %6161 = vmatprep.mubr.msk.f32.mxu1 %vm7667_vm4, %v7668_v9 }
0x2c76   : > { %7038 = vmatprep.subr.bf16.mxu1 %v7666_v3 }
0x2c7d   : > { %7041 = vmatpush3.bf16.xpose.msk.msra.mxu1 %vm7780_vm3, %v8676_v50 }
0x2c7e   : > { %7042 = vmatprep.subr.bf16.mxu1 %v7666_v3 }
0x2c85   : > { %7045 = vmatpush3.bf16.xpose.msk.msra.mxu1 %vm7780_vm3, %v8689_v62 }
0x2c86   : > { %7046 = vmatprep.subr.bf16.mxu1 %v7666_v3 }
0x2c8d   : > { %7049 = vmatpush3.bf16.xpose.msk.msra.mxu1 %vm7780_vm3, %v8702_v0 }
0x2c8e   : > { %7050 = vmatprep.subr.bf16.mxu1 %v7666_v3 }
0x2c95   : > { %7053 = vmatpush3.bf16.xpose.msk.msra.mxu1 %vm7780_vm3, %v8718_v6 }
0x2c96   : > { %7054 = vmatprep.subr.bf16.mxu1 %v7666_v3 }
0x2c9d   : > { %7057 = vmatpush3.bf16.xpose.msk.msra.mxu1 %vm7780_vm3, %v8740_v17 }
0x2c9e   : > { %7082 = vmatprep.subr.bf16.mxu1 %v7666_v3 }
0x2d47   : > { %v3008_v43 = vpop.f32.mrb[22].mxu1 }
0x2d48   : > { %v3009_v44 = vadd.f32 %v8906_v25, %v3008_v43  ;;  %v6109_v51 = vpop.f32.mrb[23].mxu1 }
0x2d4a   : > { %v3013_v14 = vrot.slane %v3009_v44, 5 }
0x2d4c   : > { %3022 = vrot.lane.b32.xlu0 %v3013_v14, %s7669_s19  ;;  %v3015_v40 = vadd.f32 %v3013_v14, %v8942_v27 }
0x2d4e   : > { %v4959_v28 = vmul.f32 -1.442695, %v3015_v40 }
0x2d50   : > { %7489 = vpow2.f32 %v4959_v28 }
0x2d5a   : > { %v7490_v47 = vpop.eup %7489 }
0x2d5b   : > { %v3019_v24 = vadd.f32 1.0, %v7490_v47 }
0x2d5d   : > { %7491 = vrcp.f32 %v3019_v24 }
0x2d67   : > { %v7492_v32 = vpop.eup %7491 }
0x2d68   : > { %v3032_v58 = vsub.f32 1.0, %v7492_v32  ;;  %v3040_v61 = vmul.f32 %v7492_v32, %v3038_v59  ;;  %v5018_v59 = vld [vmem:[%s9640_s2 + $0x130] sm:$0xff] }
0x2dbe   : > { %v3023_v18 = vpop.permute.xlu0 %3022 }
0x2dbf   : > { %v3025_v49 = vmul.f32 %v7492_v32, %v3023_v18 }
0x2dc1   : > { %3027 = vrot.lane.b32.xlu1 %v3025_v49, %s7669_s19 }
0x2e33   : > { %v3028_v53 = vpop.permute.xlu1 %3027 }
0x2e34   : > { %v3030_v57 = vadd.f32 %v3028_v53, %v8942_v27  ;;  %v5016_v53 = vld [vmem:[%s9640_s2 + $0x120] sm:$0xff] }
0x2e36   : > { %7493 = vtanh.f32 %v3030_v57  ;;  %v5017_v57 = vld [vmem:[%s9640_s2 + $0x128] sm:$0xff] }
0x2e40   : > { %v7494_v54 = vpop.eup %7493 }
0x2e41   : > { %3034 = vrot.lane.b32.xlu0 %v7494_v54, %s7670_s20  ;;  %v9154_v54 = vpack.c.bf16 %v5017_v57, %v5016_v53 }
0x2eb3   : > { %v3035_v1 = vpop.permute.xlu0 %3034 }
0x2eb4   : > { %v3037_v63 = vmul.f32 %v3035_v1, %v3032_v58  ;;  %v5019_v1 = vld [vmem:[%s9640_s2 + $0x138] sm:$0xff] }
0x2eb6   : > { %v9068_v11 = vadd.f32 %v3040_v61, %v3037_v63  ;;  %v9169_v61 = vpack.c.bf16 %v5019_v1, %v5018_v59  ;;  %v5020_v63 = vld [vmem:[%s9640_s2 + $0x140] sm:$0xff] }
0x2eb8   : > { %v3048_v12 = vrot.slane %v9068_v11, 3  ;;  %v3149_v33 = vrot.slane %v9068_v11, 7 }
0x2eba   : > { %3049 = vrot.lane.b32.xlu1 %v3048_v12, %s7670_s20  ;;  %v5021_v12 = vld [vmem:[%s9640_s2 + $0x148] sm:$0xff] }
0x2f2c   : > { %v3050_v31 = vpop.permute.xlu1 %3049 }
0x2f2d   : > { %6135 = vmatmul.mubr.msk.f32.vlgmr.msra.gmra.mrb[20].mxu0 %vm445_vm1, %v3050_v31  ;;  %v9181_v31 = vpack.c.bf16 %v5021_v12, %v5020_v63 }
0x2f2e   : > { %7061 = vmatpush3.bf16.xpose.msk.msra.mxu0 %vm7780_vm3, %v8664_v48  ;;  %6188 = vmatprep.mubr.msk.f32.mxu0 %vm7667_vm4, %v7668_v9 }
0x2f2f   : > { %7062 = vmatprep.subr.bf16.mxu0 %v7666_v3 }
0x2f36   : > { %7065 = vmatpush3.bf16.xpose.msk.msra.mxu0 %vm7780_vm3, %v8676_v50 }
0x2f37   : > { %7066 = vmatprep.subr.bf16.mxu0 %v7666_v3 }
0x2f3e   : > { %7069 = vmatpush3.bf16.xpose.msk.msra.mxu0 %vm7780_vm3, %v8689_v62 }
0x2f3f   : > { %7070 = vmatprep.subr.bf16.mxu0 %v7666_v3 }
0x2f46   : > { %7073 = vmatpush3.bf16.xpose.msk.msra.mxu0 %vm7780_vm3, %v8702_v0 }
0x2f47   : > { %7074 = vmatprep.subr.bf16.mxu0 %v7666_v3 }
0x2f4e   : > { %7077 = vmatpush3.bf16.xpose.msk.msra.mxu0 %vm7780_vm3, %v8718_v6 }
0x2f4f   : > { %7078 = vmatprep.subr.bf16.mxu0 %v7666_v3 }
0x2f56   : > { %7081 = vmatpush3.bf16.xpose.msk.msra.mxu0 %vm7780_vm3, %v8740_v17 }
0x2f57   : > { %7106 = vmatprep.subr.bf16.mxu0 %v7666_v3 }
0x3000   : > { %v3119_v5 = vpop.f32.mrb[20].mxu0 }
0x3001   : > { %v3120_v26 = vadd.f32 %v8906_v25, %v3119_v5  ;;  %v6136_v10 = vpop.f32.mrb[21].mxu0  ;;  %v5022_v5 = vld [vmem:[%s9640_s2 + $0x150] sm:$0xff] }
0x3003   : > { %v3124_v29 = vrot.slane %v3120_v26, 4  ;;  %v5023_v26 = vld [vmem:[%s9640_s2 + $0x158] sm:$0xff] }
0x3004   : > { %v9193_v10 = vpack.c.bf16 %v5023_v26, %v5022_v5 }
0x3005   : > { %3133 = vrot.lane.b32.xlu0 %v3124_v29, %s7669_s19  ;;  %v3126_v52 = vadd.f32 %v3124_v29, %v8942_v27  ;;  %v5024_v29 = vld [vmem:[%s9640_s2 + $0x160] sm:$0xff] }
0x3007   : > { %v4973_v13 = vmul.f32 -1.442695, %v3126_v52  ;;  %v5025_v52 = vld [vmem:[%s9640_s2 + $0x168] sm:$0xff] }
0x3009   : > { %7495 = vpow2.f32 %v4973_v13  ;;  %v9205_v13 = vpack.c.bf16 %v5025_v52, %v5024_v29 }
0x3013   : > { %v7496_v19 = vpop.eup %7495 }
0x3014   : > { %v3130_v23 = vadd.f32 1.0, %v7496_v19  ;;  %v5026_v19 = vld [vmem:[%s9640_s2 + $0x170] sm:$0xff] }
0x3016   : > { %7497 = vrcp.f32 %v3130_v23  ;;  %v5027_v23 = vld [vmem:[%s9640_s2 + $0x178] sm:$0xff] }
0x3020   : > { %v7498_v35 = vpop.eup %7497 }
0x3021   : > { %v3143_v30 = vsub.f32 1.0, %v7498_v35  ;;  %v3151_v36 = vmul.f32 %v7498_v35, %v3149_v33 }
0x3077   : > { %v3134_v56 = vpop.permute.xlu0 %3133 }
0x3078   : > { %v3136_v7 = vmul.f32 %v7498_v35, %v3134_v56  ;;  %v9217_v35 = vpack.c.bf16 %v5027_v23, %v5026_v19  ;;  %v9226_v56 = vld [vmem:[%s9643_s5 + $0x3] sm:$0x1] }
0x307a   : > { %3138 = vrot.lane.b32.xlu1 %v3136_v7, %s7669_s19 }
0x30ec   : > { %v3139_v4 = vpop.permute.xlu1 %3138 }
0x30ed   : > { %v3141_v15 = vadd.f32 %v3139_v4, %v8942_v27 }
0x30ef   : > { %7499 = vtanh.f32 %v3141_v15 }
0x30f9   : > { %v7500_v21 = vpop.eup %7499 }
0x30fa   : > { %3145 = vrot.lane.b32.xlu0 %v7500_v21, %s7670_s20 }
0x316c   : > { %v3146_v60 = vpop.permute.xlu0 %3145 }
0x316d   : > { %v3148_v37 = vmul.f32 %v3146_v60, %v3143_v30  ;;  %v9261_v30 = vld [vmem:[%s9642_s4 + $0x3] sm:$0x1] }
0x316f   : > { %v9106_v39 = vadd.f32 %v3151_v36, %v3148_v37 }
0x3171   : > { %v3159_v55 = vrot.slane %v9106_v39, 4  ;;  %v3260_v28 = vrot.slane %v9106_v39, 7 }
0x3173   : > { %3160 = vrot.lane.b32.xlu1 %v3159_v55, %s7670_s20 }
0x31e5   : > { %v3161_v38 = vpop.permute.xlu1 %3160 }
0x31e6   : > { %6162 = vmatmul.mubr.msk.f32.vlgmr.msra.gmra.mrb[24].mxu1 %vm445_vm1, %v3161_v38 }
0x31e7   : > { %7085 = vmatpush3.bf16.xpose.msk.msra.mxu1 %vm7780_vm3, %v8664_v48  ;;  %6215 = vmatprep.mubr.msk.f32.mxu1 %vm7667_vm4, %v7668_v9 }
0x31e8   : > { %7086 = vmatprep.subr.bf16.mxu1 %v7666_v3 }
0x31ef   : > { %7089 = vmatpush3.bf16.xpose.msk.msra.mxu1 %vm7780_vm3, %v8676_v50 }
0x31f0   : > { %7090 = vmatprep.subr.bf16.mxu1 %v7666_v3 }
0x31f7   : > { %7093 = vmatpush3.bf16.xpose.msk.msra.mxu1 %vm7780_vm3, %v8689_v62 }
0x31f8   : > { %7094 = vmatprep.subr.bf16.mxu1 %v7666_v3 }
0x31ff   : > { %7097 = vmatpush3.bf16.xpose.msk.msra.mxu1 %vm7780_vm3, %v8702_v0 }
0x3200   : > { %7098 = vmatprep.subr.bf16.mxu1 %v7666_v3 }
0x3207   : > { %7101 = vmatpush3.bf16.xpose.msk.msra.mxu1 %vm7780_vm3, %v8718_v6 }
0x3208   : > { %7102 = vmatprep.subr.bf16.mxu1 %v7666_v3 }
0x320f   : > { %7105 = vmatpush3.bf16.xpose.msk.msra.mxu1 %vm7780_vm3, %v8740_v17 }
0x3210   : > { %7130 = vmatprep.subr.bf16.mxu1 %v7666_v3 }
0x32b9   : > { %v3230_v48 = vpop.f32.mrb[24].mxu1 }
0x32ba   : > { %v3231_v50 = vadd.f32 %v8906_v25, %v3230_v48  ;;  %v6163_v62 = vpop.f32.mrb[25].mxu1 }
0x32bc   : > { %v3235_v46 = vrot.slane %v3231_v50, 3 }
0x32be   : > { %3244 = vrot.lane.b32.xlu0 %v3235_v46, %s7669_s19  ;;  %v3237_v0 = vadd.f32 %v3235_v46, %v8942_v27 }
0x32c0   : > { %v4987_v22 = vmul.f32 -1.442695, %v3237_v0 }
0x32c2   : > { %7501 = vpow2.f32 %v4987_v22 }
0x32cc   : > { %v7502_v6 = vpop.eup %7501 }
0x32cd   : > { %v3241_v2 = vadd.f32 1.0, %v7502_v6 }
0x32cf   : > { %7503 = vrcp.f32 %v3241_v2 }
0x32d9   : > { %v7504_v42 = vpop.eup %7503 }
0x32da   : > { %v3254_v40 = vsub.f32 1.0, %v7504_v42  ;;  %v3262_v24 = vmul.f32 %v7504_v42, %v3260_v28 }
0x3330   : > { %v3245_v43 = vpop.permute.xlu0 %3244 }
0x3331   : > { %v3247_v44 = vmul.f32 %v7504_v42, %v3245_v43 }
0x3333   : > { %3249 = vrot.lane.b32.xlu1 %v3247_v44, %s7669_s19 }
0x33a5   : > { %v3250_v17 = vpop.permute.xlu1 %3249 }
0x33a6   : > { %v3252_v51 = vadd.f32 %v3250_v17, %v8942_v27 }
0x33a8   : > { %7505 = vtanh.f32 %v3252_v51 }
0x33b2   : > { %v7506_v14 = vpop.eup %7505 }
0x33b3   : > { %3256 = vrot.lane.b32.xlu0 %v7506_v14, %s7670_s20 }
0x3425   : > { %v3257_v47 = vpop.permute.xlu0 %3256 }
0x3426   : > { %v3259_v32 = vmul.f32 %v3257_v47, %v3254_v40 }
0x3428   : > { %v9144_v18 = vadd.f32 %v3262_v24, %v3259_v32 }
0x342a   : > { %v3270_v49 = vrot.slane %v9144_v18, 5  ;;  %v3371_v32 = vrot.slane %v9144_v18, 7 }
0x342c   : > { %3271 = vrot.lane.b32.xlu1 %v3270_v49, %s7670_s20 }
0x349e   : > { %v3272_v58 = vpop.permute.xlu1 %3271 }
0x349f   : > { %6189 = vmatmul.mubr.msk.f32.vlgmr.msra.gmra.mrb[22].mxu0 %vm445_vm1, %v3272_v58 }
0x34a0   : > { %7109 = vmatpush3.bf16.xpose.msk.msra.mxu0 %vm7780_vm3, %v9154_v54  ;;  %6242 = vmatprep.mubr.msk.f32.mxu0 %vm7667_vm4, %v7668_v9 }
0x34a1   : > { %7110 = vmatprep.subr.bf16.mxu0 %v7666_v3 }
0x34a8   : > { %7113 = vmatpush3.bf16.xpose.msk.msra.mxu0 %vm7780_vm3, %v9169_v61 }
0x34a9   : > { %7114 = vmatprep.subr.bf16.mxu0 %v7666_v3 }
0x34b0   : > { %7117 = vmatpush3.bf16.xpose.msk.msra.mxu0 %vm7780_vm3, %v9181_v31 }
0x34b1   : > { %7118 = vmatprep.subr.bf16.mxu0 %v7666_v3 }
0x34b8   : > { %7121 = vmatpush3.bf16.xpose.msk.msra.mxu0 %vm7780_vm3, %v9193_v10 }
0x34b9   : > { %7122 = vmatprep.subr.bf16.mxu0 %v7666_v3 }
0x34c0   : > { %7125 = vmatpush3.bf16.xpose.msk.msra.mxu0 %vm7780_vm3, %v9205_v13 }
0x34c1   : > { %7126 = vmatprep.subr.bf16.mxu0 %v7666_v3 }
0x34c8   : > { %7129 = vmatpush3.bf16.xpose.msk.msra.mxu0 %vm7780_vm3, %v9217_v35 }
0x34c9   : > { %7154 = vmatprep.subr.bf16.mxu0 %v7666_v3 }
0x34cf   : > { %6243 = vmatmul.mubr.msk.f32.vlgmr.msra.gmra.mrb[24].mxu0 %vm445_vm1, %v9226_v56 }
0x34d0   : > { %7157 = vmatpush3.bf16.xpose.msk.msra.mxu0 %vm7780_vm3, %v9154_v54  ;;  %6296 = vmatprep.mubr.msk.f32.mxu0 %vm7667_vm4, %v7668_v9 }
0x34d1   : > { %7158 = vmatprep.subr.bf16.mxu0 %v7666_v3 }
0x34d8   : > { %7161 = vmatpush3.bf16.xpose.msk.msra.mxu0 %vm7780_vm3, %v9169_v61 }
0x34d9   : > { %7162 = vmatprep.subr.bf16.mxu0 %v7666_v3 }
0x34e0   : > { %7165 = vmatpush3.bf16.xpose.msk.msra.mxu0 %vm7780_vm3, %v9181_v31 }
0x34e1   : > { %7166 = vmatprep.subr.bf16.mxu0 %v7666_v3 }
0x34e8   : > { %7169 = vmatpush3.bf16.xpose.msk.msra.mxu0 %vm7780_vm3, %v9193_v10 }
0x34e9   : > { %7170 = vmatprep.subr.bf16.mxu0 %v7666_v3 }
0x34f0   : > { %7173 = vmatpush3.bf16.xpose.msk.msra.mxu0 %vm7780_vm3, %v9205_v13 }
0x34f1   : > { %7174 = vmatprep.subr.bf16.mxu0 %v7666_v3 }
0x34f8   : > { %7177 = vmatpush3.bf16.xpose.msk.msra.mxu0 %vm7780_vm3, %v9217_v35 }
0x34f9   : > { %7202 = vmatprep.subr.bf16.mxu0 %v7666_v3 }
0x3572   : > { %v3341_v7 = vpop.f32.mrb[22].mxu0 }
0x3573   : > { %v3342_v4 = vadd.f32 %v8906_v25, %v3341_v7  ;;  %v6190_v15 = vpop.f32.mrb[23].mxu0  ;;  %v3656_v7 = vrot.slane %v9226_v56, %v8035_v16 }
0x3575   : > { %v3346_v21 = vrot.slane %v3342_v4, 2 }
0x3577   : > { %3355 = vrot.lane.b32.xlu0 %v3346_v21, %s7669_s19  ;;  %v3348_v55 = vadd.f32 %v3346_v21, %v8942_v27 }
0x3579   : > { %v5001_v38 = vmul.f32 -1.442695, %v3348_v55 }
0x357b   : > { %7507 = vpow2.f32 %v5001_v38 }
0x3585   : > { %v7508_v25 = vpop.eup %7507 }
0x3586   : > { %v3352_v48 = vadd.f32 1.0, %v7508_v25 }
0x3588   : > { %7509 = vrcp.f32 %v3352_v48 }
0x3592   : > { %v7510_v50 = vpop.eup %7509 }
0x3593   : > { %v3365_v24 = vsub.f32 1.0, %v7510_v50  ;;  %v3373_v53 = vmul.f32 %v7510_v50, %v3371_v32 }
0x35a2   : > { %v3614_v33 = vpop.f32.mrb[24].mxu0 }
0x35a3   : > { %v3615_v60 = vadd.f32 %v9261_v30, %v3614_v33  ;;  %v6244_v36 = vpop.f32.mrb[25].mxu0 }
0x35a5   : > { %v3619_v37 = vrot.slane %v3615_v60, 1 }
0x35a7   : > { %3620 = vrot.lane.b32.xlu0 %v3619_v37, %s7670_s20 }
0x35e9   : > { %v3356_v62 = vpop.permute.xlu0 %3355 }
0x35ea   : > { %v3358_v46 = vmul.f32 %v7510_v50, %v3356_v62 }
0x35ec   : > { %3360 = vrot.lane.b32.xlu1 %v3358_v46, %s7669_s19 }
0x35f0   : > { %3637 = vrot.lane.b32.xlu1 %v3619_v37, %s7671_s26 }
0x3619   : > { %v3621_v0 = vpop.permute.xlu0 %3620 }
0x361a   : > { %v3623_v22 = vadd.f32 %v3621_v0, %v8942_v27  ;;  %v3630_v63 = vadd.f32 %v3621_v0, %v8945_v34 }
0x361c   : > { %v5043_v6 = vmul.f32 -1.442695, %v3623_v22  ;;  %v5044_v5 = vmul.f32 -1.442695, %v3630_v63 }
0x361e   : > { %7511 = vpow2.f32 %v5043_v6 }
0x3628   : > { %v7512_v2 = vpop.eup %7511 }
0x3629   : > { %v3627_v42 = vadd.f32 1.0, %v7512_v2 }
0x362b   : > { %7513 = vrcp.f32 %v3627_v42 }
0x3635   : > { %v7514_v17 = vpop.eup %7513 }
0x365e   : > { %v3361_v43 = vpop.permute.xlu1 %3360 }
0x365f   : > { %v3363_v44 = vadd.f32 %v3361_v43, %v8942_v27 }
0x3661   : > { %7515 = vtanh.f32 %v3363_v44 }
0x3662   : > { %v3638_v51 = vpop.permute.xlu1 %3637 }
0x3663   : > { %v3640_v14 = vmul.f32 %v7514_v17, %v3638_v51 }
0x3665   : > { %3642 = vrot.lane.b32.xlu1 %v3640_v14, %s7669_s19 }
0x366b   : > { %v7516_v40 = vpop.eup %7515 }
0x366c   : > { %3367 = vrot.lane.b32.xlu0 %v7516_v40, %s7670_s20 }
0x36d7   : > { %v3643_v28 = vpop.permute.xlu1 %3642 }
0x36d8   : > { %v3645_v47 = vadd.f32 %v3643_v28, %v8945_v34 }
0x36da   : > { %7517 = vtanh.f32 %v3645_v47 }
0x36db   : > { %7519 = vpow2.f32 %v5044_v5 }
0x36de   : > { %v3368_v49 = vpop.permute.xlu0 %3367 }
0x36df   : > { %v3370_v57 = vmul.f32 %v3368_v49, %v3365_v24 }
0x36e1   : > { %v9274_v58 = vadd.f32 %v3373_v53, %v3370_v57 }
0x36e3   : > { %v3381_v59 = vrot.slane %v9274_v58, 6 }
0x36e4   : > { %v7518_v1 = vpop.eup %7517 }
0x36e5   : > { %3649 = vrot.lane.b32.xlu1 %v7518_v1, %s7670_s20  ;;  %3382 = vrot.lane.b32.xlu0 %v3381_v59, %s7670_s20  ;;  %v7520_v26 = vpop.eup %7519 }
0x36e6   : > { %v3634_v29 = vadd.f32 1.0, %v7520_v26 }
0x36e8   : > { %7521 = vrcp.f32 %v3634_v29 }
0x36f2   : > { %v7522_v52 = vpop.eup %7521 }
0x36f3   : > { %v3647_v23 = vsub.f32 1.0, %v7522_v52  ;;  %v3658_v15 = vmul.f32 %v7522_v52, %v3656_v7 }
0x3757   : > { %v3383_v12 = vpop.permute.xlu0 %3382  ;;  %v3650_v19 = vpop.permute.xlu1 %3649 }
0x3758   : > { %6216 = vmatmul.mubr.msk.f32.vlgmr.msra.gmra.mrb[26].mxu1 %vm445_vm1, %v3383_v12  ;;  %v3652_v4 = vmul.f32 %v3650_v19, %v3647_v23 }
0x3759   : > { %7133 = vmatpush3.bf16.xpose.msk.msra.mxu1 %vm7780_vm3, %v9154_v54  ;;  %6269 = vmatprep.mubr.msk.f32.mxu1 %vm7667_vm4, %v7668_v9 }
0x375a   : > { %7134 = vmatprep.subr.bf16.mxu1 %v7666_v3  ;;  %v9308_v21 = vadd.f32 %v3658_v15, %v3652_v4 }
0x375c   : > { %v3666_v33 = vrot.slane %v9308_v21, 7  ;;  %v3774_v28 = vrot.slane %v9308_v21, 1 }
0x3761   : > { %7137 = vmatpush3.bf16.xpose.msk.msra.mxu1 %vm7780_vm3, %v9169_v61 }
0x3762   : > { %7138 = vmatprep.subr.bf16.mxu1 %v7666_v3 }
0x3769   : > { %7141 = vmatpush3.bf16.xpose.msk.msra.mxu1 %vm7780_vm3, %v9181_v31 }
0x376a   : > { %7142 = vmatprep.subr.bf16.mxu1 %v7666_v3 }
0x3771   : > { %7145 = vmatpush3.bf16.xpose.msk.msra.mxu1 %vm7780_vm3, %v9193_v10 }
0x3772   : > { %7146 = vmatprep.subr.bf16.mxu1 %v7666_v3 }
0x3779   : > { %7149 = vmatpush3.bf16.xpose.msk.msra.mxu1 %vm7780_vm3, %v9205_v13 }
0x377a   : > { %7150 = vmatprep.subr.bf16.mxu1 %v7666_v3 }
0x3781   : > { %7153 = vmatpush3.bf16.xpose.msk.msra.mxu1 %vm7780_vm3, %v9217_v35 }
0x3782   : > { %7178 = vmatprep.subr.bf16.mxu1 %v7666_v3 }
0x3788   : > { %6270 = vmatmul.mubr.msk.f32.vlgmr.msra.gmra.mrb[28].mxu1 %vm445_vm1, %v3666_v33 }
0x3789   : > { %7181 = vmatpush3.bf16.xpose.msk.msra.mxu1 %vm7780_vm3, %v9154_v54  ;;  %6323 = vmatprep.mubr.msk.f32.mxu1 %vm7667_vm4, %v7668_v9 }
0x378a   : > { %7182 = vmatprep.subr.bf16.mxu1 %v7666_v3 }
0x3791   : > { %7185 = vmatpush3.bf16.xpose.msk.msra.mxu1 %vm7780_vm3, %v9169_v61 }
0x3792   : > { %7186 = vmatprep.subr.bf16.mxu1 %v7666_v3 }
0x3799   : > { %7189 = vmatpush3.bf16.xpose.msk.msra.mxu1 %vm7780_vm3, %v9181_v31 }
0x379a   : > { %7190 = vmatprep.subr.bf16.mxu1 %v7666_v3 }
0x37a1   : > { %7193 = vmatpush3.bf16.xpose.msk.msra.mxu1 %vm7780_vm3, %v9193_v10 }
0x37a2   : > { %7194 = vmatprep.subr.bf16.mxu1 %v7666_v3 }
0x37a9   : > { %7197 = vmatpush3.bf16.xpose.msk.msra.mxu1 %vm7780_vm3, %v9205_v13 }
0x37aa   : > { %7198 = vmatprep.subr.bf16.mxu1 %v7666_v3 }
0x37b1   : > { %7201 = vmatpush3.bf16.xpose.msk.msra.mxu1 %vm7780_vm3, %v9217_v35 }
0x37b2   : > { %7226 = vmatprep.subr.bf16.mxu1 %v7666_v3 }
0x382b   : > { %v9339_v16 = vpop.f32.mrb[26].mxu1 }
0x382c   : > { %v6217_v56 = vpop.f32.mrb[27].mxu1 }
0x385b   : > { %v3735_v60 = vpop.f32.mrb[28].mxu1 }
0x385c   : > { %v3736_v36 = vadd.f32 %v9261_v30, %v3735_v60  ;;  %v6271_v37 = vpop.f32.mrb[29].mxu1 }
0x385e   : > { %v3740_v55 = vrot.slane %v3736_v36, 2 }
0x3860   : > { %3758 = vrot.lane.b32.xlu1 %v3740_v55, %s7671_s26  ;;  %3741 = vrot.lane.b32.xlu0 %v3740_v55, %s7670_s20 }
0x38d2   : > { %v3742_v38 = vpop.permute.xlu0 %3741  ;;  %v3759_v0 = vpop.permute.xlu1 %3758 }
0x38d3   : > { %v3744_v25 = vadd.f32 %v3742_v38, %v8942_v27  ;;  %v3751_v43 = vadd.f32 %v3742_v38, %v8945_v34 }
0x38d5   : > { %v5058_v48 = vmul.f32 -1.442695, %v3744_v25  ;;  %v5059_v44 = vmul.f32 -1.442695, %v3751_v43 }
0x38d7   : > { %7523 = vpow2.f32 %v5058_v48 }
0x38e1   : > { %v7524_v50 = vpop.eup %7523 }
0x38e2   : > { %v3748_v62 = vadd.f32 1.0, %v7524_v50 }
0x38e4   : > { %7525 = vrcp.f32 %v3748_v62 }
0x38ee   : > { %v7526_v46 = vpop.eup %7525 }
0x38ef   : > { %v3761_v22 = vmul.f32 %v7526_v46, %v3759_v0 }
0x38f1   : > { %3763 = vrot.lane.b32.xlu0 %v3761_v22, %s7669_s19 }
0x3963   : > { %v3764_v6 = vpop.permute.xlu0 %3763 }
0x3964   : > { %v3766_v2 = vadd.f32 %v3764_v6, %v8945_v34 }
0x3966   : > { %7527 = vtanh.f32 %v3766_v2 }
0x3967   : > { %7529 = vpow2.f32 %v5059_v44 }
0x3970   : > { %v7528_v42 = vpop.eup %7527 }
0x3971   : > { %3770 = vrot.lane.b32.xlu1 %v7528_v42, %s7670_s20  ;;  %v7530_v17 = vpop.eup %7529 }
0x3972   : > { %v3755_v51 = vadd.f32 1.0, %v7530_v17 }
0x3974   : > { %7531 = vrcp.f32 %v3755_v51 }
0x397e   : > { %v7532_v14 = vpop.eup %7531 }
0x397f   : > { %v3768_v40 = vsub.f32 1.0, %v7532_v14  ;;  %v3776_v24 = vmul.f32 %v7532_v14, %v3774_v28 }
0x39e3   : > { %v3771_v47 = vpop.permute.xlu1 %3770 }
0x39e4   : > { %v3773_v32 = vmul.f32 %v3771_v47, %v3768_v40 }
0x39e6   : > { %v9350_v49 = vadd.f32 %v3776_v24, %v3773_v32 }
0x39e8   : > { %v3784_v53 = vrot.slane %v9350_v49, 6  ;;  %v3892_v25 = vrot.slane %v9350_v49, 1 }
0x39ea   : > { %6297 = vmatmul.mubr.msk.f32.vlgmr.msra.gmra.mrb[26].mxu0 %vm445_vm1, %v3784_v53 }
0x39eb   : > { %7205 = vmatpush3.bf16.xpose.msk.msra.mxu0 %vm7780_vm3, %v9154_v54  ;;  %6350 = vmatprep.mubr.msk.f32.mxu0 %vm7667_vm4, %v7668_v9 }
0x39ec   : > { %7206 = vmatprep.subr.bf16.mxu0 %v7666_v3 }
0x39f3   : > { %7209 = vmatpush3.bf16.xpose.msk.msra.mxu0 %vm7780_vm3, %v9169_v61 }
0x39f4   : > { %7210 = vmatprep.subr.bf16.mxu0 %v7666_v3 }
0x39fb   : > { %7213 = vmatpush3.bf16.xpose.msk.msra.mxu0 %vm7780_vm3, %v9181_v31 }
0x39fc   : > { %7214 = vmatprep.subr.bf16.mxu0 %v7666_v3 }
0x3a03   : > { %7217 = vmatpush3.bf16.xpose.msk.msra.mxu0 %vm7780_vm3, %v9193_v10 }
0x3a04   : > { %7218 = vmatprep.subr.bf16.mxu0 %v7666_v3 }
0x3a0b   : > { %7221 = vmatpush3.bf16.xpose.msk.msra.mxu0 %vm7780_vm3, %v9205_v13 }
0x3a0c   : > { %7222 = vmatprep.subr.bf16.mxu0 %v7666_v3 }
0x3a13   : > { %7225 = vmatpush3.bf16.xpose.msk.msra.mxu0 %vm7780_vm3, %v9217_v35 }
0x3a14   : > { %7250 = vmatprep.subr.bf16.mxu0 %v7666_v3 }
0x3abd   : > { %v3853_v57 = vpop.f32.mrb[26].mxu0 }
0x3abe   : > { %v3854_v59 = vadd.f32 %v9261_v30, %v3853_v57  ;;  %v6298_v1 = vpop.f32.mrb[27].mxu0 }
0x3ac0   : > { %v3858_v63 = vrot.slane %v3854_v59, 3 }
0x3ac2   : > { %3876 = vrot.lane.b32.xlu1 %v3858_v63, %s7671_s26  ;;  %3859 = vrot.lane.b32.xlu0 %v3858_v63, %s7670_s20 }
0x3b34   : > { %v3860_v12 = vpop.permute.xlu0 %3859  ;;  %v3877_v23 = vpop.permute.xlu1 %3876 }
0x3b35   : > { %v3862_v5 = vadd.f32 %v3860_v12, %v8942_v27  ;;  %v3869_v56 = vadd.f32 %v3860_v12, %v8945_v34 }
0x3b37   : > { %v5073_v26 = vmul.f32 -1.442695, %v3862_v5  ;;  %v5074_v60 = vmul.f32 -1.442695, %v3869_v56 }
0x3b39   : > { %7533 = vpow2.f32 %v5073_v26 }
0x3b43   : > { %v7534_v29 = vpop.eup %7533 }
0x3b44   : > { %v3866_v52 = vadd.f32 1.0, %v7534_v29 }
0x3b46   : > { %7535 = vrcp.f32 %v3866_v52 }
0x3b50   : > { %v7536_v19 = vpop.eup %7535 }
0x3b51   : > { %v3879_v7 = vmul.f32 %v7536_v19, %v3877_v23 }
0x3b53   : > { %3881 = vrot.lane.b32.xlu0 %v3879_v7, %s7669_s19 }
0x3bc5   : > { %v3882_v4 = vpop.permute.xlu0 %3881 }
0x3bc6   : > { %v3884_v15 = vadd.f32 %v3882_v4, %v8945_v34 }
0x3bc8   : > { %7537 = vtanh.f32 %v3884_v15 }
0x3bc9   : > { %7539 = vpow2.f32 %v5074_v60 }
0x3bd2   : > { %v7538_v33 = vpop.eup %7537 }
0x3bd3   : > { %3888 = vrot.lane.b32.xlu1 %v7538_v33, %s7670_s20  ;;  %v7540_v36 = vpop.eup %7539 }
0x3bd4   : > { %v3873_v37 = vadd.f32 1.0, %v7540_v36 }
0x3bd6   : > { %7541 = vrcp.f32 %v3873_v37 }
0x3be0   : > { %v7542_v55 = vpop.eup %7541 }
0x3be1   : > { %v3886_v38 = vsub.f32 1.0, %v7542_v55  ;;  %v3894_v50 = vmul.f32 %v7542_v55, %v3892_v25 }
0x3c45   : > { %v3889_v48 = vpop.permute.xlu1 %3888 }
0x3c46   : > { %v3891_v62 = vmul.f32 %v3889_v48, %v3886_v38 }
0x3c48   : > { %v9389_v46 = vadd.f32 %v3894_v50, %v3891_v62 }
0x3c4a   : > { %v3902_v0 = vrot.slane %v9389_v46, 5  ;;  %v4010_v26 = vrot.slane %v9389_v46, 1 }
0x3c4c   : > { %6324 = vmatmul.mubr.msk.f32.vlgmr.msra.gmra.mrb[30].mxu1 %vm445_vm1, %v3902_v0 }
0x3c4d   : > { %7229 = vmatpush3.bf16.xpose.msk.msra.mxu1 %vm7780_vm3, %v9154_v54  ;;  %6377 = vmatprep.mubr.msk.f32.mxu1 %vm7667_vm4, %v7668_v9 }
0x3c4e   : > { %7230 = vmatprep.subr.bf16.mxu1 %v7666_v3 }
0x3c55   : > { %7233 = vmatpush3.bf16.xpose.msk.msra.mxu1 %vm7780_vm3, %v9169_v61 }
0x3c56   : > { %7234 = vmatprep.subr.bf16.mxu1 %v7666_v3 }
0x3c5d   : > { %7237 = vmatpush3.bf16.xpose.msk.msra.mxu1 %vm7780_vm3, %v9181_v31 }
0x3c5e   : > { %7238 = vmatprep.subr.bf16.mxu1 %v7666_v3 }
0x3c65   : > { %7241 = vmatpush3.bf16.xpose.msk.msra.mxu1 %vm7780_vm3, %v9193_v10 }
0x3c66   : > { %7242 = vmatprep.subr.bf16.mxu1 %v7666_v3 }
0x3c6d   : > { %7245 = vmatpush3.bf16.xpose.msk.msra.mxu1 %vm7780_vm3, %v9205_v13 }
0x3c6e   : > { %7246 = vmatprep.subr.bf16.mxu1 %v7666_v3 }
0x3c75   : > { %7249 = vmatpush3.bf16.xpose.msk.msra.mxu1 %vm7780_vm3, %v9217_v35 }
0x3c76   : > { %7274 = vmatprep.subr.bf16.mxu1 %v7666_v3 }
0x3d1f   : > { %v3971_v22 = vpop.f32.mrb[30].mxu1 }
0x3d20   : > { %v3972_v6 = vadd.f32 %v9261_v30, %v3971_v22  ;;  %v6325_v2 = vpop.f32.mrb[31].mxu1 }
0x3d22   : > { %v3976_v42 = vrot.slane %v3972_v6, 4 }
0x3d24   : > { %3994 = vrot.lane.b32.xlu1 %v3976_v42, %s7671_s26  ;;  %3977 = vrot.lane.b32.xlu0 %v3976_v42, %s7670_s20 }
0x3d96   : > { %v3978_v43 = vpop.permute.xlu0 %3977  ;;  %v3995_v28 = vpop.permute.xlu1 %3994 }
0x3d97   : > { %v3980_v44 = vadd.f32 %v3978_v43, %v8942_v27  ;;  %v3987_v57 = vadd.f32 %v3978_v43, %v8945_v34 }
0x3d99   : > { %v5088_v17 = vmul.f32 -1.442695, %v3980_v44  ;;  %v5089_v59 = vmul.f32 -1.442695, %v3987_v57 }
0x3d9b   : > { %7543 = vpow2.f32 %v5088_v17 }
0x3da5   : > { %v7544_v51 = vpop.eup %7543 }
0x3da6   : > { %v3984_v14 = vadd.f32 1.0, %v7544_v51 }
0x3da8   : > { %7545 = vrcp.f32 %v3984_v14 }
0x3db2   : > { %v7546_v40 = vpop.eup %7545 }
0x3db3   : > { %v3997_v47 = vmul.f32 %v7546_v40, %v3995_v28 }
0x3db5   : > { %3999 = vrot.lane.b32.xlu0 %v3997_v47, %s7669_s19 }
0x3e27   : > { %v4000_v24 = vpop.permute.xlu0 %3999 }
0x3e28   : > { %v4002_v32 = vadd.f32 %v4000_v24, %v8945_v34 }
0x3e2a   : > { %7547 = vtanh.f32 %v4002_v32 }
0x3e2b   : > { %7549 = vpow2.f32 %v5089_v59 }
0x3e34   : > { %v7548_v53 = vpop.eup %7547 }
0x3e35   : > { %4006 = vrot.lane.b32.xlu1 %v7548_v53, %s7670_s20  ;;  %v7550_v1 = vpop.eup %7549 }
0x3e36   : > { %v3991_v63 = vadd.f32 1.0, %v7550_v1 }
0x3e38   : > { %7551 = vrcp.f32 %v3991_v63 }
0x3e42   : > { %v7552_v12 = vpop.eup %7551 }
0x3e43   : > { %v4004_v5 = vsub.f32 1.0, %v7552_v12  ;;  %v4012_v52 = vmul.f32 %v7552_v12, %v4010_v26 }
0x3ea7   : > { %v4007_v29 = vpop.permute.xlu1 %4006 }
0x3ea8   : > { %v4009_v19 = vmul.f32 %v4007_v29, %v4004_v5 }
0x3eaa   : > { %v9428_v23 = vadd.f32 %v4012_v52, %v4009_v19 }
0x3eac   : > { %v4020_v7 = vrot.slane %v9428_v23, 4  ;;  %v4128_v51 = vrot.slane %v9428_v23, 1 }
0x3eae   : > { %6351 = vmatmul.mubr.msk.f32.vlgmr.msra.gmra.mrb[28].mxu0 %vm445_vm1, %v4020_v7 }
0x3eaf   : > { %7253 = vmatpush3.bf16.xpose.msk.msra.mxu0 %vm7780_vm3, %v9154_v54  ;;  %6404 = vmatprep.mubr.msk.f32.mxu0 %vm7667_vm4, %v7668_v9 }
0x3eb0   : > { %7254 = vmatprep.subr.bf16.mxu0 %v7666_v3 }
0x3eb7   : > { %7257 = vmatpush3.bf16.xpose.msk.msra.mxu0 %vm7780_vm3, %v9169_v61 }
0x3eb8   : > { %7258 = vmatprep.subr.bf16.mxu0 %v7666_v3 }
0x3ebf   : > { %7261 = vmatpush3.bf16.xpose.msk.msra.mxu0 %vm7780_vm3, %v9181_v31 }
0x3ec0   : > { %7262 = vmatprep.subr.bf16.mxu0 %v7666_v3 }
0x3ec7   : > { %7265 = vmatpush3.bf16.xpose.msk.msra.mxu0 %vm7780_vm3, %v9193_v10 }
0x3ec8   : > { %7266 = vmatprep.subr.bf16.mxu0 %v7666_v3 }
0x3ecf   : > { %7269 = vmatpush3.bf16.xpose.msk.msra.mxu0 %vm7780_vm3, %v9205_v13 }
0x3ed0   : > { %7270 = vmatprep.subr.bf16.mxu0 %v7666_v3 }
0x3ed7   : > { %7273 = vmatpush3.bf16.xpose.msk.msra.mxu0 %vm7780_vm3, %v9217_v35 }
0x3f81   : > { %v4089_v4 = vpop.f32.mrb[28].mxu0 }
0x3f82   : > { %v4090_v15 = vadd.f32 %v9261_v30, %v4089_v4  ;;  %v6352_v33 = vpop.f32.mrb[29].mxu0 }
0x3f84   : > { %v4094_v56 = vrot.slane %v4090_v15, 5 }
0x3f86   : > { %4112 = vrot.lane.b32.xlu1 %v4094_v56, %s7671_s26  ;;  %4095 = vrot.lane.b32.xlu0 %v4094_v56, %s7670_s20 }
0x3ff8   : > { %v4096_v60 = vpop.permute.xlu0 %4095  ;;  %v4113_v48 = vpop.permute.xlu1 %4112 }
0x3ff9   : > { %v4098_v36 = vadd.f32 %v4096_v60, %v8942_v27  ;;  %v4105_v6 = vadd.f32 %v4096_v60, %v8945_v34 }
0x3ffb   : > { %v5103_v37 = vmul.f32 -1.442695, %v4098_v36  ;;  %v5104_v2 = vmul.f32 -1.442695, %v4105_v6 }
0x3ffd   : > { %7553 = vpow2.f32 %v5103_v37 }
0x4007   : > { %v7554_v55 = vpop.eup %7553 }
0x4008   : > { %v4102_v38 = vadd.f32 1.0, %v7554_v55 }
0x400a   : > { %7555 = vrcp.f32 %v4102_v38 }
0x4014   : > { %v7556_v25 = vpop.eup %7555 }
0x4015   : > { %v4115_v50 = vmul.f32 %v7556_v25, %v4113_v48 }
0x4017   : > { %4117 = vrot.lane.b32.xlu0 %v4115_v50, %s7669_s19 }
0x4089   : > { %v4118_v62 = vpop.permute.xlu0 %4117 }
0x408a   : > { %v4120_v0 = vadd.f32 %v4118_v62, %v8945_v34 }
0x408c   : > { %7557 = vtanh.f32 %v4120_v0 }
0x408d   : > { %7559 = vpow2.f32 %v5104_v2 }
0x4096   : > { %v7558_v22 = vpop.eup %7557 }
0x4097   : > { %4124 = vrot.lane.b32.xlu1 %v7558_v22, %s7670_s20  ;;  %v7560_v42 = vpop.eup %7559 }
0x4098   : > { %v4109_v43 = vadd.f32 1.0, %v7560_v42 }
0x409a   : > { %7561 = vrcp.f32 %v4109_v43 }
0x40a4   : > { %v7562_v44 = vpop.eup %7561 }
0x40a5   : > { %v4122_v17 = vsub.f32 1.0, %v7562_v44  ;;  %v4130_v40 = vmul.f32 %v7562_v44, %v4128_v51  ;;  %v7601_v44 = vld [vmem:[%s9642_s4 + $0x2] sm:$0x1] }
0x4109   : > { %v4125_v14 = vpop.permute.xlu1 %4124 }
0x410a   : > { %v4127_v28 = vmul.f32 %v4125_v14, %v4122_v17  ;;  %v3453_v17 = vadd.f32 %v7601_v44, %v9339_v16 }
0x410c   : > { %v9466_v47 = vadd.f32 %v4130_v40, %v4127_v28  ;;  %v3457_v14 = vrot.slane %v3453_v17, 1 }
0x410e   : > { %v4138_v24 = vrot.slane %v9466_v47, 3  ;;  %v4246_v7 = vrot.slane %v9466_v47, 1 }
0x4110   : > { %6378 = vmatmul.mubr.msk.f32.vlgmr.msra.gmra.mrb[32].mxu1 %vm445_vm1, %v4138_v24  ;;  %v3459_v24 = vadd.f32 %v3457_v14, %v8942_v27 }
0x4111   : > { %7277 = vmatpush3.bf16.xpose.msk.msra.mxu1 %vm7780_vm3, %v9154_v54  ;;  %6431 = vmatprep.mubr.msk.f32.mxu1 %vm7667_vm4, %v7668_v9  ;;  %vm3379_vm4 = vcmask 784902  }
0x4112   : > { %7278 = vmatprep.subr.bf16.mxu1 %v7666_v3 }
0x4119   : > { %7281 = vmatpush3.bf16.xpose.msk.msra.mxu1 %vm7780_vm3, %v9169_v61 }
0x411a   : > { %7282 = vmatprep.subr.bf16.mxu1 %v7666_v3 }
0x4121   : > { %7285 = vmatpush3.bf16.xpose.msk.msra.mxu1 %vm7780_vm3, %v9181_v31 }
0x4122   : > { %7286 = vmatprep.subr.bf16.mxu1 %v7666_v3 }
0x4129   : > { %7289 = vmatpush3.bf16.xpose.msk.msra.mxu1 %vm7780_vm3, %v9193_v10 }
0x412a   : > { %7290 = vmatprep.subr.bf16.mxu1 %v7666_v3 }
0x4131   : > { %7293 = vmatpush3.bf16.xpose.msk.msra.mxu1 %vm7780_vm3, %v9205_v13 }
0x4132   : > { %7294 = vmatprep.subr.bf16.mxu1 %v7666_v3 }
0x4139   : > { %7297 = vmatpush3.bf16.xpose.msk.msra.mxu1 %vm7780_vm3, %v9217_v35  ;;  %vm3157_vm3 = vcmask 782852  }
0x41e3   : > { %v4207_v9 = vpop.f32.mrb[32].mxu1 }
0x41e4   : > { %v4208_v54 = vadd.f32 %v9261_v30, %v4207_v9  ;;  %v6379_v61 = vpop.f32.mrb[33].mxu1  ;;  %v5015_v9 = vmul.f32 -1.442695, %v3459_v24 }
0x41e6   : > { %v4212_v31 = vrot.slane %v4208_v54, 6 }
0x41e8   : > { %4230 = vrot.lane.b32.xlu1 %v4212_v31, %s7671_s26  ;;  %4213 = vrot.lane.b32.xlu0 %v4212_v31, %s7670_s20 }
0x425a   : > { %v4214_v10 = vpop.permute.xlu0 %4213  ;;  %v4231_v8 = vpop.permute.xlu1 %4230 }
0x425b   : > { %v4216_v32 = vadd.f32 %v4214_v10, %v8942_v27  ;;  %v4223_v12 = vadd.f32 %v4214_v10, %v8945_v34 }
0x425d   : > { %v5118_v53 = vmul.f32 -1.442695, %v4216_v32  ;;  %v5119_v5 = vmul.f32 -1.442695, %v4223_v12 }
0x425f   : > { %7563 = vpow2.f32 %v5118_v53 }
0x4269   : > { %v7564_v13 = vpop.eup %7563 }
0x426a   : > { %v4220_v3 = vadd.f32 1.0, %v7564_v13 }
0x426c   : > { %7565 = vrcp.f32 %v4220_v3 }
0x4276   : > { %v7566_v57 = vpop.eup %7565 }
0x4277   : > { %v4233_v35 = vmul.f32 %v7566_v57, %v4231_v8 }
0x4279   : > { %4235 = vrot.lane.b32.xlu0 %v4233_v35, %s7669_s19 }
0x42eb   : > { %v4236_v59 = vpop.permute.xlu0 %4235 }
0x42ec   : > { %v4238_v1 = vadd.f32 %v4236_v59, %v8945_v34 }
0x42ee   : > { %7567 = vtanh.f32 %v4238_v1 }
0x42ef   : > { %7569 = vpow2.f32 %v5119_v5 }
0x42f8   : > { %v7568_v63 = vpop.eup %7567 }
0x42f9   : > { %4242 = vrot.lane.b32.xlu1 %v7568_v63, %s7670_s20  ;;  %v7570_v26 = vpop.eup %7569 }
0x42fa   : > { %v4227_v29 = vadd.f32 1.0, %v7570_v26 }
0x42fc   : > { %7571 = vrcp.f32 %v4227_v29 }
0x4306   : > { %v7572_v52 = vpop.eup %7571 }
0x4307   : > { %v4240_v19 = vsub.f32 1.0, %v7572_v52  ;;  %v4248_v15 = vmul.f32 %v7572_v52, %v4246_v7 }
0x436b   : > { %v4243_v4 = vpop.permute.xlu1 %4242 }
0x436c   : > { %v4245_v33 = vmul.f32 %v4243_v4, %v4240_v19 }
0x436e   : > { %v9504_v56 = vadd.f32 %v4248_v15, %v4245_v33 }
0x4370   : > { %v4256_v60 = vrot.slane %v9504_v56, 2  ;;  %v4364_v53 = vrot.slane %v9504_v56, 1 }
0x4372   : > { %6405 = vmatmul.mubr.msk.f32.vlgmr.msra.gmra.mrb[30].mxu0 %vm445_vm1, %v4256_v60 }
0x4445   : > { %v4325_v36 = vpop.f32.mrb[30].mxu0 }
0x4446   : > { %v4326_v37 = vadd.f32 %v9261_v30, %v4325_v36  ;;  %v6406_v55 = vpop.f32.mrb[31].mxu0 }
0x4448   : > { %v4330_v38 = vrot.slane %v4326_v37, 7 }
0x444a   : > { %4348 = vrot.lane.b32.xlu1 %v4330_v38, %s7671_s26  ;;  %4331 = vrot.lane.b32.xlu0 %v4330_v38, %s7670_s20 }
0x44bc   : > { %v4332_v25 = vpop.permute.xlu0 %4331  ;;  %v4349_v6 = vpop.permute.xlu1 %4348 }
0x44bd   : > { %v4334_v48 = vadd.f32 %v4332_v25, %v8942_v27  ;;  %v4341_v40 = vadd.f32 %v4332_v25, %v8945_v34  ;;  %v3482_v25 = vrot.slane %v9274_v58, 7 }
0x44bf   : > { %v5133_v50 = vmul.f32 -1.442695, %v4334_v48  ;;  %v5134_v28 = vmul.f32 -1.442695, %v4341_v40 }
0x44c1   : > { %7573 = vpow2.f32 %v5133_v50 }
0x44cb   : > { %v7574_v62 = vpop.eup %7573 }
0x44cc   : > { %v4338_v0 = vadd.f32 1.0, %v7574_v62 }
0x44ce   : > { %7575 = vrcp.f32 %v4338_v0 }
0x44d8   : > { %v7576_v22 = vpop.eup %7575 }
0x44d9   : > { %v4351_v2 = vmul.f32 %v7576_v22, %v4349_v6 }
0x44db   : > { %4353 = vrot.lane.b32.xlu0 %v4351_v2, %s7669_s19 }
0x454d   : > { %v4354_v42 = vpop.permute.xlu0 %4353 }
0x454e   : > { %v4356_v43 = vadd.f32 %v4354_v42, %v8945_v34 }
0x4550   : > { %7577 = vtanh.f32 %v4356_v43 }
0x4551   : > { %7579 = vpow2.f32 %v5134_v28 }
0x4552   : > { %7581 = vpow2.f32 %v5015_v9 }
0x455a   : > { %v7578_v51 = vpop.eup %7577 }
0x455b   : > { %4360 = vrot.lane.b32.xlu1 %v7578_v51, %s7670_s20  ;;  %v7580_v54 = vpop.eup %7579 }
0x455c   : > { %v4345_v61 = vadd.f32 1.0, %v7580_v54  ;;  %v7582_v31 = vpop.eup %7581 }
0x455d   : > { %v3463_v10 = vadd.f32 1.0, %v7582_v31 }
0x455e   : > { %7583 = vrcp.f32 %v4345_v61 }
0x455f   : > { %3466 = vrot.lane.b32.xlu1 %v3457_v14, %s7669_s19  ;;  %7585 = vrcp.f32 %v3463_v10 }
0x4568   : > { %v7584_v16 = vpop.eup %7583 }
0x4569   : > { %v4358_v32 = vsub.f32 1.0, %v7584_v16  ;;  %v4366_v3 = vmul.f32 %v7584_v16, %v4364_v53  ;;  %v7586_v35 = vpop.eup %7585 }
0x456a   : > { %v3484_v50 = vmul.f32 %v7586_v35, %v3482_v25 }
0x45cd   : > { %v4361_v13 = vpop.permute.xlu1 %4360 }
0x45ce   : > { %v4363_v57 = vmul.f32 %v4361_v13, %v4358_v32 }
0x45d0   : > { %v9523_v8 = vadd.f32 %v4366_v3, %v4363_v57 }
0x45d1   : > { %v3467_v59 = vpop.permute.xlu1 %3466 }
0x45d2   : > { %v4374_v1 = vrot.slane %v9523_v8, 1  ;;  %v3469_v63 = vmul.f32 %v7586_v35, %v3467_v59 }
0x45d4   : > { %6432 = vmatmul.mubr.msk.f32.vlgmr.msra.gmra.mrb[34].mxu1 %vm445_vm1, %v4374_v1  ;;  %3471 = vrot.lane.b32.xlu1 %v3469_v63, %s7669_s19  ;;  %vm2935_vm1 = vcmask 780802  }
0x4646   : > { %v3472_v12 = vpop.permute.xlu1 %3471 }
0x4647   : > { %v3474_v5 = vadd.f32 %v3472_v12, %v8942_v27 }
0x4649   : > { %7587 = vtanh.f32 %v3474_v5 }
0x4653   : > { %v7588_v26 = vpop.eup %7587 }
0x4654   : > { %3478 = vrot.lane.b32.xlu1 %v7588_v26, %s7670_s20 }
0x4658   : > { %2711 = vrot.lane.b32.xlu1 %v8954_v45, %s7671_s26 }
0x465c   : > { %2932 = vrot.lane.b32.xlu1 %v9030_v41, %s7671_s26 }
0x4660   : > { %3154 = vrot.lane.b32.xlu1 %v9106_v39, %s7671_s26 }
0x4664   : > { %3376 = vrot.lane.b32.xlu1 %v9274_v58, %s7671_s26 }
0x4668   : > { %3661 = vrot.lane.b32.xlu1 %v9308_v21, %s7670_s20 }
0x466c   : > { %3897 = vrot.lane.b32.xlu1 %v9389_v46, %s7670_s20 }
0x4670   : > { %4133 = vrot.lane.b32.xlu1 %v9466_v47, %s7670_s20 }
0x4674   : > { %4369 = vrot.lane.b32.xlu1 %v9523_v8, %s7670_s20 }
0x46a7   : > { %v4443_v45 = vpop.f32.mrb[34].mxu1 }
0x46a8   : > { %v4444_v41 = vadd.f32 %v9261_v30, %v4443_v45  ;;  %v6433_v39 = vpop.f32.mrb[35].mxu1 }
0x46aa   : > { %4448 = vrot.lane.b32.xlu0 %v4444_v41, %s7670_s20 }
0x46ae   : > { %4465 = vrot.lane.b32.xlu0 %v4444_v41, %s7671_s26 }
0x46c6   : > { %v3479_v21 = vpop.permute.xlu1 %3478 }
0x46ca   : > { %v2712_v29 = vpop.permute.xlu1 %2711 }
0x46cb   : > { %2715 = vst.msk [vmem:[%s8051_s9] sm:$0x1] %vm2714_vm0, %v2712_v29 }
0x46ce   : > { %v2933_v46 = vpop.permute.xlu1 %2932 }
0x46cf   : > { %2936 = vst.msk [vmem:[%s8051_s9] sm:$0x4] %vm2935_vm1, %v2933_v46 }
0x46d2   : > { %v3155_v47 = vpop.permute.xlu1 %3154 }
0x46d3   : > { %3158 = vst.msk [vmem:[%s8051_s9] sm:$0x10] %vm3157_vm3, %v3155_v47 }
0x46d6   : > { %v3377_v52 = vpop.permute.xlu1 %3376 }
0x46d7   : > { %3380 = vst.msk [vmem:[%s8051_s9] sm:$0x40] %vm3379_vm4, %v3377_v52 }
0x471c   : > { %v4449_v30 = vpop.permute.xlu0 %4448 }
0x471d   : > { %v4451_v19 = vadd.f32 %v4449_v30, %v8942_v27  ;;  %v3476_v27 = vsub.f32 1.0, %v7586_v35 }
0x471f   : > { %v5148_v7 = vmul.f32 -1.442695, %v4451_v19  ;;  %v3481_v48 = vmul.f32 %v3479_v21, %v3476_v27 }
0x4720   : > { %v4466_v60 = vpop.permute.xlu0 %4465 }
0x4721   : > { %7589 = vpow2.f32 %v5148_v7  ;;  %v3485_v62 = vadd.f32 %v3484_v50, %v3481_v48 }
0x472b   : > { %v7590_v4 = vpop.eup %7589 }
0x472c   : > { %v4455_v15 = vadd.f32 1.0, %v7590_v4 }
0x472e   : > { %7591 = vrcp.f32 %v4455_v15 }
0x4738   : > { %v7592_v33 = vpop.eup %7591 }
0x4739   : > { %v4468_v36 = vmul.f32 %v7592_v33, %v4466_v60 }
0x473b   : > { %4470 = vrot.lane.b32.xlu0 %v4468_v36, %s7669_s19  ;;  %s5151_s19 = sshll.u32 %s7729_s25, 7  ;;  %s7672_s25 = smov [#allocation2]  }
0x473c   : > { %s9593_s29 = scalar_lea.hbm %s9644_s6, %s5151_s19  ;;  %s7606_s12 = sshll.u32 %s7672_s25, 4  ;;  %s7607_s12 = int_to_ptr.vmem [resolvable:$false] %s7606_s12 }
0x473d   : > { %s7608_s13 = scalar_lea.vmem %s7607_s12, 256 }
0x47ad   : > { %v4471_v37 = vpop.permute.xlu0 %4470 }
0x47ae   : > { %v4473_v55 = vadd.f32 %v4471_v37, %v8945_v34 }
0x47b0   : > { %7593 = vtanh.f32 %v4473_v55 }
0x47ba   : > { %v7594_v38 = vpop.eup %7593 }
0x47bb   : > { %4477 = vrot.lane.b32.xlu0 %v7594_v38, %s7670_s20 }
0x47bf   : > { %2821 = vrot.lane.b32.xlu0 %v8992_v20, %s7671_s26  ;;  %v4458_v20 = vadd.f32 %v4449_v30, %v8945_v34 }
0x47c3   : > { %3043 = vrot.lane.b32.xlu0 %v9068_v11, %s7671_s26  ;;  %v5149_v11 = vmul.f32 -1.442695, %v4458_v20 }
0x47c5   : > { %7595 = vpow2.f32 %v5149_v11 }
0x47c7   : > { %3265 = vrot.lane.b32.xlu0 %v9144_v18, %s7671_s26  ;;  %v3662_v18 = vpop.permute.xlu1 %3661 }
0x47cb   : > { %3487 = vrot.lane.b32.xlu0 %v3485_v62, %s7671_s26  ;;  %v3898_v22 = vpop.permute.xlu1 %3897 }
0x47cf   : > { %3779 = vrot.lane.b32.xlu0 %v9350_v49, %s7670_s20  ;;  %v7596_v58 = vpop.eup %7595  ;;  %v4134_v2 = vpop.permute.xlu1 %4133 }
0x47d0   : > { %v4462_v0 = vadd.f32 1.0, %v7596_v58 }
0x47d2   : > { %7597 = vrcp.f32 %v4462_v0 }
0x47d3   : > { %4015 = vrot.lane.b32.xlu0 %v9428_v23, %s7670_s20  ;;  %v4370_v44 = vpop.permute.xlu1 %4369 }
0x47d7   : > { %4251 = vrot.lane.b32.xlu0 %v9504_v56, %s7670_s20 }
0x47dc   : > { %v7598_v6 = vpop.eup %7597 }
0x47dd   : > { %v4475_v49 = vsub.f32 1.0, %v7598_v6  ;;  %v4482_v56 = vmul.f32 %v7598_v6, %v4374_v1 }
0x482d   : > { %v4478_v23 = vpop.permute.xlu0 %4477 }
0x482e   : > { %v4480_v42 = vmul.f32 %v4478_v23, %v4475_v49 }
0x4830   : > { %v4483_v34 = vadd.f32 %v4482_v56, %v4480_v42 }
0x4831   : > { %v2822_v43 = vpop.permute.xlu0 %2821 }
0x4832   : > { %2825 = vst.msk [vmem:[%s8051_s9] sm:$0x2] %vm2824_vm9, %v2822_v43  ;;  %4485 = vrot.lane.b32.xlu0 %v4483_v34, %s7670_s20  ;;  %s4504_s20 = sshll.u32 %s8051_s9, 4  ;;  %s9595_s20 = int_to_ptr.vmem [resolvable:$true] %s4504_s20 }
0x4833   : > { %4373 = vst.msk [vmem:[%s8051_s9] sm:$0x2] %vm4372_vm10, %v4370_v44  ;;  %s7602_s11 = scalar_lea.vmem %s9595_s20, 128  ;;  %p7609_p0 = scmp.lt.s32.totalorder %s9595_s20, %s7607_s12 }
0x4834   : > { %p7603_p11 = scmp.ne.s32.totalorder %s9595_s20, %s7602_s11  ;;  %p7610_p1 = scmp.lt.s32.totalorder %s7608_s13, %s7602_s11 }
0x4835   : > { %v3044_v17 = vpop.permute.xlu0 %3043 }
0x4836   : > { %3047 = vst.msk [vmem:[%s8051_s9] sm:$0x8] %vm3046_vm11, %v3044_v17  ;;  %p7604_p12 = pnand %p7603_p11, %p7746_p5  ;;  %p7611_p2 = por %p7610_p1, %p7609_p0 }
0x4837   : > { %4137 = vst.msk [vmem:[%s8051_s9] sm:$0x8] %vm4136_vm12, %v4134_v2 }
0x4838   : > { %p7605_p13 = pneg %p7604_p12 }
0x4839   : > { %v3266_v51 = vpop.permute.xlu0 %3265 }
0x483a   : > { %3269 = vst.msk [vmem:[%s8051_s9] sm:$0x20] %vm3268_vm13, %v3266_v51  ;;  %p7612_p3 = pnand %p7611_p2, %p7605_p13 }
0x483b   : > { %3901 = vst.msk [vmem:[%s8051_s9] sm:$0x20] %vm3900_vm14, %v3898_v22 }
0x483d   : > { %v3488_v14 = vpop.permute.xlu0 %3487 }
0x483e   : > { %3491 = vst.msk [vmem:[%s8051_s9] sm:$0x80] %vm3490_vm15, %v3488_v14 }
0x483f   : > { %3665 = vst.msk [vmem:[%s8051_s9] sm:$0x80] %vm3664_vm2, %v3662_v18 }
0x4841   : > { %v3780_v40 = vpop.permute.xlu0 %3779 }
0x4842   : > { %3783 = vst.msk [vmem:[%s8051_s9] sm:$0x40] %vm3782_vm5, %v3780_v40 }
0x4845   : > { %v4016_v28 = vpop.permute.xlu0 %4015 }
0x4846   : > { %4019 = vst.msk [vmem:[%s8051_s9] sm:$0x10] %vm4018_vm6, %v4016_v28 }
0x4849   : > { %v4252_v24 = vpop.permute.xlu0 %4251 }
0x484a   : > { %4255 = vst.msk [vmem:[%s8051_s9] sm:$0x4] %vm4254_vm7, %v4252_v24 }
0x48a4   : > { %v4486_v9 = vpop.permute.xlu0 %4485 }
0x48a5   : > { %4489 = vst.msk [vmem:[%s8051_s9] sm:$0x1] %vm4488_vm8, %v4486_v9 }
0x48a6   : > { %7615 = shalt.err (!%p7612_p3)
}
0x48a7   : > { %s7616_s28 = scalar_lea.hbm %s9593_s29, 128  ;;  %s7620_s15 = scalar_lea.hbm %s9644_s6, 256 }
0x48a8   : > { %p7617_p4 = scmp.ne.s32.totalorder %s9593_s29, %s7616_s28  ;;  %p7621_p9 = scmp.lt.u32.totalorder %s9593_s29, %s9644_s6 }
0x48a9   : > { %p7622_p10 = scmp.lt.u32.totalorder %s7620_s15, %s7616_s28  ;;  %p7624_p12 = scmp.lt.u32.totalorder %s7616_s28, %s9593_s29 }
0x48aa   : > { %p7618_p7 = pnand %p7617_p4, %p7746_p5 }
0x48ab   : > { %p7623_p11 = por %p7622_p10, %p7621_p9 }
0x48ac   : > { %p7619_p8 = pneg %p7618_p7 }
0x48ad   : > { %p7625_p13 = por %p7624_p12, %p7623_p11 }
0x48af   : > { %p7626_p0 = pnand %p7625_p13, %p7619_p8 }
0x48b1   : > { %7629 = shalt.err (!%p7626_p0)
}
0x48b2   : > { %7298 = dma.vmem_to_hbm [thread:$0]  (%p7746_p5), %s9595_s20, 128, %s9593_s29, %s4491_s10  }
0x48b3 PF: > { %p7304_p1 = scmp.ge.s32.totalorder %s7664_s24, 2  ;;  %s4516_s19 = sand.u32 1, %s7652_s21  }
0x48b4   : > { %s4517_s26 = scalar_lea.sflag [#allocation3], %s4516_s19 }
0x48b5   : > { %p7301_p2 = pnand %p7304_p1, %p7750_p6 }
0x48b7   : > { %7647 = dma.done.wait (!%p7301_p2), %s4517_s26, 128  }
0x48b8   : > { %7649 = vsyncadd (!%p7301_p2), %s4517_s26, 4294967168  ;;  %p16_p3 = scmp.ge.s32.totalorder %s7733_s27, 4   ;;  %s9651_s21 = smov %s7656_s22 }
0x48b9   : > { %s9652_s22 = smov %s7660_s23  ;;  %s9653_s23 = smov %s7744_s30 }
0x48ba   : > { %s9654_s24 = smov %s7733_s27  ;;  %18 = sbr.rel (!%p16_p3) target bundleno = 3 (0x3), region = 90 }
0x48c1   :  { %4522 = vsyncpa [#allocation3], 1 }
0x48c2   :  { %4524 = vsyncpa [#allocation3 + $0x1], 1 }

</bundles_post_ra>
